<compile_context>
chip_gen: v6e
topology: v6e:2x2x1
jax: 0.10.0
libtpu: 0.0.40
codegen_flags: <defaults>
</compile_context>

<pallas_src>
import functools
import math

import jax
import jax.numpy as jnp
from jax import lax
from jax.experimental import pallas as pl
from jax.experimental.pallas import tpu as pltpu


def _round_up(x, m):
    return ((x + m - 1) // m) * m


def _tensorcores_per_chip():
    """2 for dual-TC / megacore chips (v4, v5p, v7x); 1 for v5e / v6e."""
    try:
        kind = jax.devices()[0].device_kind.lower()
    except Exception:
        return 1
    if "lite" in kind or "v5e" in kind or "v6e" in kind or "v6" in kind:
        return 1
    if "v7" in kind or "v5p" in kind or "v4" in kind:
        return 2
    return 1


def _vmem_capacity_bytes():
    try:
        cap = getattr(pltpu.get_tpu_info(), "vmem_capacity_bytes", None)
        if cap:
            return int(cap)
    except Exception:
        pass
    try:
        if "v7" in jax.devices()[0].device_kind.lower():
            return 64 << 20
    except Exception:
        pass
    return 128 << 20


def _single_buffered():
    try:
        return pl.Buffered(1)
    except Exception:  # very old API fallback: default double buffering
        return None


def _make_lstm_kernel(num_layers, S, BB, Hp, chunk_ts):
    """Kernel for fixed (num_layers, seq len, batch block, padded hidden, gx chunk)."""
    n_chunks = pl.cdiv(S, chunk_ts)

    def kernel(*refs):
        # refs = [x_ref, (w_ih_T, w_hh_T, bias) * L, w_lin_T, b_lin,
        #         out_ref, gx_ref [, seq_ref]]
        x_ref = refs[0]                                   # (S*BB, Ip)
        layer_refs = refs[1:1 + 3 * num_layers]
        w_lin_ref = refs[1 + 3 * num_layers]              # (Hp, Op)
        b_lin_ref = refs[2 + 3 * num_layers]              # (1, Op)   f32
        out_ref = refs[3 + 3 * num_layers]                # (BB, Op)
        gx_ref = refs[4 + 3 * num_layers]                 # (chunk_ts*BB, 4*Hp) f32
        seq_ref = refs[5 + 3 * num_layers] if num_layers > 1 else None

        h = jnp.zeros((BB, Hp), jnp.float32)

        for layer in range(num_layers):
            w_ih_ref = layer_refs[3 * layer]              # (in_dim_p, 4*Hp)
            w_hh_ref = layer_refs[3 * layer + 1]          # (Hp, 4*Hp)
            bias_ref = layer_refs[3 * layer + 2]          # (1, 4*Hp) f32 (= b_ih + b_hh)
            last = layer == num_layers - 1

            h = jnp.zeros((BB, Hp), jnp.float32)
            c = jnp.zeros((BB, Hp), jnp.float32)

            for ci in range(n_chunks):
                t0 = ci * chunk_ts
                ts_len = min(chunk_ts, S - t0)
                rows = ts_len * BB

                # Hoisted input projection for this chunk of timesteps: one large
                # throughput MXU matmul, bias folded in.  Streaming chunk-by-chunk
                # keeps the scratch bounded (v7x: 64 MiB VMEM / TC).
                if layer == 0:
                    in_chunk = x_ref[t0 * BB:t0 * BB + rows, :]
                else:
                    in_chunk = seq_ref[t0 * BB:t0 * BB + rows, :]
                gx_ref[0:rows, :] = (
                    jnp.dot(in_chunk.astype(w_ih_ref.dtype), w_ih_ref[...],
                            preferred_element_type=jnp.float32)
                    + bias_ref[...])

                def step(t, carry, *, last=last, w_hh_ref=w_hh_ref, t0=t0):
                    h, c = carry
                    row = pl.multiple_of(t * BB, BB)
                    # Serial critical path: one (BB,Hp)x(Hp,4Hp) matmul + gate math.
                    g = gx_ref[pl.ds(row, BB), :] + jnp.dot(
                        h.astype(w_hh_ref.dtype), w_hh_ref[...],
                        preferred_element_type=jnp.float32)
                    # Lane-aligned gate slices (Hp % 128 == 0); PyTorch order i, f, g, o.
                    i_g = jax.nn.sigmoid(g[:, 0 * Hp:1 * Hp])
                    f_g = jax.nn.sigmoid(g[:, 1 * Hp:2 * Hp])
                    g_g = jnp.tanh(g[:, 2 * Hp:3 * Hp])
                    o_g = jax.nn.sigmoid(g[:, 3 * Hp:4 * Hp])
                    c_new = f_g * c + i_g * g_g
                    h_new = o_g * jnp.tanh(c_new)
                    if not last:                          # last layer: dead stores removed
                        out_row = pl.multiple_of(t0 * BB + t * BB, BB)
                        seq_ref[pl.ds(out_row, BB), :] = h_new.astype(seq_ref.dtype)
                    return h_new, c_new

                unroll = ts_len if ts_len <= 8 else 8
                h, c = lax.fori_loop(0, ts_len, step, (h, c), unroll=unroll)

        # Final Linear on the last timestep of the top layer.
        # Op % 128 == 0 -> lane-dense unmasked output stores.
        out_ref[...] = (
            jnp.dot(h.astype(w_lin_ref.dtype), w_lin_ref[...],
                    preferred_element_type=jnp.float32)
            + b_lin_ref[...])

    return kernel


def init_lstm_rnn_params(key, input_size, hidden_size, output_size, num_layers):
    """Deterministic parameter init mimicking PyTorch shapes (uniform +-1/sqrt(H))."""
    bound = 1.0 / math.sqrt(hidden_size)
    params = {"layers": []}
    for layer in range(num_layers):
        in_dim = input_size if layer == 0 else hidden_size
        key, k1, k2, k3, k4 = jax.random.split(key, 5)
        w_ih = jax.random.uniform(k1, (4 * hidden_size, in_dim), jnp.float32, -bound, bound)
        w_hh = jax.random.uniform(k2, (4 * hidden_size, hidden_size), jnp.float32, -bound, bound)
        b_ih = jax.random.uniform(k3, (4 * hidden_size,), jnp.float32, -bound, bound)
        b_hh = jax.random.uniform(k4, (4 * hidden_size,), jnp.float32, -bound, bound)
        params["layers"].append((w_ih, w_hh, b_ih, b_hh))
    key, k1, k2 = jax.random.split(key, 3)
    lin_bound = 1.0 / math.sqrt(hidden_size)
    params["w_lin"] = jax.random.uniform(
        k1, (output_size, hidden_size), jnp.float32, -lin_bound, lin_bound)
    params["b_lin"] = jax.random.uniform(
        k2, (output_size,), jnp.float32, -lin_bound, lin_bound)
    return params


@functools.partial(
    jax.jit,
    static_argnames=("hidden_size", "output_size", "num_layers", "compute_dtype"))
def lstm_rnn_forward(x, params, *, hidden_size, output_size, num_layers,
                     compute_dtype=jnp.bfloat16):
    """x: (B, S, I) float32, batch_first — same convention as the PyTorch module.

    NOTE: with compute_dtype=bfloat16 the recurrent W_hh matmul is bf16 and rounding
    error compounds over very long sequences (S >~ 512); use compute_dtype=float32
    for a bit-accurate recurrent path.
    """
    B, S, I = x.shape
    H, O = hidden_size, output_size
    cdt = jnp.dtype(compute_dtype)
    f32 = jnp.float32

    Hp = _round_up(H, 128)            # lane-aligned gate groups (4 * Hp)
    Op = _round_up(O, 128)            # lane-dense output stores
    Ip = _round_up(max(I, 1), 8)      # sublane-aligned contraction dim for layer 0
    G = 4 * Hp

    # ---- batch blocking: never split on single-TC chips (v5e/v6e); split early on
    #      dual-TC chips (v7x/megacore); cap BB so the S*BB scratch stays bounded. ----
    Bp8 = _round_up(B, 8)
    MAX_BB = 256
    num_blocks = max(1, pl.cdiv(Bp8, MAX_BB))
    if _tensorcores_per_chip() >= 2 and Bp8 >= 16:
        num_blocks = max(num_blocks, 2)
    BB = _round_up(pl.cdiv(Bp8, num_blocks), 8)
    Bp = BB * num_blocks

    half = cdt.itemsize == 2
    x_dt = cdt if (half and I >= 128) else f32           # bf16 layer-0 DMA when MXU path is bf16
    seq_dt = cdt if (half and BB % 16 == 0) else f32     # bf16 inter-layer scratch when aligned

    # ---- gx streaming chunk (timesteps): <= ~8 MiB scratch, >= ~512 rows per matmul ----
    bytes_per_ts = BB * G * 4
    chunk_ts = max(1, (8 << 20) // bytes_per_ts)
    chunk_ts = max(chunk_ts, pl.cdiv(512, BB))           # keep projection throughput-bound (v5e)
    chunk_ts = min(chunk_ts, S)

    # ---- layout prep (plain JAX glue): seq-major x, pre-transposed gate-padded weights ----
    x_sm = jnp.transpose(x, (1, 0, 2)).astype(x_dt)                    # (S, B, I)
    x_sm = jnp.pad(x_sm, ((0, 0), (0, Bp - B), (0, Ip - I)))           # (S, Bp, Ip)
    x_blk = (x_sm.reshape(S, num_blocks, BB, Ip)
                 .transpose(1, 0, 2, 3)
                 .reshape(num_blocks, S * BB, Ip))                     # rows: t*BB + b_local

    inputs = [x_blk]
    for li, (w_ih, w_hh, b_ih, b_hh) in enumerate(params["layers"]):
        din = I if li == 0 else H      # real input width of this layer
        dinp = Ip if li == 0 else Hp   # padded input width seen by the kernel
        w_ih_t = jnp.zeros((dinp, G), f32)
        w_hh_t = jnp.zeros((Hp, G), f32)
        bias = jnp.zeros((1, G), f32)
        bsum = b_ih + b_hh
        for g in range(4):             # PyTorch gate order i, f, g, o
            w_ih_t = w_ih_t.at[:din, g * Hp:g * Hp + H].set(
                jnp.transpose(w_ih[g * H:(g + 1) * H, :]))
            w_hh_t = w_hh_t.at[:H, g * Hp:g * Hp + H].set(
                jnp.transpose(w_hh[g * H:(g + 1) * H, :]))
            bias = bias.at[0, g * Hp:g * Hp + H].set(bsum[g * H:(g + 1) * H])
        # bf16 only when the contraction dim is MXU-sized; bias always f32.
        wdt_ih = cdt if dinp >= 128 else f32
        inputs += [w_ih_t.astype(wdt_ih), w_hh_t.astype(cdt), bias]
    w_lin_t = jnp.zeros((Hp, Op), f32).at[:H, :O].set(
        jnp.transpose(params["w_lin"])).astype(cdt)
    b_lin = jnp.zeros((1, Op), f32).at[0, :O].set(params["b_lin"])
    inputs += [w_lin_t, b_lin]

    kernel = _make_lstm_kernel(num_layers, S, BB, Hp, chunk_ts)

    # Weights / biases have constant index maps -> single-buffer them (the default
    # double buffer would waste a full extra copy of every weight in VMEM).
    def _const_spec(a):
        zeros = (0,) * a.ndim
        return pl.BlockSpec(a.shape, lambda b: zeros, pipeline_mode=_single_buffered())

    x_pipe = _single_buffered() if num_blocks == 1 else None
    in_specs = [pl.BlockSpec((None, S * BB, Ip), lambda b: (b, 0, 0),
                             pipeline_mode=x_pipe)]
    in_specs += [_const_spec(a) for a in inputs[1:]]
    out_spec = pl.BlockSpec((BB, Op), lambda b: (b, 0))

    scratch_shapes = [pltpu.VMEM((chunk_ts * BB, G), f32)]        # streamed input-gate chunk
    if num_layers > 1:
        scratch_shapes.append(pltpu.VMEM((S * BB, Hp), seq_dt))   # inter-layer h sequence

    # VMEM budget from the actual resident set (weights single-buffered).
    vmem_bytes = (1 if num_blocks == 1 else 2) * S * BB * Ip * jnp.dtype(x_dt).itemsize
    vmem_bytes += 2 * BB * Op * 4
    for a in inputs[1:]:
        vmem_bytes += a.size * a.dtype.itemsize
    vmem_bytes += chunk_ts * BB * G * 4
    if num_layers > 1:
        vmem_bytes += S * BB * Hp * jnp.dtype(seq_dt).itemsize
    vmem_cap = (_vmem_capacity_bytes() * 3) // 4                  # ~96 MiB v5e/v6e, ~48 MiB v7x
    vmem_limit = int(min(max(vmem_bytes + (4 << 20), 16 << 20), vmem_cap))

    out = pl.pallas_call(
        kernel,
        out_shape=jax.ShapeDtypeStruct((Bp, Op), f32),
        grid=(num_blocks,),
        in_specs=in_specs,
        out_specs=out_spec,
        scratch_shapes=scratch_shapes,
        compiler_params=pltpu.CompilerParams(
            dimension_semantics=("parallel",),
            vmem_limit_bytes=vmem_limit),
    )(*inputs)
    return out[:B, :O]


def lstm_rnn_reference(x, params, *, hidden_size, output_size, num_layers):
    """Pure-JAX reference of the PyTorch forward (for correctness check)."""
    B, S, _ = x.shape
    H = hidden_size
    seq = x.astype(jnp.float32)
    for (w_ih, w_hh, b_ih, b_hh) in params["layers"]:
        h = jnp.zeros((B, H), jnp.float32)
        c = jnp.zeros((B, H), jnp.float32)
        outs = []
        for t in range(S):
            gates = seq[:, t, :] @ w_ih.T + b_ih + h @ w_hh.T + b_hh
            i_g = jax.nn.sigmoid(gates[:, 0 * H:1 * H])
            f_g = jax.nn.sigmoid(gates[:, 1 * H:2 * H])
            g_g = jnp.tanh(gates[:, 2 * H:3 * H])
            o_g = jax.nn.sigmoid(gates[:, 3 * H:4 * H])
            c = f_g * c + i_g * g_g
            h = o_g * jnp.tanh(c)
            outs.append(h)
        seq = jnp.stack(outs, axis=1)
    y = seq @ params["w_lin"].T + params["b_lin"]
    return y[:, -1, :]


if __name__ == "__main__":
    # Small shapes consistent with the module's forward.
    B, S, I, H, O, L = 2, 8, 4, 32, 4, 2

    key = jax.random.PRNGKey(0)
    kx, kp = jax.random.split(key)
    x = jax.random.normal(kx, (B, S, I), jnp.float32)
    params = init_lstm_rnn_params(kp, I, H, O, L)

    ref = lstm_rnn_reference(x, params, hidden_size=H, output_size=O, num_layers=L)

    # Default fast path: bf16 weights on the MXU, f32 state / gate math.
    out_bf16 = lstm_rnn_forward(x, params, hidden_size=H, output_size=O,
                                num_layers=L, compute_dtype=jnp.bfloat16)
    out_bf16 = jax.block_until_ready(out_bf16)
    assert out_bf16.shape == (B, O)
    assert jnp.allclose(out_bf16, ref, atol=5e-2, rtol=5e-2), (out_bf16, ref)

    # High-precision path: all-f32 weights.
    out_f32 = lstm_rnn_forward(x, params, hidden_size=H, output_size=O,
                               num_layers=L, compute_dtype=jnp.float32)
    out_f32 = jax.block_until_ready(out_f32)
    assert out_f32.shape == (B, O)
    assert jnp.allclose(out_f32, ref, atol=1e-3, rtol=1e-3), (out_f32, ref)

    print("KERNEL_OK")
</pallas_src>

<mosaic_0001>
module attributes {stable_mosaic.version = 11 : i64} {
  func.func @kernel(%arg0: i32, %arg1: memref<1x64x8xf32, #tpu.memory_space<vmem>>, %arg2: memref<8x512xf32, #tpu.memory_space<vmem>>, %arg3: memref<128x512xbf16, #tpu.memory_space<vmem>>, %arg4: memref<1x512xf32, #tpu.memory_space<vmem>>, %arg5: memref<128x512xbf16, #tpu.memory_space<vmem>>, %arg6: memref<128x512xbf16, #tpu.memory_space<vmem>>, %arg7: memref<1x512xf32, #tpu.memory_space<vmem>>, %arg8: memref<128x128xbf16, #tpu.memory_space<vmem>>, %arg9: memref<1x128xf32, #tpu.memory_space<vmem>>, %arg10: memref<8x128xf32, #tpu.memory_space<vmem>>, %arg11: memref<64x512xf32, #tpu.memory_space<vmem>>, %arg12: memref<64x128xf32, #tpu.memory_space<vmem>>) attributes {dimension_semantics = [#tpu.dimension_semantics<parallel>], iteration_bounds = array<i64: 1>, scalar_prefetch = 0 : i64, scratch_operands = 2 : i64, tpu.core_type = #tpu.core_type<tc>, window_params = [{pipeline_mode = #tpu.pipeline_mode<synchronous>, transform_indices = @transform_0, window_bounds = array<i64: 1, 64, 8>}, {pipeline_mode = #tpu.pipeline_mode<synchronous>, transform_indices = @transform_1, window_bounds = array<i64: 8, 512>}, {pipeline_mode = #tpu.pipeline_mode<synchronous>, transform_indices = @transform_2, window_bounds = array<i64: 128, 512>}, {pipeline_mode = #tpu.pipeline_mode<synchronous>, transform_indices = @transform_3, window_bounds = array<i64: 1, 512>}, {pipeline_mode = #tpu.pipeline_mode<synchronous>, transform_indices = @transform_4, window_bounds = array<i64: 128, 512>}, {pipeline_mode = #tpu.pipeline_mode<synchronous>, transform_indices = @transform_5, window_bounds = array<i64: 128, 512>}, {pipeline_mode = #tpu.pipeline_mode<synchronous>, transform_indices = @transform_6, window_bounds = array<i64: 1, 512>}, {pipeline_mode = #tpu.pipeline_mode<synchronous>, transform_indices = @transform_7, window_bounds = array<i64: 128, 128>}, {pipeline_mode = #tpu.pipeline_mode<synchronous>, transform_indices = @transform_8, window_bounds = array<i64: 1, 128>}, {transform_indices = @transform_9, window_bounds = array<i64: 8, 128>}]} {
    %cst = arith.constant 0.000000e+00 : f32
    %0 = vector.broadcast %cst : f32 to vector<8x128xf32>
    %cst_0 = arith.constant 0.000000e+00 : f32
    %1 = vector.broadcast %cst_0 : f32 to vector<8x128xf32>
    %c0 = arith.constant 0 : index
    %c0_1 = arith.constant 0 : index
    %c0_2 = arith.constant 0 : index
    %2 = vector.load %arg1[%c0, %c0_1, %c0_2] : memref<1x64x8xf32, #tpu.memory_space<vmem>>, vector<1x64x8xf32>
    %3 = vector.shape_cast %2 : vector<1x64x8xf32> to vector<64x8xf32>
    %c0_3 = arith.constant 0 : index
    %c0_4 = arith.constant 0 : index
    %4 = vector.load %arg2[%c0_3, %c0_4] : memref<8x512xf32, #tpu.memory_space<vmem>>, vector<8x512xf32>
    %cst_5 = arith.constant dense<0.000000e+00> : vector<64x512xf32>
    %5 = tpu.matmul %3, %4, %cst_5 {dimension_numbers = #tpu.dot_dimension_numbers<[1], [0], [0], [1], [0, 0, 1, 1], [], []>} : vector<64x8xf32>, vector<8x512xf32>, vector<64x512xf32> -> vector<64x512xf32>
    %c0_6 = arith.constant 0 : index
    %c0_7 = arith.constant 0 : index
    %6 = vector.load %arg4[%c0_6, %c0_7] : memref<1x512xf32, #tpu.memory_space<vmem>>, vector<1x512xf32>
    %7 = vector.broadcast %6 : vector<1x512xf32> to vector<64x512xf32>
    %8 = arith.addf %5, %7 : vector<64x512xf32>
    %c0_8 = arith.constant 0 : index
    %c0_9 = arith.constant 0 : index
    %9 = vector.load %arg11[%c0_8, %c0_9] : memref<64x512xf32, #tpu.memory_space<vmem>>, vector<64x512xf32>
    tpu.vector_store %arg11[%c0_8, %c0_9], %8 {strides = array<i32>} : memref<64x512xf32, #tpu.memory_space<vmem>>, vector<64x512xf32>,
    %c0_i32 = arith.constant 0 : i32
    %c8_i32 = arith.constant 8 : i32
    %10 = arith.muli %c0_i32, %c8_i32 : i32
    %11 = tpu.assume_multiple %10, 8 : i32
    %12 = arith.index_cast %11 : i32 to index
    %c0_10 = arith.constant 0 : index
    %13 = vector.load %arg11[%12, %c0_10] : memref<64x512xf32, #tpu.memory_space<vmem>>, vector<8x512xf32>
    %14 = arith.truncf %0 : vector<8x128xf32> to vector<8x128xbf16>
    %c0_11 = arith.constant 0 : index
    %c0_12 = arith.constant 0 : index
    %15 = vector.load %arg3[%c0_11, %c0_12] : memref<128x512xbf16, #tpu.memory_space<vmem>>, vector<128x512xbf16>
    %cst_13 = arith.constant dense<0.000000e+00> : vector<8x512xf32>
    %16 = tpu.matmul %14, %15, %cst_13 {dimension_numbers = #tpu.dot_dimension_numbers<[1], [0], [0], [1], [0, 0, 1, 1], [], []>} : vector<8x128xbf16>, vector<128x512xbf16>, vector<8x512xf32> -> vector<8x512xf32>
    %17 = arith.addf %13, %16 : vector<8x512xf32>
    %18 = vector.extract_strided_slice %17 {offsets = [0, 0], sizes = [8, 128], strides = [1, 1]} : vector<8x512xf32> to vector<8x128xf32>
    %19 = arith.negf %18 : vector<8x128xf32>
    %20 = math.exp %19 : vector<8x128xf32>
    %cst_14 = arith.constant 1.000000e+00 : f32
    %21 = vector.broadcast %cst_14 : f32 to vector<8x128xf32>
    %22 = arith.addf %21, %20 : vector<8x128xf32>
    %23 = arith.divf %21, %22 : vector<8x128xf32>
    %24 = vector.extract_strided_slice %17 {offsets = [0, 128], sizes = [8, 128], strides = [1, 1]} : vector<8x512xf32> to vector<8x128xf32>
    %25 = arith.negf %24 : vector<8x128xf32>
    %26 = math.exp %25 : vector<8x128xf32>
    %cst_15 = arith.constant 1.000000e+00 : f32
    %27 = vector.broadcast %cst_15 : f32 to vector<8x128xf32>
    %28 = arith.addf %27, %26 : vector<8x128xf32>
    %29 = arith.divf %27, %28 : vector<8x128xf32>
    %30 = vector.extract_strided_slice %17 {offsets = [0, 256], sizes = [8, 128], strides = [1, 1]} : vector<8x512xf32> to vector<8x128xf32>
    %31 = math.tanh %30 : vector<8x128xf32>
    %32 = vector.extract_strided_slice %17 {offsets = [0, 384], sizes = [8, 128], strides = [1, 1]} : vector<8x512xf32> to vector<8x128xf32>
    %33 = arith.negf %32 : vector<8x128xf32>
    %34 = math.exp %33 : vector<8x128xf32>
    %cst_16 = arith.constant 1.000000e+00 : f32
    %35 = vector.broadcast %cst_16 : f32 to vector<8x128xf32>
    %36 = arith.addf %35, %34 : vector<8x128xf32>
    %37 = arith.divf %35, %36 : vector<8x128xf32>
    %38 = arith.mulf %29, %1 : vector<8x128xf32>
    %39 = arith.mulf %23, %31 : vector<8x128xf32>
    %40 = arith.addf %38, %39 : vector<8x128xf32>
    %41 = math.tanh %40 : vector<8x128xf32>
    %42 = arith.mulf %37, %41 : vector<8x128xf32>
    %c8_i32_17 = arith.constant 8 : i32
    %43 = arith.muli %c0_i32, %c8_i32_17 : i32
    %c0_i32_18 = arith.constant 0 : i32
    %44 = arith.addi %c0_i32_18, %43 : i32
    %45 = tpu.assume_multiple %44, 8 : i32
    %46 = arith.index_cast %45 : i32 to index
    %c0_19 = arith.constant 0 : index
    %47 = vector.load %arg12[%46, %c0_19] : memref<64x128xf32, #tpu.memory_space<vmem>>, vector<8x128xf32>
    tpu.vector_store %arg12[%46, %c0_19], %42 {strides = array<i32>} : memref<64x128xf32, #tpu.memory_space<vmem>>, vector<8x128xf32>,
    %c1_i32 = arith.constant 1 : i32
    %c8_i32_20 = arith.constant 8 : i32
    %48 = arith.muli %c1_i32, %c8_i32_20 : i32
    %49 = tpu.assume_multiple %48, 8 : i32
    %50 = arith.index_cast %49 : i32 to index
    %c0_21 = arith.constant 0 : index
    %51 = vector.load %arg11[%50, %c0_21] : memref<64x512xf32, #tpu.memory_space<vmem>>, vector<8x512xf32>
    %52 = arith.truncf %42 : vector<8x128xf32> to vector<8x128xbf16>
    %c0_22 = arith.constant 0 : index
    %c0_23 = arith.constant 0 : index
    %53 = vector.load %arg3[%c0_22, %c0_23] : memref<128x512xbf16, #tpu.memory_space<vmem>>, vector<128x512xbf16>
    %cst_24 = arith.constant dense<0.000000e+00> : vector<8x512xf32>
    %54 = tpu.matmul %52, %53, %cst_24 {dimension_numbers = #tpu.dot_dimension_numbers<[1], [0], [0], [1], [0, 0, 1, 1], [], []>} : vector<8x128xbf16>, vector<128x512xbf16>, vector<8x512xf32> -> vector<8x512xf32>
    %55 = arith.addf %51, %54 : vector<8x512xf32>
    %56 = vector.extract_strided_slice %55 {offsets = [0, 0], sizes = [8, 128], strides = [1, 1]} : vector<8x512xf32> to vector<8x128xf32>
    %57 = arith.negf %56 : vector<8x128xf32>
    %58 = math.exp %57 : vector<8x128xf32>
    %cst_25 = arith.constant 1.000000e+00 : f32
    %59 = vector.broadcast %cst_25 : f32 to vector<8x128xf32>
    %60 = arith.addf %59, %58 : vector<8x128xf32>
    %61 = arith.divf %59, %60 : vector<8x128xf32>
    %62 = vector.extract_strided_slice %55 {offsets = [0, 128], sizes = [8, 128], strides = [1, 1]} : vector<8x512xf32> to vector<8x128xf32>
    %63 = arith.negf %62 : vector<8x128xf32>
    %64 = math.exp %63 : vector<8x128xf32>
    %cst_26 = arith.constant 1.000000e+00 : f32
    %65 = vector.broadcast %cst_26 : f32 to vector<8x128xf32>
    %66 = arith.addf %65, %64 : vector<8x128xf32>
    %67 = arith.divf %65, %66 : vector<8x128xf32>
    %68 = vector.extract_strided_slice %55 {offsets = [0, 256], sizes = [8, 128], strides = [1, 1]} : vector<8x512xf32> to vector<8x128xf32>
    %69 = math.tanh %68 : vector<8x128xf32>
    %70 = vector.extract_strided_slice %55 {offsets = [0, 384], sizes = [8, 128], strides = [1, 1]} : vector<8x512xf32> to vector<8x128xf32>
    %71 = arith.negf %70 : vector<8x128xf32>
    %72 = math.exp %71 : vector<8x128xf32>
    %cst_27 = arith.constant 1.000000e+00 : f32
    %73 = vector.broadcast %cst_27 : f32 to vector<8x128xf32>
    %74 = arith.addf %73, %72 : vector<8x128xf32>
    %75 = arith.divf %73, %74 : vector<8x128xf32>
    %76 = arith.mulf %67, %40 : vector<8x128xf32>
    %77 = arith.mulf %61, %69 : vector<8x128xf32>
    %78 = arith.addf %76, %77 : vector<8x128xf32>
    %79 = math.tanh %78 : vector<8x128xf32>
    %80 = arith.mulf %75, %79 : vector<8x128xf32>
    %c8_i32_28 = arith.constant 8 : i32
    %81 = arith.muli %c1_i32, %c8_i32_28 : i32
    %c0_i32_29 = arith.constant 0 : i32
    %82 = arith.addi %c0_i32_29, %81 : i32
    %83 = tpu.assume_multiple %82, 8 : i32
    %84 = arith.index_cast %83 : i32 to index
    %c0_30 = arith.constant 0 : index
    %85 = vector.load %arg12[%84, %c0_30] : memref<64x128xf32, #tpu.memory_space<vmem>>, vector<8x128xf32>
    tpu.vector_store %arg12[%84, %c0_30], %80 {strides = array<i32>} : memref<64x128xf32, #tpu.memory_space<vmem>>, vector<8x128xf32>,
    %c2_i32 = arith.constant 2 : i32
    %c8_i32_31 = arith.constant 8 : i32
    %86 = arith.muli %c2_i32, %c8_i32_31 : i32
    %87 = tpu.assume_multiple %86, 8 : i32
    %88 = arith.index_cast %87 : i32 to index
    %c0_32 = arith.constant 0 : index
    %89 = vector.load %arg11[%88, %c0_32] : memref<64x512xf32, #tpu.memory_space<vmem>>, vector<8x512xf32>
    %90 = arith.truncf %80 : vector<8x128xf32> to vector<8x128xbf16>
    %c0_33 = arith.constant 0 : index
    %c0_34 = arith.constant 0 : index
    %91 = vector.load %arg3[%c0_33, %c0_34] : memref<128x512xbf16, #tpu.memory_space<vmem>>, vector<128x512xbf16>
    %cst_35 = arith.constant dense<0.000000e+00> : vector<8x512xf32>
    %92 = tpu.matmul %90, %91, %cst_35 {dimension_numbers = #tpu.dot_dimension_numbers<[1], [0], [0], [1], [0, 0, 1, 1], [], []>} : vector<8x128xbf16>, vector<128x512xbf16>, vector<8x512xf32> -> vector<8x512xf32>
    %93 = arith.addf %89, %92 : vector<8x512xf32>
    %94 = vector.extract_strided_slice %93 {offsets = [0, 0], sizes = [8, 128], strides = [1, 1]} : vector<8x512xf32> to vector<8x128xf32>
    %95 = arith.negf %94 : vector<8x128xf32>
    %96 = math.exp %95 : vector<8x128xf32>
    %cst_36 = arith.constant 1.000000e+00 : f32
    %97 = vector.broadcast %cst_36 : f32 to vector<8x128xf32>
    %98 = arith.addf %97, %96 : vector<8x128xf32>
    %99 = arith.divf %97, %98 : vector<8x128xf32>
    %100 = vector.extract_strided_slice %93 {offsets = [0, 128], sizes = [8, 128], strides = [1, 1]} : vector<8x512xf32> to vector<8x128xf32>
    %101 = arith.negf %100 : vector<8x128xf32>
    %102 = math.exp %101 : vector<8x128xf32>
    %cst_37 = arith.constant 1.000000e+00 : f32
    %103 = vector.broadcast %cst_37 : f32 to vector<8x128xf32>
    %104 = arith.addf %103, %102 : vector<8x128xf32>
    %105 = arith.divf %103, %104 : vector<8x128xf32>
    %106 = vector.extract_strided_slice %93 {offsets = [0, 256], sizes = [8, 128], strides = [1, 1]} : vector<8x512xf32> to vector<8x128xf32>
    %107 = math.tanh %106 : vector<8x128xf32>
    %108 = vector.extract_strided_slice %93 {offsets = [0, 384], sizes = [8, 128], strides = [1, 1]} : vector<8x512xf32> to vector<8x128xf32>
    %109 = arith.negf %108 : vector<8x128xf32>
    %110 = math.exp %109 : vector<8x128xf32>
    %cst_38 = arith.constant 1.000000e+00 : f32
    %111 = vector.broadcast %cst_38 : f32 to vector<8x128xf32>
    %112 = arith.addf %111, %110 : vector<8x128xf32>
    %113 = arith.divf %111, %112 : vector<8x128xf32>
    %114 = arith.mulf %105, %78 : vector<8x128xf32>
    %115 = arith.mulf %99, %107 : vector<8x128xf32>
    %116 = arith.addf %114, %115 : vector<8x128xf32>
    %117 = math.tanh %116 : vector<8x128xf32>
    %118 = arith.mulf %113, %117 : vector<8x128xf32>
    %c8_i32_39 = arith.constant 8 : i32
    %119 = arith.muli %c2_i32, %c8_i32_39 : i32
    %c0_i32_40 = arith.constant 0 : i32
    %120 = arith.addi %c0_i32_40, %119 : i32
    %121 = tpu.assume_multiple %120, 8 : i32
    %122 = arith.index_cast %121 : i32 to index
    %c0_41 = arith.constant 0 : index
    %123 = vector.load %arg12[%122, %c0_41] : memref<64x128xf32, #tpu.memory_space<vmem>>, vector<8x128xf32>
    tpu.vector_store %arg12[%122, %c0_41], %118 {strides = array<i32>} : memref<64x128xf32, #tpu.memory_space<vmem>>, vector<8x128xf32>,
    %c3_i32 = arith.constant 3 : i32
    %c8_i32_42 = arith.constant 8 : i32
    %124 = arith.muli %c3_i32, %c8_i32_42 : i32
    %125 = tpu.assume_multiple %124, 8 : i32
    %126 = arith.index_cast %125 : i32 to index
    %c0_43 = arith.constant 0 : index
    %127 = vector.load %arg11[%126, %c0_43] : memref<64x512xf32, #tpu.memory_space<vmem>>, vector<8x512xf32>
    %128 = arith.truncf %118 : vector<8x128xf32> to vector<8x128xbf16>
    %c0_44 = arith.constant 0 : index
    %c0_45 = arith.constant 0 : index
    %129 = vector.load %arg3[%c0_44, %c0_45] : memref<128x512xbf16, #tpu.memory_space<vmem>>, vector<128x512xbf16>
    %cst_46 = arith.constant dense<0.000000e+00> : vector<8x512xf32>
    %130 = tpu.matmul %128, %129, %cst_46 {dimension_numbers = #tpu.dot_dimension_numbers<[1], [0], [0], [1], [0, 0, 1, 1], [], []>} : vector<8x128xbf16>, vector<128x512xbf16>, vector<8x512xf32> -> vector<8x512xf32>
    %131 = arith.addf %127, %130 : vector<8x512xf32>
    %132 = vector.extract_strided_slice %131 {offsets = [0, 0], sizes = [8, 128], strides = [1, 1]} : vector<8x512xf32> to vector<8x128xf32>
    %133 = arith.negf %132 : vector<8x128xf32>
    %134 = math.exp %133 : vector<8x128xf32>
    %cst_47 = arith.constant 1.000000e+00 : f32
    %135 = vector.broadcast %cst_47 : f32 to vector<8x128xf32>
    %136 = arith.addf %135, %134 : vector<8x128xf32>
    %137 = arith.divf %135, %136 : vector<8x128xf32>
    %138 = vector.extract_strided_slice %131 {offsets = [0, 128], sizes = [8, 128], strides = [1, 1]} : vector<8x512xf32> to vector<8x128xf32>
    %139 = arith.negf %138 : vector<8x128xf32>
    %140 = math.exp %139 : vector<8x128xf32>
    %cst_48 = arith.constant 1.000000e+00 : f32
    %141 = vector.broadcast %cst_48 : f32 to vector<8x128xf32>
    %142 = arith.addf %141, %140 : vector<8x128xf32>
    %143 = arith.divf %141, %142 : vector<8x128xf32>
    %144 = vector.extract_strided_slice %131 {offsets = [0, 256], sizes = [8, 128], strides = [1, 1]} : vector<8x512xf32> to vector<8x128xf32>
    %145 = math.tanh %144 : vector<8x128xf32>
    %146 = vector.extract_strided_slice %131 {offsets = [0, 384], sizes = [8, 128], strides = [1, 1]} : vector<8x512xf32> to vector<8x128xf32>
    %147 = arith.negf %146 : vector<8x128xf32>
    %148 = math.exp %147 : vector<8x128xf32>
    %cst_49 = arith.constant 1.000000e+00 : f32
    %149 = vector.broadcast %cst_49 : f32 to vector<8x128xf32>
    %150 = arith.addf %149, %148 : vector<8x128xf32>
    %151 = arith.divf %149, %150 : vector<8x128xf32>
    %152 = arith.mulf %143, %116 : vector<8x128xf32>
    %153 = arith.mulf %137, %145 : vector<8x128xf32>
    %154 = arith.addf %152, %153 : vector<8x128xf32>
    %155 = math.tanh %154 : vector<8x128xf32>
    %156 = arith.mulf %151, %155 : vector<8x128xf32>
    %c8_i32_50 = arith.constant 8 : i32
    %157 = arith.muli %c3_i32, %c8_i32_50 : i32
    %c0_i32_51 = arith.constant 0 : i32
    %158 = arith.addi %c0_i32_51, %157 : i32
    %159 = tpu.assume_multiple %158, 8 : i32
    %160 = arith.index_cast %159 : i32 to index
    %c0_52 = arith.constant 0 : index
    %161 = vector.load %arg12[%160, %c0_52] : memref<64x128xf32, #tpu.memory_space<vmem>>, vector<8x128xf32>
    tpu.vector_store %arg12[%160, %c0_52], %156 {strides = array<i32>} : memref<64x128xf32, #tpu.memory_space<vmem>>, vector<8x128xf32>,
    %c4_i32 = arith.constant 4 : i32
    %c8_i32_53 = arith.constant 8 : i32
    %162 = arith.muli %c4_i32, %c8_i32_53 : i32
    %163 = tpu.assume_multiple %162, 8 : i32
    %164 = arith.index_cast %163 : i32 to index
    %c0_54 = arith.constant 0 : index
    %165 = vector.load %arg11[%164, %c0_54] : memref<64x512xf32, #tpu.memory_space<vmem>>, vector<8x512xf32>
    %166 = arith.truncf %156 : vector<8x128xf32> to vector<8x128xbf16>
    %c0_55 = arith.constant 0 : index
    %c0_56 = arith.constant 0 : index
    %167 = vector.load %arg3[%c0_55, %c0_56] : memref<128x512xbf16, #tpu.memory_space<vmem>>, vector<128x512xbf16>
    %cst_57 = arith.constant dense<0.000000e+00> : vector<8x512xf32>
    %168 = tpu.matmul %166, %167, %cst_57 {dimension_numbers = #tpu.dot_dimension_numbers<[1], [0], [0], [1], [0, 0, 1, 1], [], []>} : vector<8x128xbf16>, vector<128x512xbf16>, vector<8x512xf32> -> vector<8x512xf32>
    %169 = arith.addf %165, %168 : vector<8x512xf32>
    %170 = vector.extract_strided_slice %169 {offsets = [0, 0], sizes = [8, 128], strides = [1, 1]} : vector<8x512xf32> to vector<8x128xf32>
    %171 = arith.negf %170 : vector<8x128xf32>
    %172 = math.exp %171 : vector<8x128xf32>
    %cst_58 = arith.constant 1.000000e+00 : f32
    %173 = vector.broadcast %cst_58 : f32 to vector<8x128xf32>
    %174 = arith.addf %173, %172 : vector<8x128xf32>
    %175 = arith.divf %173, %174 : vector<8x128xf32>
    %176 = vector.extract_strided_slice %169 {offsets = [0, 128], sizes = [8, 128], strides = [1, 1]} : vector<8x512xf32> to vector<8x128xf32>
    %177 = arith.negf %176 : vector<8x128xf32>
    %178 = math.exp %177 : vector<8x128xf32>
    %cst_59 = arith.constant 1.000000e+00 : f32
    %179 = vector.broadcast %cst_59 : f32 to vector<8x128xf32>
    %180 = arith.addf %179, %178 : vector<8x128xf32>
    %181 = arith.divf %179, %180 : vector<8x128xf32>
    %182 = vector.extract_strided_slice %169 {offsets = [0, 256], sizes = [8, 128], strides = [1, 1]} : vector<8x512xf32> to vector<8x128xf32>
    %183 = math.tanh %182 : vector<8x128xf32>
    %184 = vector.extract_strided_slice %169 {offsets = [0, 384], sizes = [8, 128], strides = [1, 1]} : vector<8x512xf32> to vector<8x128xf32>
    %185 = arith.negf %184 : vector<8x128xf32>
    %186 = math.exp %185 : vector<8x128xf32>
    %cst_60 = arith.constant 1.000000e+00 : f32
    %187 = vector.broadcast %cst_60 : f32 to vector<8x128xf32>
    %188 = arith.addf %187, %186 : vector<8x128xf32>
    %189 = arith.divf %187, %188 : vector<8x128xf32>
    %190 = arith.mulf %181, %154 : vector<8x128xf32>
    %191 = arith.mulf %175, %183 : vector<8x128xf32>
    %192 = arith.addf %190, %191 : vector<8x128xf32>
    %193 = math.tanh %192 : vector<8x128xf32>
    %194 = arith.mulf %189, %193 : vector<8x128xf32>
    %c8_i32_61 = arith.constant 8 : i32
    %195 = arith.muli %c4_i32, %c8_i32_61 : i32
    %c0_i32_62 = arith.constant 0 : i32
    %196 = arith.addi %c0_i32_62, %195 : i32
    %197 = tpu.assume_multiple %196, 8 : i32
    %198 = arith.index_cast %197 : i32 to index
    %c0_63 = arith.constant 0 : index
    %199 = vector.load %arg12[%198, %c0_63] : memref<64x128xf32, #tpu.memory_space<vmem>>, vector<8x128xf32>
    tpu.vector_store %arg12[%198, %c0_63], %194 {strides = array<i32>} : memref<64x128xf32, #tpu.memory_space<vmem>>, vector<8x128xf32>,
    %c5_i32 = arith.constant 5 : i32
    %c8_i32_64 = arith.constant 8 : i32
    %200 = arith.muli %c5_i32, %c8_i32_64 : i32
    %201 = tpu.assume_multiple %200, 8 : i32
    %202 = arith.index_cast %201 : i32 to index
    %c0_65 = arith.constant 0 : index
    %203 = vector.load %arg11[%202, %c0_65] : memref<64x512xf32, #tpu.memory_space<vmem>>, vector<8x512xf32>
    %204 = arith.truncf %194 : vector<8x128xf32> to vector<8x128xbf16>
    %c0_66 = arith.constant 0 : index
    %c0_67 = arith.constant 0 : index
    %205 = vector.load %arg3[%c0_66, %c0_67] : memref<128x512xbf16, #tpu.memory_space<vmem>>, vector<128x512xbf16>
    %cst_68 = arith.constant dense<0.000000e+00> : vector<8x512xf32>
    %206 = tpu.matmul %204, %205, %cst_68 {dimension_numbers = #tpu.dot_dimension_numbers<[1], [0], [0], [1], [0, 0, 1, 1], [], []>} : vector<8x128xbf16>, vector<128x512xbf16>, vector<8x512xf32> -> vector<8x512xf32>
    %207 = arith.addf %203, %206 : vector<8x512xf32>
    %208 = vector.extract_strided_slice %207 {offsets = [0, 0], sizes = [8, 128], strides = [1, 1]} : vector<8x512xf32> to vector<8x128xf32>
    %209 = arith.negf %208 : vector<8x128xf32>
    %210 = math.exp %209 : vector<8x128xf32>
    %cst_69 = arith.constant 1.000000e+00 : f32
    %211 = vector.broadcast %cst_69 : f32 to vector<8x128xf32>
    %212 = arith.addf %211, %210 : vector<8x128xf32>
    %213 = arith.divf %211, %212 : vector<8x128xf32>
    %214 = vector.extract_strided_slice %207 {offsets = [0, 128], sizes = [8, 128], strides = [1, 1]} : vector<8x512xf32> to vector<8x128xf32>
    %215 = arith.negf %214 : vector<8x128xf32>
    %216 = math.exp %215 : vector<8x128xf32>
    %cst_70 = arith.constant 1.000000e+00 : f32
    %217 = vector.broadcast %cst_70 : f32 to vector<8x128xf32>
    %218 = arith.addf %217, %216 : vector<8x128xf32>
    %219 = arith.divf %217, %218 : vector<8x128xf32>
    %220 = vector.extract_strided_slice %207 {offsets = [0, 256], sizes = [8, 128], strides = [1, 1]} : vector<8x512xf32> to vector<8x128xf32>
    %221 = math.tanh %220 : vector<8x128xf32>
    %222 = vector.extract_strided_slice %207 {offsets = [0, 384], sizes = [8, 128], strides = [1, 1]} : vector<8x512xf32> to vector<8x128xf32>
    %223 = arith.negf %222 : vector<8x128xf32>
    %224 = math.exp %223 : vector<8x128xf32>
    %cst_71 = arith.constant 1.000000e+00 : f32
    %225 = vector.broadcast %cst_71 : f32 to vector<8x128xf32>
    %226 = arith.addf %225, %224 : vector<8x128xf32>
    %227 = arith.divf %225, %226 : vector<8x128xf32>
    %228 = arith.mulf %219, %192 : vector<8x128xf32>
    %229 = arith.mulf %213, %221 : vector<8x128xf32>
    %230 = arith.addf %228, %229 : vector<8x128xf32>
    %231 = math.tanh %230 : vector<8x128xf32>
    %232 = arith.mulf %227, %231 : vector<8x128xf32>
    %c8_i32_72 = arith.constant 8 : i32
    %233 = arith.muli %c5_i32, %c8_i32_72 : i32
    %c0_i32_73 = arith.constant 0 : i32
    %234 = arith.addi %c0_i32_73, %233 : i32
    %235 = tpu.assume_multiple %234, 8 : i32
    %236 = arith.index_cast %235 : i32 to index
    %c0_74 = arith.constant 0 : index
    %237 = vector.load %arg12[%236, %c0_74] : memref<64x128xf32, #tpu.memory_space<vmem>>, vector<8x128xf32>
    tpu.vector_store %arg12[%236, %c0_74], %232 {strides = array<i32>} : memref<64x128xf32, #tpu.memory_space<vmem>>, vector<8x128xf32>,
    %c6_i32 = arith.constant 6 : i32
    %c8_i32_75 = arith.constant 8 : i32
    %238 = arith.muli %c6_i32, %c8_i32_75 : i32
    %239 = tpu.assume_multiple %238, 8 : i32
    %240 = arith.index_cast %239 : i32 to index
    %c0_76 = arith.constant 0 : index
    %241 = vector.load %arg11[%240, %c0_76] : memref<64x512xf32, #tpu.memory_space<vmem>>, vector<8x512xf32>
    %242 = arith.truncf %232 : vector<8x128xf32> to vector<8x128xbf16>
    %c0_77 = arith.constant 0 : index
    %c0_78 = arith.constant 0 : index
    %243 = vector.load %arg3[%c0_77, %c0_78] : memref<128x512xbf16, #tpu.memory_space<vmem>>, vector<128x512xbf16>
    %cst_79 = arith.constant dense<0.000000e+00> : vector<8x512xf32>
    %244 = tpu.matmul %242, %243, %cst_79 {dimension_numbers = #tpu.dot_dimension_numbers<[1], [0], [0], [1], [0, 0, 1, 1], [], []>} : vector<8x128xbf16>, vector<128x512xbf16>, vector<8x512xf32> -> vector<8x512xf32>
    %245 = arith.addf %241, %244 : vector<8x512xf32>
    %246 = vector.extract_strided_slice %245 {offsets = [0, 0], sizes = [8, 128], strides = [1, 1]} : vector<8x512xf32> to vector<8x128xf32>
    %247 = arith.negf %246 : vector<8x128xf32>
    %248 = math.exp %247 : vector<8x128xf32>
    %cst_80 = arith.constant 1.000000e+00 : f32
    %249 = vector.broadcast %cst_80 : f32 to vector<8x128xf32>
    %250 = arith.addf %249, %248 : vector<8x128xf32>
    %251 = arith.divf %249, %250 : vector<8x128xf32>
    %252 = vector.extract_strided_slice %245 {offsets = [0, 128], sizes = [8, 128], strides = [1, 1]} : vector<8x512xf32> to vector<8x128xf32>
    %253 = arith.negf %252 : vector<8x128xf32>
    %254 = math.exp %253 : vector<8x128xf32>
    %cst_81 = arith.constant 1.000000e+00 : f32
    %255 = vector.broadcast %cst_81 : f32 to vector<8x128xf32>
    %256 = arith.addf %255, %254 : vector<8x128xf32>
    %257 = arith.divf %255, %256 : vector<8x128xf32>
    %258 = vector.extract_strided_slice %245 {offsets = [0, 256], sizes = [8, 128], strides = [1, 1]} : vector<8x512xf32> to vector<8x128xf32>
    %259 = math.tanh %258 : vector<8x128xf32>
    %260 = vector.extract_strided_slice %245 {offsets = [0, 384], sizes = [8, 128], strides = [1, 1]} : vector<8x512xf32> to vector<8x128xf32>
    %261 = arith.negf %260 : vector<8x128xf32>
    %262 = math.exp %261 : vector<8x128xf32>
    %cst_82 = arith.constant 1.000000e+00 : f32
    %263 = vector.broadcast %cst_82 : f32 to vector<8x128xf32>
    %264 = arith.addf %263, %262 : vector<8x128xf32>
    %265 = arith.divf %263, %264 : vector<8x128xf32>
    %266 = arith.mulf %257, %230 : vector<8x128xf32>
    %267 = arith.mulf %251, %259 : vector<8x128xf32>
    %268 = arith.addf %266, %267 : vector<8x128xf32>
    %269 = math.tanh %268 : vector<8x128xf32>
    %270 = arith.mulf %265, %269 : vector<8x128xf32>
    %c8_i32_83 = arith.constant 8 : i32
    %271 = arith.muli %c6_i32, %c8_i32_83 : i32
    %c0_i32_84 = arith.constant 0 : i32
    %272 = arith.addi %c0_i32_84, %271 : i32
    %273 = tpu.assume_multiple %272, 8 : i32
    %274 = arith.index_cast %273 : i32 to index
    %c0_85 = arith.constant 0 : index
    %275 = vector.load %arg12[%274, %c0_85] : memref<64x128xf32, #tpu.memory_space<vmem>>, vector<8x128xf32>
    tpu.vector_store %arg12[%274, %c0_85], %270 {strides = array<i32>} : memref<64x128xf32, #tpu.memory_space<vmem>>, vector<8x128xf32>,
    %c7_i32 = arith.constant 7 : i32
    %c8_i32_86 = arith.constant 8 : i32
    %276 = arith.muli %c7_i32, %c8_i32_86 : i32
    %277 = tpu.assume_multiple %276, 8 : i32
    %278 = arith.index_cast %277 : i32 to index
    %c0_87 = arith.constant 0 : index
    %279 = vector.load %arg11[%278, %c0_87] : memref<64x512xf32, #tpu.memory_space<vmem>>, vector<8x512xf32>
    %280 = arith.truncf %270 : vector<8x128xf32> to vector<8x128xbf16>
    %c0_88 = arith.constant 0 : index
    %c0_89 = arith.constant 0 : index
    %281 = vector.load %arg3[%c0_88, %c0_89] : memref<128x512xbf16, #tpu.memory_space<vmem>>, vector<128x512xbf16>
    %cst_90 = arith.constant dense<0.000000e+00> : vector<8x512xf32>
    %282 = tpu.matmul %280, %281, %cst_90 {dimension_numbers = #tpu.dot_dimension_numbers<[1], [0], [0], [1], [0, 0, 1, 1], [], []>} : vector<8x128xbf16>, vector<128x512xbf16>, vector<8x512xf32> -> vector<8x512xf32>
    %283 = arith.addf %279, %282 : vector<8x512xf32>
    %284 = vector.extract_strided_slice %283 {offsets = [0, 0], sizes = [8, 128], strides = [1, 1]} : vector<8x512xf32> to vector<8x128xf32>
    %285 = arith.negf %284 : vector<8x128xf32>
    %286 = math.exp %285 : vector<8x128xf32>
    %cst_91 = arith.constant 1.000000e+00 : f32
    %287 = vector.broadcast %cst_91 : f32 to vector<8x128xf32>
    %288 = arith.addf %287, %286 : vector<8x128xf32>
    %289 = arith.divf %287, %288 : vector<8x128xf32>
    %290 = vector.extract_strided_slice %283 {offsets = [0, 128], sizes = [8, 128], strides = [1, 1]} : vector<8x512xf32> to vector<8x128xf32>
    %291 = arith.negf %290 : vector<8x128xf32>
    %292 = math.exp %291 : vector<8x128xf32>
    %cst_92 = arith.constant 1.000000e+00 : f32
    %293 = vector.broadcast %cst_92 : f32 to vector<8x128xf32>
    %294 = arith.addf %293, %292 : vector<8x128xf32>
    %295 = arith.divf %293, %294 : vector<8x128xf32>
    %296 = vector.extract_strided_slice %283 {offsets = [0, 256], sizes = [8, 128], strides = [1, 1]} : vector<8x512xf32> to vector<8x128xf32>
    %297 = math.tanh %296 : vector<8x128xf32>
    %298 = vector.extract_strided_slice %283 {offsets = [0, 384], sizes = [8, 128], strides = [1, 1]} : vector<8x512xf32> to vector<8x128xf32>
    %299 = arith.negf %298 : vector<8x128xf32>
    %300 = math.exp %299 : vector<8x128xf32>
    %cst_93 = arith.constant 1.000000e+00 : f32
    %301 = vector.broadcast %cst_93 : f32 to vector<8x128xf32>
    %302 = arith.addf %301, %300 : vector<8x128xf32>
    %303 = arith.divf %301, %302 : vector<8x128xf32>
    %304 = arith.mulf %295, %268 : vector<8x128xf32>
    %305 = arith.mulf %289, %297 : vector<8x128xf32>
    %306 = arith.addf %304, %305 : vector<8x128xf32>
    %307 = math.tanh %306 : vector<8x128xf32>
    %308 = arith.mulf %303, %307 : vector<8x128xf32>
    %c8_i32_94 = arith.constant 8 : i32
    %309 = arith.muli %c7_i32, %c8_i32_94 : i32
    %c0_i32_95 = arith.constant 0 : i32
    %310 = arith.addi %c0_i32_95, %309 : i32
    %311 = tpu.assume_multiple %310, 8 : i32
    %312 = arith.index_cast %311 : i32 to index
    %c0_96 = arith.constant 0 : index
    %313 = vector.load %arg12[%312, %c0_96] : memref<64x128xf32, #tpu.memory_space<vmem>>, vector<8x128xf32>
    tpu.vector_store %arg12[%312, %c0_96], %308 {strides = array<i32>} : memref<64x128xf32, #tpu.memory_space<vmem>>, vector<8x128xf32>,
    %c8_i32_97 = arith.constant 8 : i32
    %cst_98 = arith.constant 0.000000e+00 : f32
    %314 = vector.broadcast %cst_98 : f32 to vector<8x128xf32>
    %cst_99 = arith.constant 0.000000e+00 : f32
    %315 = vector.broadcast %cst_99 : f32 to vector<8x128xf32>
    %c0_100 = arith.constant 0 : index
    %c0_101 = arith.constant 0 : index
    %316 = vector.load %arg12[%c0_100, %c0_101] : memref<64x128xf32, #tpu.memory_space<vmem>>, vector<64x128xf32>
    %317 = arith.truncf %316 : vector<64x128xf32> to vector<64x128xbf16>
    %c0_102 = arith.constant 0 : index
    %c0_103 = arith.constant 0 : index
    %318 = vector.load %arg5[%c0_102, %c0_103] : memref<128x512xbf16, #tpu.memory_space<vmem>>, vector<128x512xbf16>
    %cst_104 = arith.constant dense<0.000000e+00> : vector<64x512xf32>
    %319 = tpu.matmul %317, %318, %cst_104 {dimension_numbers = #tpu.dot_dimension_numbers<[1], [0], [0], [1], [0, 0, 1, 1], [], []>} : vector<64x128xbf16>, vector<128x512xbf16>, vector<64x512xf32> -> vector<64x512xf32>
    %c0_105 = arith.constant 0 : index
    %c0_106 = arith.constant 0 : index
    %320 = vector.load %arg7[%c0_105, %c0_106] : memref<1x512xf32, #tpu.memory_space<vmem>>, vector<1x512xf32>
    %321 = vector.broadcast %320 : vector<1x512xf32> to vector<64x512xf32>
    %322 = arith.addf %319, %321 : vector<64x512xf32>
    %c0_107 = arith.constant 0 : index
    %c0_108 = arith.constant 0 : index
    %323 = vector.load %arg11[%c0_107, %c0_108] : memref<64x512xf32, #tpu.memory_space<vmem>>, vector<64x512xf32>
    tpu.vector_store %arg11[%c0_107, %c0_108], %322 {strides = array<i32>} : memref<64x512xf32, #tpu.memory_space<vmem>>, vector<64x512xf32>,
    %c0_i32_109 = arith.constant 0 : i32
    %c8_i32_110 = arith.constant 8 : i32
    %324 = arith.muli %c0_i32_109, %c8_i32_110 : i32
    %325 = tpu.assume_multiple %324, 8 : i32
    %326 = arith.index_cast %325 : i32 to index
    %c0_111 = arith.constant 0 : index
    %327 = vector.load %arg11[%326, %c0_111] : memref<64x512xf32, #tpu.memory_space<vmem>>, vector<8x512xf32>
    %328 = arith.truncf %314 : vector<8x128xf32> to vector<8x128xbf16>
    %c0_112 = arith.constant 0 : index
    %c0_113 = arith.constant 0 : index
    %329 = vector.load %arg6[%c0_112, %c0_113] : memref<128x512xbf16, #tpu.memory_space<vmem>>, vector<128x512xbf16>
    %cst_114 = arith.constant dense<0.000000e+00> : vector<8x512xf32>
    %330 = tpu.matmul %328, %329, %cst_114 {dimension_numbers = #tpu.dot_dimension_numbers<[1], [0], [0], [1], [0, 0, 1, 1], [], []>} : vector<8x128xbf16>, vector<128x512xbf16>, vector<8x512xf32> -> vector<8x512xf32>
    %331 = arith.addf %327, %330 : vector<8x512xf32>
    %332 = vector.extract_strided_slice %331 {offsets = [0, 0], sizes = [8, 128], strides = [1, 1]} : vector<8x512xf32> to vector<8x128xf32>
    %333 = arith.negf %332 : vector<8x128xf32>
    %334 = math.exp %333 : vector<8x128xf32>
    %cst_115 = arith.constant 1.000000e+00 : f32
    %335 = vector.broadcast %cst_115 : f32 to vector<8x128xf32>
    %336 = arith.addf %335, %334 : vector<8x128xf32>
    %337 = arith.divf %335, %336 : vector<8x128xf32>
    %338 = vector.extract_strided_slice %331 {offsets = [0, 128], sizes = [8, 128], strides = [1, 1]} : vector<8x512xf32> to vector<8x128xf32>
    %339 = arith.negf %338 : vector<8x128xf32>
    %340 = math.exp %339 : vector<8x128xf32>
    %cst_116 = arith.constant 1.000000e+00 : f32
    %341 = vector.broadcast %cst_116 : f32 to vector<8x128xf32>
    %342 = arith.addf %341, %340 : vector<8x128xf32>
    %343 = arith.divf %341, %342 : vector<8x128xf32>
    %344 = vector.extract_strided_slice %331 {offsets = [0, 256], sizes = [8, 128], strides = [1, 1]} : vector<8x512xf32> to vector<8x128xf32>
    %345 = math.tanh %344 : vector<8x128xf32>
    %346 = vector.extract_strided_slice %331 {offsets = [0, 384], sizes = [8, 128], strides = [1, 1]} : vector<8x512xf32> to vector<8x128xf32>
    %347 = arith.negf %346 : vector<8x128xf32>
    %348 = math.exp %347 : vector<8x128xf32>
    %cst_117 = arith.constant 1.000000e+00 : f32
    %349 = vector.broadcast %cst_117 : f32 to vector<8x128xf32>
    %350 = arith.addf %349, %348 : vector<8x128xf32>
    %351 = arith.divf %349, %350 : vector<8x128xf32>
    %352 = arith.mulf %343, %315 : vector<8x128xf32>
    %353 = arith.mulf %337, %345 : vector<8x128xf32>
    %354 = arith.addf %352, %353 : vector<8x128xf32>
    %355 = math.tanh %354 : vector<8x128xf32>
    %356 = arith.mulf %351, %355 : vector<8x128xf32>
    %c1_i32_118 = arith.constant 1 : i32
    %c8_i32_119 = arith.constant 8 : i32
    %357 = arith.muli %c1_i32_118, %c8_i32_119 : i32
    %358 = tpu.assume_multiple %357, 8 : i32
    %359 = arith.index_cast %358 : i32 to index
    %c0_120 = arith.constant 0 : index
    %360 = vector.load %arg11[%359, %c0_120] : memref<64x512xf32, #tpu.memory_space<vmem>>, vector<8x512xf32>
    %361 = arith.truncf %356 : vector<8x128xf32> to vector<8x128xbf16>
    %c0_121 = arith.constant 0 : index
    %c0_122 = arith.constant 0 : index
    %362 = vector.load %arg6[%c0_121, %c0_122] : memref<128x512xbf16, #tpu.memory_space<vmem>>, vector<128x512xbf16>
    %cst_123 = arith.constant dense<0.000000e+00> : vector<8x512xf32>
    %363 = tpu.matmul %361, %362, %cst_123 {dimension_numbers = #tpu.dot_dimension_numbers<[1], [0], [0], [1], [0, 0, 1, 1], [], []>} : vector<8x128xbf16>, vector<128x512xbf16>, vector<8x512xf32> -> vector<8x512xf32>
    %364 = arith.addf %360, %363 : vector<8x512xf32>
    %365 = vector.extract_strided_slice %364 {offsets = [0, 0], sizes = [8, 128], strides = [1, 1]} : vector<8x512xf32> to vector<8x128xf32>
    %366 = arith.negf %365 : vector<8x128xf32>
    %367 = math.exp %366 : vector<8x128xf32>
    %cst_124 = arith.constant 1.000000e+00 : f32
    %368 = vector.broadcast %cst_124 : f32 to vector<8x128xf32>
    %369 = arith.addf %368, %367 : vector<8x128xf32>
    %370 = arith.divf %368, %369 : vector<8x128xf32>
    %371 = vector.extract_strided_slice %364 {offsets = [0, 128], sizes = [8, 128], strides = [1, 1]} : vector<8x512xf32> to vector<8x128xf32>
    %372 = arith.negf %371 : vector<8x128xf32>
    %373 = math.exp %372 : vector<8x128xf32>
    %cst_125 = arith.constant 1.000000e+00 : f32
    %374 = vector.broadcast %cst_125 : f32 to vector<8x128xf32>
    %375 = arith.addf %374, %373 : vector<8x128xf32>
    %376 = arith.divf %374, %375 : vector<8x128xf32>
    %377 = vector.extract_strided_slice %364 {offsets = [0, 256], sizes = [8, 128], strides = [1, 1]} : vector<8x512xf32> to vector<8x128xf32>
    %378 = math.tanh %377 : vector<8x128xf32>
    %379 = vector.extract_strided_slice %364 {offsets = [0, 384], sizes = [8, 128], strides = [1, 1]} : vector<8x512xf32> to vector<8x128xf32>
    %380 = arith.negf %379 : vector<8x128xf32>
    %381 = math.exp %380 : vector<8x128xf32>
    %cst_126 = arith.constant 1.000000e+00 : f32
    %382 = vector.broadcast %cst_126 : f32 to vector<8x128xf32>
    %383 = arith.addf %382, %381 : vector<8x128xf32>
    %384 = arith.divf %382, %383 : vector<8x128xf32>
    %385 = arith.mulf %376, %354 : vector<8x128xf32>
    %386 = arith.mulf %370, %378 : vector<8x128xf32>
    %387 = arith.addf %385, %386 : vector<8x128xf32>
    %388 = math.tanh %387 : vector<8x128xf32>
    %389 = arith.mulf %384, %388 : vector<8x128xf32>
    %c2_i32_127 = arith.constant 2 : i32
    %c8_i32_128 = arith.constant 8 : i32
    %390 = arith.muli %c2_i32_127, %c8_i32_128 : i32
    %391 = tpu.assume_multiple %390, 8 : i32
    %392 = arith.index_cast %391 : i32 to index
    %c0_129 = arith.constant 0 : index
    %393 = vector.load %arg11[%392, %c0_129] : memref<64x512xf32, #tpu.memory_space<vmem>>, vector<8x512xf32>
    %394 = arith.truncf %389 : vector<8x128xf32> to vector<8x128xbf16>
    %c0_130 = arith.constant 0 : index
    %c0_131 = arith.constant 0 : index
    %395 = vector.load %arg6[%c0_130, %c0_131] : memref<128x512xbf16, #tpu.memory_space<vmem>>, vector<128x512xbf16>
    %cst_132 = arith.constant dense<0.000000e+00> : vector<8x512xf32>
    %396 = tpu.matmul %394, %395, %cst_132 {dimension_numbers = #tpu.dot_dimension_numbers<[1], [0], [0], [1], [0, 0, 1, 1], [], []>} : vector<8x128xbf16>, vector<128x512xbf16>, vector<8x512xf32> -> vector<8x512xf32>
    %397 = arith.addf %393, %396 : vector<8x512xf32>
    %398 = vector.extract_strided_slice %397 {offsets = [0, 0], sizes = [8, 128], strides = [1, 1]} : vector<8x512xf32> to vector<8x128xf32>
    %399 = arith.negf %398 : vector<8x128xf32>
    %400 = math.exp %399 : vector<8x128xf32>
    %cst_133 = arith.constant 1.000000e+00 : f32
    %401 = vector.broadcast %cst_133 : f32 to vector<8x128xf32>
    %402 = arith.addf %401, %400 : vector<8x128xf32>
    %403 = arith.divf %401, %402 : vector<8x128xf32>
    %404 = vector.extract_strided_slice %397 {offsets = [0, 128], sizes = [8, 128], strides = [1, 1]} : vector<8x512xf32> to vector<8x128xf32>
    %405 = arith.negf %404 : vector<8x128xf32>
    %406 = math.exp %405 : vector<8x128xf32>
    %cst_134 = arith.constant 1.000000e+00 : f32
    %407 = vector.broadcast %cst_134 : f32 to vector<8x128xf32>
    %408 = arith.addf %407, %406 : vector<8x128xf32>
    %409 = arith.divf %407, %408 : vector<8x128xf32>
    %410 = vector.extract_strided_slice %397 {offsets = [0, 256], sizes = [8, 128], strides = [1, 1]} : vector<8x512xf32> to vector<8x128xf32>
    %411 = math.tanh %410 : vector<8x128xf32>
    %412 = vector.extract_strided_slice %397 {offsets = [0, 384], sizes = [8, 128], strides = [1, 1]} : vector<8x512xf32> to vector<8x128xf32>
    %413 = arith.negf %412 : vector<8x128xf32>
    %414 = math.exp %413 : vector<8x128xf32>
    %cst_135 = arith.constant 1.000000e+00 : f32
    %415 = vector.broadcast %cst_135 : f32 to vector<8x128xf32>
    %416 = arith.addf %415, %414 : vector<8x128xf32>
    %417 = arith.divf %415, %416 : vector<8x128xf32>
    %418 = arith.mulf %409, %387 : vector<8x128xf32>
    %419 = arith.mulf %403, %411 : vector<8x128xf32>
    %420 = arith.addf %418, %419 : vector<8x128xf32>
    %421 = math.tanh %420 : vector<8x128xf32>
    %422 = arith.mulf %417, %421 : vector<8x128xf32>
    %c3_i32_136 = arith.constant 3 : i32
    %c8_i32_137 = arith.constant 8 : i32
    %423 = arith.muli %c3_i32_136, %c8_i32_137 : i32
    %424 = tpu.assume_multiple %423, 8 : i32
    %425 = arith.index_cast %424 : i32 to index
    %c0_138 = arith.constant 0 : index
    %426 = vector.load %arg11[%425, %c0_138] : memref<64x512xf32, #tpu.memory_space<vmem>>, vector<8x512xf32>
    %427 = arith.truncf %422 : vector<8x128xf32> to vector<8x128xbf16>
    %c0_139 = arith.constant 0 : index
    %c0_140 = arith.constant 0 : index
    %428 = vector.load %arg6[%c0_139, %c0_140] : memref<128x512xbf16, #tpu.memory_space<vmem>>, vector<128x512xbf16>
    %cst_141 = arith.constant dense<0.000000e+00> : vector<8x512xf32>
    %429 = tpu.matmul %427, %428, %cst_141 {dimension_numbers = #tpu.dot_dimension_numbers<[1], [0], [0], [1], [0, 0, 1, 1], [], []>} : vector<8x128xbf16>, vector<128x512xbf16>, vector<8x512xf32> -> vector<8x512xf32>
    %430 = arith.addf %426, %429 : vector<8x512xf32>
    %431 = vector.extract_strided_slice %430 {offsets = [0, 0], sizes = [8, 128], strides = [1, 1]} : vector<8x512xf32> to vector<8x128xf32>
    %432 = arith.negf %431 : vector<8x128xf32>
    %433 = math.exp %432 : vector<8x128xf32>
    %cst_142 = arith.constant 1.000000e+00 : f32
    %434 = vector.broadcast %cst_142 : f32 to vector<8x128xf32>
    %435 = arith.addf %434, %433 : vector<8x128xf32>
    %436 = arith.divf %434, %435 : vector<8x128xf32>
    %437 = vector.extract_strided_slice %430 {offsets = [0, 128], sizes = [8, 128], strides = [1, 1]} : vector<8x512xf32> to vector<8x128xf32>
    %438 = arith.negf %437 : vector<8x128xf32>
    %439 = math.exp %438 : vector<8x128xf32>
    %cst_143 = arith.constant 1.000000e+00 : f32
    %440 = vector.broadcast %cst_143 : f32 to vector<8x128xf32>
    %441 = arith.addf %440, %439 : vector<8x128xf32>
    %442 = arith.divf %440, %441 : vector<8x128xf32>
    %443 = vector.extract_strided_slice %430 {offsets = [0, 256], sizes = [8, 128], strides = [1, 1]} : vector<8x512xf32> to vector<8x128xf32>
    %444 = math.tanh %443 : vector<8x128xf32>
    %445 = vector.extract_strided_slice %430 {offsets = [0, 384], sizes = [8, 128], strides = [1, 1]} : vector<8x512xf32> to vector<8x128xf32>
    %446 = arith.negf %445 : vector<8x128xf32>
    %447 = math.exp %446 : vector<8x128xf32>
    %cst_144 = arith.constant 1.000000e+00 : f32
    %448 = vector.broadcast %cst_144 : f32 to vector<8x128xf32>
    %449 = arith.addf %448, %447 : vector<8x128xf32>
    %450 = arith.divf %448, %449 : vector<8x128xf32>
    %451 = arith.mulf %442, %420 : vector<8x128xf32>
    %452 = arith.mulf %436, %444 : vector<8x128xf32>
    %453 = arith.addf %451, %452 : vector<8x128xf32>
    %454 = math.tanh %453 : vector<8x128xf32>
    %455 = arith.mulf %450, %454 : vector<8x128xf32>
    %c4_i32_145 = arith.constant 4 : i32
    %c8_i32_146 = arith.constant 8 : i32
    %456 = arith.muli %c4_i32_145, %c8_i32_146 : i32
    %457 = tpu.assume_multiple %456, 8 : i32
    %458 = arith.index_cast %457 : i32 to index
    %c0_147 = arith.constant 0 : index
    %459 = vector.load %arg11[%458, %c0_147] : memref<64x512xf32, #tpu.memory_space<vmem>>, vector<8x512xf32>
    %460 = arith.truncf %455 : vector<8x128xf32> to vector<8x128xbf16>
    %c0_148 = arith.constant 0 : index
    %c0_149 = arith.constant 0 : index
    %461 = vector.load %arg6[%c0_148, %c0_149] : memref<128x512xbf16, #tpu.memory_space<vmem>>, vector<128x512xbf16>
    %cst_150 = arith.constant dense<0.000000e+00> : vector<8x512xf32>
    %462 = tpu.matmul %460, %461, %cst_150 {dimension_numbers = #tpu.dot_dimension_numbers<[1], [0], [0], [1], [0, 0, 1, 1], [], []>} : vector<8x128xbf16>, vector<128x512xbf16>, vector<8x512xf32> -> vector<8x512xf32>
    %463 = arith.addf %459, %462 : vector<8x512xf32>
    %464 = vector.extract_strided_slice %463 {offsets = [0, 0], sizes = [8, 128], strides = [1, 1]} : vector<8x512xf32> to vector<8x128xf32>
    %465 = arith.negf %464 : vector<8x128xf32>
    %466 = math.exp %465 : vector<8x128xf32>
    %cst_151 = arith.constant 1.000000e+00 : f32
    %467 = vector.broadcast %cst_151 : f32 to vector<8x128xf32>
    %468 = arith.addf %467, %466 : vector<8x128xf32>
    %469 = arith.divf %467, %468 : vector<8x128xf32>
    %470 = vector.extract_strided_slice %463 {offsets = [0, 128], sizes = [8, 128], strides = [1, 1]} : vector<8x512xf32> to vector<8x128xf32>
    %471 = arith.negf %470 : vector<8x128xf32>
    %472 = math.exp %471 : vector<8x128xf32>
    %cst_152 = arith.constant 1.000000e+00 : f32
    %473 = vector.broadcast %cst_152 : f32 to vector<8x128xf32>
    %474 = arith.addf %473, %472 : vector<8x128xf32>
    %475 = arith.divf %473, %474 : vector<8x128xf32>
    %476 = vector.extract_strided_slice %463 {offsets = [0, 256], sizes = [8, 128], strides = [1, 1]} : vector<8x512xf32> to vector<8x128xf32>
    %477 = math.tanh %476 : vector<8x128xf32>
    %478 = vector.extract_strided_slice %463 {offsets = [0, 384], sizes = [8, 128], strides = [1, 1]} : vector<8x512xf32> to vector<8x128xf32>
    %479 = arith.negf %478 : vector<8x128xf32>
    %480 = math.exp %479 : vector<8x128xf32>
    %cst_153 = arith.constant 1.000000e+00 : f32
    %481 = vector.broadcast %cst_153 : f32 to vector<8x128xf32>
    %482 = arith.addf %481, %480 : vector<8x128xf32>
    %483 = arith.divf %481, %482 : vector<8x128xf32>
    %484 = arith.mulf %475, %453 : vector<8x128xf32>
    %485 = arith.mulf %469, %477 : vector<8x128xf32>
    %486 = arith.addf %484, %485 : vector<8x128xf32>
    %487 = math.tanh %486 : vector<8x128xf32>
    %488 = arith.mulf %483, %487 : vector<8x128xf32>
    %c5_i32_154 = arith.constant 5 : i32
    %c8_i32_155 = arith.constant 8 : i32
    %489 = arith.muli %c5_i32_154, %c8_i32_155 : i32
    %490 = tpu.assume_multiple %489, 8 : i32
    %491 = arith.index_cast %490 : i32 to index
    %c0_156 = arith.constant 0 : index
    %492 = vector.load %arg11[%491, %c0_156] : memref<64x512xf32, #tpu.memory_space<vmem>>, vector<8x512xf32>
    %493 = arith.truncf %488 : vector<8x128xf32> to vector<8x128xbf16>
    %c0_157 = arith.constant 0 : index
    %c0_158 = arith.constant 0 : index
    %494 = vector.load %arg6[%c0_157, %c0_158] : memref<128x512xbf16, #tpu.memory_space<vmem>>, vector<128x512xbf16>
    %cst_159 = arith.constant dense<0.000000e+00> : vector<8x512xf32>
    %495 = tpu.matmul %493, %494, %cst_159 {dimension_numbers = #tpu.dot_dimension_numbers<[1], [0], [0], [1], [0, 0, 1, 1], [], []>} : vector<8x128xbf16>, vector<128x512xbf16>, vector<8x512xf32> -> vector<8x512xf32>
    %496 = arith.addf %492, %495 : vector<8x512xf32>
    %497 = vector.extract_strided_slice %496 {offsets = [0, 0], sizes = [8, 128], strides = [1, 1]} : vector<8x512xf32> to vector<8x128xf32>
    %498 = arith.negf %497 : vector<8x128xf32>
    %499 = math.exp %498 : vector<8x128xf32>
    %cst_160 = arith.constant 1.000000e+00 : f32
    %500 = vector.broadcast %cst_160 : f32 to vector<8x128xf32>
    %501 = arith.addf %500, %499 : vector<8x128xf32>
    %502 = arith.divf %500, %501 : vector<8x128xf32>
    %503 = vector.extract_strided_slice %496 {offsets = [0, 128], sizes = [8, 128], strides = [1, 1]} : vector<8x512xf32> to vector<8x128xf32>
    %504 = arith.negf %503 : vector<8x128xf32>
    %505 = math.exp %504 : vector<8x128xf32>
    %cst_161 = arith.constant 1.000000e+00 : f32
    %506 = vector.broadcast %cst_161 : f32 to vector<8x128xf32>
    %507 = arith.addf %506, %505 : vector<8x128xf32>
    %508 = arith.divf %506, %507 : vector<8x128xf32>
    %509 = vector.extract_strided_slice %496 {offsets = [0, 256], sizes = [8, 128], strides = [1, 1]} : vector<8x512xf32> to vector<8x128xf32>
    %510 = math.tanh %509 : vector<8x128xf32>
    %511 = vector.extract_strided_slice %496 {offsets = [0, 384], sizes = [8, 128], strides = [1, 1]} : vector<8x512xf32> to vector<8x128xf32>
    %512 = arith.negf %511 : vector<8x128xf32>
    %513 = math.exp %512 : vector<8x128xf32>
    %cst_162 = arith.constant 1.000000e+00 : f32
    %514 = vector.broadcast %cst_162 : f32 to vector<8x128xf32>
    %515 = arith.addf %514, %513 : vector<8x128xf32>
    %516 = arith.divf %514, %515 : vector<8x128xf32>
    %517 = arith.mulf %508, %486 : vector<8x128xf32>
    %518 = arith.mulf %502, %510 : vector<8x128xf32>
    %519 = arith.addf %517, %518 : vector<8x128xf32>
    %520 = math.tanh %519 : vector<8x128xf32>
    %521 = arith.mulf %516, %520 : vector<8x128xf32>
    %c6_i32_163 = arith.constant 6 : i32
    %c8_i32_164 = arith.constant 8 : i32
    %522 = arith.muli %c6_i32_163, %c8_i32_164 : i32
    %523 = tpu.assume_multiple %522, 8 : i32
    %524 = arith.index_cast %523 : i32 to index
    %c0_165 = arith.constant 0 : index
    %525 = vector.load %arg11[%524, %c0_165] : memref<64x512xf32, #tpu.memory_space<vmem>>, vector<8x512xf32>
    %526 = arith.truncf %521 : vector<8x128xf32> to vector<8x128xbf16>
    %c0_166 = arith.constant 0 : index
    %c0_167 = arith.constant 0 : index
    %527 = vector.load %arg6[%c0_166, %c0_167] : memref<128x512xbf16, #tpu.memory_space<vmem>>, vector<128x512xbf16>
    %cst_168 = arith.constant dense<0.000000e+00> : vector<8x512xf32>
    %528 = tpu.matmul %526, %527, %cst_168 {dimension_numbers = #tpu.dot_dimension_numbers<[1], [0], [0], [1], [0, 0, 1, 1], [], []>} : vector<8x128xbf16>, vector<128x512xbf16>, vector<8x512xf32> -> vector<8x512xf32>
    %529 = arith.addf %525, %528 : vector<8x512xf32>
    %530 = vector.extract_strided_slice %529 {offsets = [0, 0], sizes = [8, 128], strides = [1, 1]} : vector<8x512xf32> to vector<8x128xf32>
    %531 = arith.negf %530 : vector<8x128xf32>
    %532 = math.exp %531 : vector<8x128xf32>
    %cst_169 = arith.constant 1.000000e+00 : f32
    %533 = vector.broadcast %cst_169 : f32 to vector<8x128xf32>
    %534 = arith.addf %533, %532 : vector<8x128xf32>
    %535 = arith.divf %533, %534 : vector<8x128xf32>
    %536 = vector.extract_strided_slice %529 {offsets = [0, 128], sizes = [8, 128], strides = [1, 1]} : vector<8x512xf32> to vector<8x128xf32>
    %537 = arith.negf %536 : vector<8x128xf32>
    %538 = math.exp %537 : vector<8x128xf32>
    %cst_170 = arith.constant 1.000000e+00 : f32
    %539 = vector.broadcast %cst_170 : f32 to vector<8x128xf32>
    %540 = arith.addf %539, %538 : vector<8x128xf32>
    %541 = arith.divf %539, %540 : vector<8x128xf32>
    %542 = vector.extract_strided_slice %529 {offsets = [0, 256], sizes = [8, 128], strides = [1, 1]} : vector<8x512xf32> to vector<8x128xf32>
    %543 = math.tanh %542 : vector<8x128xf32>
    %544 = vector.extract_strided_slice %529 {offsets = [0, 384], sizes = [8, 128], strides = [1, 1]} : vector<8x512xf32> to vector<8x128xf32>
    %545 = arith.negf %544 : vector<8x128xf32>
    %546 = math.exp %545 : vector<8x128xf32>
    %cst_171 = arith.constant 1.000000e+00 : f32
    %547 = vector.broadcast %cst_171 : f32 to vector<8x128xf32>
    %548 = arith.addf %547, %546 : vector<8x128xf32>
    %549 = arith.divf %547, %548 : vector<8x128xf32>
    %550 = arith.mulf %541, %519 : vector<8x128xf32>
    %551 = arith.mulf %535, %543 : vector<8x128xf32>
    %552 = arith.addf %550, %551 : vector<8x128xf32>
    %553 = math.tanh %552 : vector<8x128xf32>
    %554 = arith.mulf %549, %553 : vector<8x128xf32>
    %c7_i32_172 = arith.constant 7 : i32
    %c8_i32_173 = arith.constant 8 : i32
    %555 = arith.muli %c7_i32_172, %c8_i32_173 : i32
    %556 = tpu.assume_multiple %555, 8 : i32
    %557 = arith.index_cast %556 : i32 to index
    %c0_174 = arith.constant 0 : index
    %558 = vector.load %arg11[%557, %c0_174] : memref<64x512xf32, #tpu.memory_space<vmem>>, vector<8x512xf32>
    %559 = arith.truncf %554 : vector<8x128xf32> to vector<8x128xbf16>
    %c0_175 = arith.constant 0 : index
    %c0_176 = arith.constant 0 : index
    %560 = vector.load %arg6[%c0_175, %c0_176] : memref<128x512xbf16, #tpu.memory_space<vmem>>, vector<128x512xbf16>
    %cst_177 = arith.constant dense<0.000000e+00> : vector<8x512xf32>
    %561 = tpu.matmul %559, %560, %cst_177 {dimension_numbers = #tpu.dot_dimension_numbers<[1], [0], [0], [1], [0, 0, 1, 1], [], []>} : vector<8x128xbf16>, vector<128x512xbf16>, vector<8x512xf32> -> vector<8x512xf32>
    %562 = arith.addf %558, %561 : vector<8x512xf32>
    %563 = vector.extract_strided_slice %562 {offsets = [0, 0], sizes = [8, 128], strides = [1, 1]} : vector<8x512xf32> to vector<8x128xf32>
    %564 = arith.negf %563 : vector<8x128xf32>
    %565 = math.exp %564 : vector<8x128xf32>
    %cst_178 = arith.constant 1.000000e+00 : f32
    %566 = vector.broadcast %cst_178 : f32 to vector<8x128xf32>
    %567 = arith.addf %566, %565 : vector<8x128xf32>
    %568 = arith.divf %566, %567 : vector<8x128xf32>
    %569 = vector.extract_strided_slice %562 {offsets = [0, 128], sizes = [8, 128], strides = [1, 1]} : vector<8x512xf32> to vector<8x128xf32>
    %570 = arith.negf %569 : vector<8x128xf32>
    %571 = math.exp %570 : vector<8x128xf32>
    %cst_179 = arith.constant 1.000000e+00 : f32
    %572 = vector.broadcast %cst_179 : f32 to vector<8x128xf32>
    %573 = arith.addf %572, %571 : vector<8x128xf32>
    %574 = arith.divf %572, %573 : vector<8x128xf32>
    %575 = vector.extract_strided_slice %562 {offsets = [0, 256], sizes = [8, 128], strides = [1, 1]} : vector<8x512xf32> to vector<8x128xf32>
    %576 = math.tanh %575 : vector<8x128xf32>
    %577 = vector.extract_strided_slice %562 {offsets = [0, 384], sizes = [8, 128], strides = [1, 1]} : vector<8x512xf32> to vector<8x128xf32>
    %578 = arith.negf %577 : vector<8x128xf32>
    %579 = math.exp %578 : vector<8x128xf32>
    %cst_180 = arith.constant 1.000000e+00 : f32
    %580 = vector.broadcast %cst_180 : f32 to vector<8x128xf32>
    %581 = arith.addf %580, %579 : vector<8x128xf32>
    %582 = arith.divf %580, %581 : vector<8x128xf32>
    %583 = arith.mulf %574, %552 : vector<8x128xf32>
    %584 = arith.mulf %568, %576 : vector<8x128xf32>
    %585 = arith.addf %583, %584 : vector<8x128xf32>
    %586 = math.tanh %585 : vector<8x128xf32>
    %587 = arith.mulf %582, %586 : vector<8x128xf32>
    %c8_i32_181 = arith.constant 8 : i32
    %588 = arith.truncf %587 : vector<8x128xf32> to vector<8x128xbf16>
    %c0_182 = arith.constant 0 : index
    %c0_183 = arith.constant 0 : index
    %589 = vector.load %arg8[%c0_182, %c0_183] : memref<128x128xbf16, #tpu.memory_space<vmem>>, vector<128x128xbf16>
    %cst_184 = arith.constant dense<0.000000e+00> : vector<8x128xf32>
    %590 = tpu.matmul %588, %589, %cst_184 {dimension_numbers = #tpu.dot_dimension_numbers<[1], [0], [0], [1], [0, 0, 1, 1], [], []>} : vector<8x128xbf16>, vector<128x128xbf16>, vector<8x128xf32> -> vector<8x128xf32>
    %c0_185 = arith.constant 0 : index
    %c0_186 = arith.constant 0 : index
    %591 = vector.load %arg9[%c0_185, %c0_186] : memref<1x128xf32, #tpu.memory_space<vmem>>, vector<1x128xf32>
    %592 = vector.broadcast %591 : vector<1x128xf32> to vector<8x128xf32>
    %593 = arith.addf %590, %592 : vector<8x128xf32>
    %c0_187 = arith.constant 0 : index
    %c0_188 = arith.constant 0 : index
    %594 = vector.load %arg10[%c0_187, %c0_188] : memref<8x128xf32, #tpu.memory_space<vmem>>, vector<8x128xf32>
    tpu.vector_store %arg10[%c0_187, %c0_188], %593 {strides = array<i32>} : memref<8x128xf32, #tpu.memory_space<vmem>>, vector<8x128xf32>,
    return
  }
  func.func @transform_0(%arg0: i32) -> (i32, i32, i32) {
    %c0_i32 = arith.constant 0 : i32
    %c0_i32_0 = arith.constant 0 : i32
    %c0_i32_1 = arith.constant 0 : i32
    return %arg0, %c0_i32, %c0_i32_0 : i32, i32, i32
  }
  func.func @transform_1(%arg0: i32) -> (i32, i32) {
    %c0_i32 = arith.constant 0 : i32
    %c0_i32_0 = arith.constant 0 : i32
    %c0_i32_1 = arith.constant 0 : i32
    return %c0_i32, %c0_i32_0 : i32, i32
  }
  func.func @transform_2(%arg0: i32) -> (i32, i32) {
    %c0_i32 = arith.constant 0 : i32
    %c0_i32_0 = arith.constant 0 : i32
    %c0_i32_1 = arith.constant 0 : i32
    return %c0_i32, %c0_i32_0 : i32, i32
  }
  func.func @transform_3(%arg0: i32) -> (i32, i32) {
    %c0_i32 = arith.constant 0 : i32
    %c0_i32_0 = arith.constant 0 : i32
    %c0_i32_1 = arith.constant 0 : i32
    return %c0_i32, %c0_i32_0 : i32, i32
  }
  func.func @transform_4(%arg0: i32) -> (i32, i32) {
    %c0_i32 = arith.constant 0 : i32
    %c0_i32_0 = arith.constant 0 : i32
    %c0_i32_1 = arith.constant 0 : i32
    return %c0_i32, %c0_i32_0 : i32, i32
  }
  func.func @transform_5(%arg0: i32) -> (i32, i32) {
    %c0_i32 = arith.constant 0 : i32
    %c0_i32_0 = arith.constant 0 : i32
    %c0_i32_1 = arith.constant 0 : i32
    return %c0_i32, %c0_i32_0 : i32, i32
  }
  func.func @transform_6(%arg0: i32) -> (i32, i32) {
    %c0_i32 = arith.constant 0 : i32
    %c0_i32_0 = arith.constant 0 : i32
    %c0_i32_1 = arith.constant 0 : i32
    return %c0_i32, %c0_i32_0 : i32, i32
  }
  func.func @transform_7(%arg0: i32) -> (i32, i32) {
    %c0_i32 = arith.constant 0 : i32
    %c0_i32_0 = arith.constant 0 : i32
    %c0_i32_1 = arith.constant 0 : i32
    return %c0_i32, %c0_i32_0 : i32, i32
  }
  func.func @transform_8(%arg0: i32) -> (i32, i32) {
    %c0_i32 = arith.constant 0 : i32
    %c0_i32_0 = arith.constant 0 : i32
    %c0_i32_1 = arith.constant 0 : i32
    return %c0_i32, %c0_i32_0 : i32, i32
  }
  func.func @transform_9(%arg0: i32) -> (i32, i32) {
    %c0_i32 = arith.constant 0 : i32
    %c0_i32_0 = arith.constant 0 : i32
    return %arg0, %c0_i32 : i32, i32
  }
}

</mosaic_0001>

<bundles_post_ra>
// kernel: lstm_rnn_forward.1
= control target key start
LH: loop header
LB: loop body
LE: loop exit
PB: predicated region body
PF: predicated region fallthrough
CT: control target
= control target key end

     0   :  { %v7217_v3 = vmov 0.0   ;;  %vm67_vm0 = vcmask 64512   ;;  %v7223_v45 = vmov 0   ;;  %v47_v46 = vlaneseq  ;;  %s7207_s1 = inlined_call_operand.vmem [shape: f32[8,512], index: 1, kind: input, shape index: {}]   ;;  %s7208_s0 = inlined_call_operand.vmem [shape: f32[1,64,8], index: 0, kind: input, shape index: {}]   ;;  %s7209_s2 = inlined_call_operand.vmem [shape: bf16[128,512], index: 2, kind: input, shape index: {}]   ;;  %s7210_s3 = inlined_call_operand.vmem [shape: f32[1,512], index: 3, kind: input, shape index: {}]   ;;  %s7211_s4 = inlined_call_operand.vmem [shape: bf16[128,512], index: 4, kind: input, shape index: {}]   ;;  %s7212_s5 = inlined_call_operand.vmem [shape: bf16[128,512], index: 5, kind: input, shape index: {}]   ;;  %s7213_s6 = inlined_call_operand.vmem [shape: f32[1,512], index: 6, kind: input, shape index: {}]   ;;  %s7214_s7 = inlined_call_operand.vmem [shape: bf16[128,128], index: 7, kind: input, shape index: {}]   ;;  %s7215_s8 = inlined_call_operand.vmem [shape: f32[1,128], index: 8, kind: input, shape index: {}]   ;;  %s7216_s9 = inlined_call_operand.vmem [shape: f32[8,128], index: 9, kind: output, shape index: {}]  }
   0x1   :  { %v42_v0 = vld [vmem:[%s7207_s1 + $0x8] sm:$0xff]  ;;  %v44_v1 = vld [vmem:[%s7207_s1 + $0x18] sm:$0xff]  ;;  %v41_v2 = vld [vmem:[%s7207_s1] sm:$0xff]  ;;  %156 = vmatprep.mubr.f32.mxu0 %v7217_v3  ;;  %269 = vmatprep.mubr.f32.mxu1 %v7217_v3  ;;  %vm5398_vm1 = vmmov 0  }
   0x2   :  { %122 = vmatprep.subr.mxu0 %v42_v0  ;;  %235 = vmatprep.subr.mxu1 %v44_v1  ;;  %v43_v4 = vld [vmem:[%s7207_s1 + $0x10] sm:$0xff]  ;;  %v33_v5 = vld [vmem:[%s7208_s0] sm:$0xff]  ;;  %v5481_v8 = vld [vmem:[%s7209_s2 + $0xe8] ss:$16 sps:$4 sm:$0xff]   ;;  %v5749_v47 = vshrl.u32 %v47_v46, 7 }
   0x3   :  { %123 = vmatpush1.msra.mxu0 %v41_v2  ;;  %236 = vmatpush1.msra.mxu1 %v43_v4  ;;  %v5469_v6 = vld [vmem:[%s7209_s2 + $0xe0] ss:$16 sps:$4 sm:$0xff]   ;;  %v5474_v7 = vld [vmem:[%s7209_s2 + $0xe4] ss:$16 sps:$4 sm:$0xff]   ;;  %v5487_v9 = vld [vmem:[%s7209_s2 + $0xec] ss:$16 sps:$4 sm:$0xff]  }
   0x4   :  { %4483 = vmatmul.mubr.msk.f32.vlgmr.msra.gmra.mxu0 %vm67_vm0, %v33_v5  ;;  %4491 = vmatmul.mubr.msk.f32.vlgmr.msra.gmra.mxu1 %vm67_vm0, %v33_v5  ;;  %v34_v10 = vld [vmem:[%s7208_s0 + $0x8] sm:$0xff]  ;;  %v5498_v11 = vld [vmem:[%s7209_s2 + $0xc0] ss:$16 sps:$4 sm:$0xff]   ;;  %v5503_v12 = vld [vmem:[%s7209_s2 + $0xc4] ss:$16 sps:$4 sm:$0xff]   ;;  %7227 = vst [vmem:[#allocation4_spill] sm:$0xff] %v5749_v47 }
   0x5   :  { %549 = vmatprep.subr.bf16.mxu0 %v5474_v7  ;;  %162 = vmatprep.mubr.f32.mxu0 %v7217_v3  ;;  %v5511_v13 = vld [vmem:[%s7209_s2 + $0xc8] ss:$16 sps:$4 sm:$0xff]   ;;  %v5516_v14 = vld [vmem:[%s7209_s2 + $0xcc] ss:$16 sps:$4 sm:$0xff]   ;;  %v35_v15 = vld [vmem:[%s7208_s0 + $0x10] sm:$0xff]  ;;  %v7222_v48 = vsub.s32 0, %v5749_v47 }
   0x6   :  { %550 = vmatpush1.bf16.msra.mxu0 %v5469_v6  ;;  %275 = vmatprep.mubr.f32.mxu1 %v7217_v3  ;;  %v5526_v16 = vld [vmem:[%s7209_s2 + $0xa4] ss:$16 sps:$4 sm:$0xff]   ;;  %v5533_v17 = vld [vmem:[%s7209_s2 + $0xa0] ss:$16 sps:$4 sm:$0xff]   ;;  %v5540_v18 = vld [vmem:[%s7209_s2 + $0xac] ss:$16 sps:$4 sm:$0xff]  }
   0x7   :  { %590 = vmatprep.subr.bf16.mxu1 %v5487_v9  ;;  %551 = vmatprep.subr.bf16.mxu0 %v5503_v12  ;;  %v5547_v19 = vld [vmem:[%s7209_s2 + $0xa8] ss:$16 sps:$4 sm:$0xff]   ;;  %v5557_v21 = vld [vmem:[%s7209_s2 + $0x84] ss:$16 sps:$4 sm:$0xff]   ;;  %v5564_v22 = vld [vmem:[%s7209_s2 + $0x80] ss:$16 sps:$4 sm:$0xff]  }
   0x8   :  { %591 = vmatpush1.bf16.msra.mxu1 %v5481_v8  ;;  %4484 = vmatmul.mubr.msk.f32.gmra.mxu0 %vm67_vm0, %v34_v10  ;;  %v36_v20 = vld [vmem:[%s7208_s0 + $0x18] sm:$0xff]  ;;  %v37_v25 = vld [vmem:[%s7208_s0 + $0x20] sm:$0xff]  ;;  %v38_v30 = vld [vmem:[%s7208_s0 + $0x28] sm:$0xff]  ;;  %v7219_v51 = vsub.s32 2, %v5749_v47  ;;  %v7221_v53 = vsub.s32 1, %v5749_v47  ;;  %v7220_v55 = vsub.s32 3, %v5749_v47 }
   0x9   :  { %4492 = vmatmul.mubr.msk.f32.gmra.mxu1 %vm67_vm0, %v34_v10  ;;  %592 = vmatprep.subr.bf16.mxu1 %v5516_v14  ;;  %v5569_v23 = vld [vmem:[%s7209_s2 + $0x8c] ss:$16 sps:$4 sm:$0xff]   ;;  %v5578_v24 = vld [vmem:[%s7209_s2 + $0x88] ss:$16 sps:$4 sm:$0xff]   ;;  %v5588_v26 = vld [vmem:[%s7209_s2 + $0x64] ss:$16 sps:$4 sm:$0xff]  }
   0xa   :  { %552 = vmatpush1.bf16.msra.mxu0 %v5498_v11  ;;  %168 = vmatprep.mubr.f32.mxu0 %v7217_v3  ;;  %v5595_v27 = vld [vmem:[%s7209_s2 + $0x60] ss:$16 sps:$4 sm:$0xff]   ;;  %v5600_v28 = vld [vmem:[%s7209_s2 + $0x6c] ss:$16 sps:$4 sm:$0xff]   ;;  %v5609_v29 = vld [vmem:[%s7209_s2 + $0x68] ss:$16 sps:$4 sm:$0xff]  }
   0xb   :  { %281 = vmatprep.mubr.f32.mxu1 %v7217_v3  ;;  %553 = vmatprep.subr.bf16.mxu0 %v5526_v16  ;;  %v5619_v31 = vld [vmem:[%s7209_s2 + $0x40] ss:$16 sps:$4 sm:$0xff]   ;;  %v5624_v32 = vld [vmem:[%s7209_s2 + $0x44] ss:$16 sps:$4 sm:$0xff]   ;;  %v5631_v33 = vld [vmem:[%s7209_s2 + $0x4c] ss:$16 sps:$4 sm:$0xff]  }
   0xc   :  { %593 = vmatpush1.bf16.msra.mxu1 %v5511_v13  ;;  %4485 = vmatmul.mubr.msk.f32.gmra.mxu0 %vm67_vm0, %v35_v15  ;;  %v5638_v34 = vld [vmem:[%s7209_s2 + $0x48] ss:$16 sps:$4 sm:$0xff]   ;;  %v39_v35 = vld [vmem:[%s7208_s0 + $0x30] sm:$0xff]  ;;  %v5667_v39 = vld [vmem:[%s7209_s2 + $0x2c] ss:$16 sps:$4 sm:$0xff]  }
   0xd   :  { %4493 = vmatmul.mubr.msk.f32.gmra.mxu1 %vm67_vm0, %v35_v15  ;;  %594 = vmatprep.subr.bf16.mxu1 %v5540_v18  ;;  %v5648_v36 = vld [vmem:[%s7209_s2 + $0x20] ss:$16 sps:$4 sm:$0xff]   ;;  %v5655_v37 = vld [vmem:[%s7209_s2 + $0x24] ss:$16 sps:$4 sm:$0xff]   ;;  %v5662_v38 = vld [vmem:[%s7209_s2 + $0x28] ss:$16 sps:$4 sm:$0xff]  }
   0xe   :  { %554 = vmatpush1.bf16.msra.mxu0 %v5533_v17  ;;  %174 = vmatprep.mubr.f32.mxu0 %v7217_v3  ;;  %v40_v40 = vld [vmem:[%s7208_s0 + $0x38] sm:$0xff]  ;;  %v5677_v41 = vld [vmem:[%s7209_s2 + $0x4] ss:$16 sps:$4 sm:$0xff]   ;;  %v5684_v42 = vld [vmem:[%s7209_s2] ss:$16 sps:$4 sm:$0xff]  }
   0xf   :  { %287 = vmatprep.mubr.f32.mxu1 %v7217_v3  ;;  %555 = vmatprep.subr.bf16.mxu0 %v5557_v21  ;;  %v5689_v43 = vld [vmem:[%s7209_s2 + $0xc] ss:$16 sps:$4 sm:$0xff]   ;;  %v5698_v44 = vld [vmem:[%s7209_s2 + $0x8] ss:$16 sps:$4 sm:$0xff]   ;;  %v45_v49 = vld [vmem:[%s7210_s3] sm:$0xf] }
  0x10   :  { %595 = vmatpush1.bf16.msra.mxu1 %v5547_v19  ;;  %4486 = vmatmul.mubr.msk.f32.gmra.mxu0 %vm67_vm0, %v36_v20  ;;  %v50_v57 = vrot.slane %v45_v49, %v7222_v48  ;;  %v5770_v58 = vrot.slane %v45_v49, %v7219_v51  ;;  %v54_v60 = vrot.slane %v45_v49, %v7221_v53 }
  0x11   :  { %4494 = vmatmul.mubr.msk.f32.gmra.mxu1 %vm67_vm0, %v36_v20  ;;  %596 = vmatprep.subr.bf16.mxu1 %v5569_v23  ;;  %v5778_v63 = vrot.slane %v45_v49, %v7220_v55 }
  0x12   :  { %556 = vmatpush1.bf16.msra.mxu0 %v5564_v22  ;;  %180 = vmatprep.mubr.f32.mxu0 %v7217_v3 }
  0x13   :  { %293 = vmatprep.mubr.f32.mxu1 %v7217_v3  ;;  %557 = vmatprep.subr.bf16.mxu0 %v5588_v26 }
  0x14   :  { %597 = vmatpush1.bf16.msra.mxu1 %v5578_v24  ;;  %4487 = vmatmul.mubr.msk.f32.gmra.mxu0 %vm67_vm0, %v37_v25 }
  0x15   :  { %4495 = vmatmul.mubr.msk.f32.gmra.mxu1 %vm67_vm0, %v37_v25  ;;  %598 = vmatprep.subr.bf16.mxu1 %v5600_v28 }
  0x16   :  { %558 = vmatpush1.bf16.msra.mxu0 %v5595_v27  ;;  %186 = vmatprep.mubr.f32.mxu0 %v7217_v3 }
  0x17   :  { %299 = vmatprep.mubr.f32.mxu1 %v7217_v3  ;;  %559 = vmatprep.subr.bf16.mxu0 %v5624_v32 }
  0x18   :  { %599 = vmatpush1.bf16.msra.mxu1 %v5609_v29  ;;  %4488 = vmatmul.mubr.msk.f32.gmra.mxu0 %vm67_vm0, %v38_v30 }
  0x19   :  { %4496 = vmatmul.mubr.msk.f32.gmra.mxu1 %vm67_vm0, %v38_v30  ;;  %600 = vmatprep.subr.bf16.mxu1 %v5631_v33 }
  0x1a   :  { %560 = vmatpush1.bf16.msra.mxu0 %v5619_v31  ;;  %192 = vmatprep.mubr.f32.mxu0 %v7217_v3 }
  0x1b   :  { %305 = vmatprep.mubr.f32.mxu1 %v7217_v3  ;;  %561 = vmatprep.subr.bf16.mxu0 %v5655_v37 }
  0x1c   :  { %601 = vmatpush1.bf16.msra.mxu1 %v5638_v34  ;;  %4489 = vmatmul.mubr.msk.f32.gmra.mxu0 %vm67_vm0, %v39_v35 }
  0x1d   :  { %4497 = vmatmul.mubr.msk.f32.gmra.mxu1 %vm67_vm0, %v39_v35  ;;  %602 = vmatprep.subr.bf16.mxu1 %v5667_v39 }
  0x1e   :  { %562 = vmatpush1.bf16.msra.mxu0 %v5648_v36  ;;  %198 = vmatprep.mubr.f32.mxu0 %v7217_v3 }
  0x1f   :  { %311 = vmatprep.mubr.f32.mxu1 %v7217_v3  ;;  %563 = vmatprep.subr.bf16.mxu0 %v5677_v41 }
  0x20   :  { %603 = vmatpush1.bf16.msra.mxu1 %v5662_v38  ;;  %4490 = vmatmul.mubr.msk.f32.gmra.mxu0 %vm67_vm0, %v40_v40 }
  0x21   :  { %4498 = vmatmul.mubr.msk.f32.gmra.mxu1 %vm67_vm0, %v40_v40  ;;  %604 = vmatprep.subr.bf16.mxu1 %v5689_v43 }
  0x22   :  { %564 = vmatpush1.bf16.msra.mxu0 %v5684_v42  ;;  %581 = vmatprep.mubr.bf16.mxu0 %v7223_v45 }
  0x23   :  { %622 = vmatprep.mubr.bf16.mxu1 %v7223_v45  ;;  %860 = vmatprep.subr.bf16.mxu0 %v5474_v7 }
  0x24   :  { %605 = vmatpush1.bf16.msra.mxu1 %v5698_v44 }
  0x25   :  { %582 = vmatmul.mubr.bf16.vlgmr.msra.gmra.mxu0 %v7223_v45  ;;  %901 = vmatprep.subr.bf16.mxu1 %v5487_v9 }
  0x26   :  { %861 = vmatpush1.bf16.msra.mxu0 %v5469_v6  ;;  %892 = vmatprep.mubr.bf16.mxu0 %v7223_v45 }
  0x27   :  { %623 = vmatmul.mubr.bf16.vlgmr.msra.gmra.mxu1 %v7223_v45  ;;  %862 = vmatprep.subr.bf16.mxu0 %v5503_v12 }
  0x28   :  { %902 = vmatpush1.bf16.msra.mxu1 %v5481_v8  ;;  %933 = vmatprep.mubr.bf16.mxu1 %v7223_v45 }
  0x29   :  { %903 = vmatprep.subr.bf16.mxu1 %v5516_v14 }
  0x2a   :  { %863 = vmatpush1.bf16.msra.mxu0 %v5498_v11 }
  0x2b   :  { %864 = vmatprep.subr.bf16.mxu0 %v5526_v16 }
  0x2c   :  { %904 = vmatpush1.bf16.msra.mxu1 %v5511_v13 }
  0x2d   :  { %905 = vmatprep.subr.bf16.mxu1 %v5540_v18 }
  0x2e   :  { %865 = vmatpush1.bf16.msra.mxu0 %v5533_v17 }
  0x2f   :  { %866 = vmatprep.subr.bf16.mxu0 %v5557_v21 }
  0x30   :  { %906 = vmatpush1.bf16.msra.mxu1 %v5547_v19 }
  0x31   :  { %907 = vmatprep.subr.bf16.mxu1 %v5569_v23 }
  0x32   :  { %867 = vmatpush1.bf16.msra.mxu0 %v5564_v22 }
  0x33   :  { %868 = vmatprep.subr.bf16.mxu0 %v5588_v26 }
  0x34   :  { %908 = vmatpush1.bf16.msra.mxu1 %v5578_v24 }
  0x35   :  { %909 = vmatprep.subr.bf16.mxu1 %v5600_v28 }
  0x36   :  { %869 = vmatpush1.bf16.msra.mxu0 %v5595_v27 }
  0x37   :  { %870 = vmatprep.subr.bf16.mxu0 %v5624_v32 }
  0x38   :  { %910 = vmatpush1.bf16.msra.mxu1 %v5609_v29 }
  0x39   :  { %911 = vmatprep.subr.bf16.mxu1 %v5631_v33 }
  0x3a   :  { %871 = vmatpush1.bf16.msra.mxu0 %v5619_v31 }
  0x3b   :  { %872 = vmatprep.subr.bf16.mxu0 %v5655_v37 }
  0x3c   :  { %912 = vmatpush1.bf16.msra.mxu1 %v5638_v34 }
  0x3d   :  { %913 = vmatprep.subr.bf16.mxu1 %v5667_v39 }
  0x3e   :  { %873 = vmatpush1.bf16.msra.mxu0 %v5648_v36 }
  0x3f   :  { %874 = vmatprep.subr.bf16.mxu0 %v5677_v41 }
  0x40   :  { %914 = vmatpush1.bf16.msra.mxu1 %v5662_v38 }
  0x41   :  { %915 = vmatprep.subr.bf16.mxu1 %v5689_v43 }
  0x42   :  { %875 = vmatpush1.bf16.msra.mxu0 %v5684_v42 }
  0x43   :  { %1172 = vmatprep.subr.bf16.mxu0 %v5474_v7 }
  0x44   :  { %916 = vmatpush1.bf16.msra.mxu1 %v5698_v44 }
  0x45   :  { %1213 = vmatprep.subr.bf16.mxu1 %v5487_v9 }
  0xc4   :  { %v5755_v50 = vpop.f32.mrf.mxu0  ;;  %v5758_v52 = vpop.f32.mrf.mxu1 }
  0xc6   :  { %v5761_v54 = vpop.f32.mrf.mxu0  ;;  %v5764_v56 = vpop.f32.mrf.mxu1 }
  0xc8   :  { %v164_v59 = vpop.f32.mrf.mxu0 }
  0xc9   :  { %v5774_v61 = vadd.f32 %v164_v59, %v50_v57  ;;  %v277_v62 = vpop.f32.mrf.mxu1 }
  0xca   :  { %v5781_v0 = vadd.f32 %v277_v62, %v5770_v58  ;;  %v166_v1 = vpop.f32.mrf.mxu0 }
  0xcb   :  { %v5783_v2 = vadd.f32 %v166_v1, %v54_v60  ;;  %v279_v4 = vpop.f32.mrf.mxu1 }
  0xcc   :  { %v5786_v5 = vadd.f32 %v279_v4, %v5778_v63  ;;  %v170_v10 = vpop.f32.mrf.mxu0 }
  0xcd   :  { %v5788_v15 = vadd.f32 %v170_v10, %v50_v57  ;;  %v283_v20 = vpop.f32.mrf.mxu1 }
  0xce   :  { %v5791_v25 = vadd.f32 %v283_v20, %v5770_v58  ;;  %v172_v30 = vpop.f32.mrf.mxu0 }
  0xcf   :  { %v5793_v35 = vadd.f32 %v172_v30, %v54_v60  ;;  %v285_v40 = vpop.f32.mrf.mxu1 }
  0xd0   :  { %v5796_v46 = vadd.f32 %v285_v40, %v5778_v63  ;;  %v176_v49 = vpop.f32.mrf.mxu0 }
  0xd1   :  { %v5798_v59 = vadd.f32 %v176_v49, %v50_v57  ;;  %v289_v62 = vpop.f32.mrf.mxu1 }
  0xd2   :  { %v5801_v1 = vadd.f32 %v289_v62, %v5770_v58  ;;  %v178_v4 = vpop.f32.mrf.mxu0 }
  0xd3   :  { %7228 = vst [vmem:[#allocation5_spill] sm:$0xff] %v5798_v59  ;;  %v5803_v10 = vadd.f32 %v178_v4, %v54_v60  ;;  %v291_v3 = vpop.f32.mrf.mxu1 }
  0xd4   :  { %7229 = vst [vmem:[#allocation6_spill] sm:$0xff] %v5801_v1  ;;  %v5806_v20 = vadd.f32 %v291_v3, %v5778_v63  ;;  %v182_v30 = vpop.f32.mrf.mxu0 }
  0xd5   :  { %7230 = vst [vmem:[#allocation7_spill] sm:$0xff] %v5803_v10  ;;  %v5808_v51 = vadd.f32 %v182_v30, %v50_v57  ;;  %v295_v55 = vpop.f32.mrf.mxu1 }
  0xd6   :  { %7231 = vst [vmem:[#allocation8_spill] sm:$0xff] %v5806_v20  ;;  %v5811_v40 = vadd.f32 %v295_v55, %v5770_v58  ;;  %v184_v49 = vpop.f32.mrf.mxu0 }
  0xd7   :  { %7232 = vst [vmem:[#allocation9_spill] sm:$0xff] %v5808_v51  ;;  %v5813_v53 = vadd.f32 %v184_v49, %v54_v60  ;;  %v297_v48 = vpop.f32.mrf.mxu1 }
  0xd8   :  { %7233 = vst [vmem:[#allocation10_spill] sm:$0xff] %v5811_v40  ;;  %v5816_v62 = vadd.f32 %v297_v48, %v5778_v63  ;;  %v188_v4 = vpop.f32.mrf.mxu0 }
  0xd9   :  { %7234 = vst [vmem:[#allocation11_spill] sm:$0xff] %v5813_v53  ;;  %v5818_v45 = vadd.f32 %v188_v4, %v50_v57  ;;  %v301_v47 = vpop.f32.mrf.mxu1 }
  0xda   :  { %7235 = vst [vmem:[#allocation12_spill] sm:$0xff] %v5816_v62  ;;  %v5821_v3 = vadd.f32 %v301_v47, %v5770_v58  ;;  %v190_v30 = vpop.f32.mrf.mxu0 }
  0xdb   :  { %7236 = vst [vmem:[#allocation13_spill] sm:$0xff] %v5818_v45  ;;  %v5823_v51 = vadd.f32 %v190_v30, %v54_v60  ;;  %v303_v1 = vpop.f32.mrf.mxu1 }
  0xdc   :  { %7237 = vst [vmem:[#allocation14_spill] sm:$0xff] %v5821_v3  ;;  %v5826_v55 = vadd.f32 %v303_v1, %v5778_v63  ;;  %v194_v49 = vpop.f32.mrf.mxu0 }
  0xdd   :  { %7238 = vst [vmem:[#allocation15_spill] sm:$0xff] %v5823_v51  ;;  %v5828_v40 = vadd.f32 %v194_v49, %v50_v57  ;;  %v307_v53 = vpop.f32.mrf.mxu1 }
  0xde   :  { %7239 = vst [vmem:[#allocation16_spill] sm:$0xff] %v5826_v55  ;;  %v5831_v48 = vadd.f32 %v307_v53, %v5770_v58  ;;  %v196_v4 = vpop.f32.mrf.mxu0  ;;  %v159_v53 = vadd.f32 %v5755_v50, %v50_v57  ;;  %v274_v50 = vadd.f32 %v5764_v56, %v5778_v63 }
  0xdf   :  { %7240 = vst [vmem:[#allocation17_spill] sm:$0xff] %v5828_v40  ;;  %v5833_v45 = vadd.f32 %v196_v4, %v54_v60  ;;  %v309_v62 = vpop.f32.mrf.mxu1 }
  0xe0   :  { %7241 = vst [vmem:[#allocation18_spill] sm:$0xff] %v5831_v48  ;;  %v5836_v47 = vadd.f32 %v309_v62, %v5778_v63  ;;  %v200_v30 = vpop.f32.mrf.mxu0  ;;  %v161_v62 = vadd.f32 %v5761_v54, %v54_v60  ;;  %v272_v54 = vadd.f32 %v5758_v52, %v5770_v58 }
  0xe1   :  { %7242 = vst [vmem:[#allocation19_spill] sm:$0xff] %v5833_v45  ;;  %v5838_v3 = vadd.f32 %v200_v30, %v50_v57  ;;  %v313_v51 = vpop.f32.mrf.mxu1 }
  0xe2   :  { %7243 = vst [vmem:[#allocation20_spill] sm:$0xff] %v5836_v47  ;;  %v5841_v1 = vadd.f32 %v313_v51, %v5770_v58  ;;  %v202_v49 = vpop.f32.mrf.mxu0 }
  0xe3   :  { %7244 = vst [vmem:[#allocation21_spill] sm:$0xff] %v5838_v3  ;;  %v5843_v40 = vadd.f32 %v202_v49, %v54_v60  ;;  %v315_v55 = vpop.f32.mrf.mxu1 }
  0xe4   :  { %7245 = vst [vmem:[#allocation22_spill] sm:$0xff] %v5841_v1  ;;  %v5847_v4 = vadd.f32 %v315_v55, %v5778_v63 }
  0xe5   :  { %7246 = vst [vmem:[#allocation23_spill] sm:$0xff] %v5843_v40  ;;  %v583_v48 = vpop.f32.mrf.mxu0 }
  0xe6   :  { %v631_v47 = vadd.f32 %v583_v48, %v159_v53 }
  0xe7   :  { %v624_v45 = vpop.f32.mrf.mxu1  ;;  %v585_v30 = vpop.f32.mrf.mxu0 }
  0xe8   :  { %v4531_v3 = vmul.f32 -1.442695, %v631_v47  ;;  %v632_v20 = vadd.f32 %v585_v30, %v161_v62  ;;  %v633_v48 = vadd.f32 %v624_v45, %v272_v54 }
  0xe9   :  { %v626_v10 = vpop.f32.mrf.mxu1  ;;  %v587_v51 = vpop.f32.mrf.mxu0 }
  0xea   :  { %5108 = vpow2.f32 %v4531_v3  ;;  %v4532_v1 = vmul.f32 -1.442695, %v632_v20  ;;  %v634_v57 = vadd.f32 %v626_v10, %v274_v50  ;;  %v7247_v51 = vmov 0  }
  0xeb   :  { %v588_v49 = vpop.f32.mrf.mxu0  ;;  %v628_v40 = vpop.f32.mrf.mxu1 }
  0xec   :  { %5110 = vpow2.f32 %v4532_v1  ;;  %v4533_v60 = vmul.f32 -1.442695, %v634_v57 }
  0xed   :  { %v629_v59 = vpop.f32.mrf.mxu1 }
  0xee   :  { %5112 = vpow2.f32 %v4533_v60 }
  0xf7   :  { %v5109_v55 = vpop.eup %5108 }
  0xf8   :  { %v638_v47 = vadd.f32 1.0, %v5109_v55 }
  0xf9   :  { %v5111_v53 = vpop.eup %5110 }
  0xfa   :  { %5114 = vrcp.f32 %v638_v47  ;;  %v644_v3 = vadd.f32 1.0, %v5111_v53 }
  0xfb   :  { %5116 = vtanh.f32 %v633_v48  ;;  %v5113_v20 = vpop.eup %5112 }
  0xfc   :  { %5118 = vrcp.f32 %v644_v3  ;;  %v651_v62 = vadd.f32 1.0, %v5113_v20 }
  0xfe   :  { %5120 = vrcp.f32 %v651_v62 }
 0x107   :  { %v5115_v40 = vpop.eup %5114 }
 0x108   :  { %v5117_v59 = vpop.eup %5116 }
 0x109   :  { %v5119_v1 = vpop.eup %5118  ;;  %v655_v63 = vmul.f32 %v5117_v59, %v5115_v40 }
 0x10a   :  { %v654_v56 = vmul.f32 0.0, %v5119_v1 }
 0x10b   :  { %v5121_v45 = vpop.eup %5120 }
 0x10c   :  { %v5854_v10 = vadd.f32 %v655_v63, %v654_v56 }
 0x10e   :  { %5122 = vtanh.f32 %v5854_v10 }
 0x11b   :  { %v5123_v52 = vpop.eup %5122 }
 0x11c   :  { %v5857_v58 = vmul.f32 %v5123_v52, %v5121_v45 }
 0x11e   :  { %v667_v30 = vpack.c.bf16 %v5857_v58, %v5857_v58 }
 0x120   :  { %893 = vmatmul.mubr.bf16.vlgmr.msra.gmra.mxu0 %v667_v30  ;;  %934 = vmatmul.mubr.bf16.vlgmr.msra.gmra.mxu1 %v667_v30 }
 0x121   :  { %1173 = vmatpush1.bf16.msra.mxu0 %v5469_v6  ;;  %1214 = vmatpush1.bf16.msra.mxu1 %v5481_v8 }
 0x122   :  { %1174 = vmatprep.subr.bf16.mxu0 %v5503_v12  ;;  %1215 = vmatprep.subr.bf16.mxu1 %v5516_v14 }
 0x123   :  { %1204 = vmatprep.mubr.bf16.mxu0 %v7247_v51  ;;  %1245 = vmatprep.mubr.bf16.mxu1 %v7247_v51 }
 0x125   :  { %1175 = vmatpush1.bf16.msra.mxu0 %v5498_v11  ;;  %1216 = vmatpush1.bf16.msra.mxu1 %v5511_v13 }
 0x126   :  { %1176 = vmatprep.subr.bf16.mxu0 %v5526_v16  ;;  %1217 = vmatprep.subr.bf16.mxu1 %v5540_v18 }
 0x129   :  { %1177 = vmatpush1.bf16.msra.mxu0 %v5533_v17  ;;  %1218 = vmatpush1.bf16.msra.mxu1 %v5547_v19 }
 0x12a   :  { %1178 = vmatprep.subr.bf16.mxu0 %v5557_v21  ;;  %1219 = vmatprep.subr.bf16.mxu1 %v5569_v23 }
 0x12d   :  { %1179 = vmatpush1.bf16.msra.mxu0 %v5564_v22  ;;  %1220 = vmatpush1.bf16.msra.mxu1 %v5578_v24 }
 0x12e   :  { %1180 = vmatprep.subr.bf16.mxu0 %v5588_v26  ;;  %1221 = vmatprep.subr.bf16.mxu1 %v5600_v28 }
 0x131   :  { %1181 = vmatpush1.bf16.msra.mxu0 %v5595_v27  ;;  %1222 = vmatpush1.bf16.msra.mxu1 %v5609_v29 }
 0x132   :  { %1182 = vmatprep.subr.bf16.mxu0 %v5624_v32  ;;  %1223 = vmatprep.subr.bf16.mxu1 %v5631_v33 }
 0x135   :  { %1183 = vmatpush1.bf16.msra.mxu0 %v5619_v31  ;;  %1224 = vmatpush1.bf16.msra.mxu1 %v5638_v34 }
 0x136   :  { %1184 = vmatprep.subr.bf16.mxu0 %v5655_v37  ;;  %1225 = vmatprep.subr.bf16.mxu1 %v5667_v39 }
 0x139   :  { %1185 = vmatpush1.bf16.msra.mxu0 %v5648_v36  ;;  %1226 = vmatpush1.bf16.msra.mxu1 %v5662_v38 }
 0x13a   :  { %1186 = vmatprep.subr.bf16.mxu0 %v5677_v41  ;;  %1227 = vmatprep.subr.bf16.mxu1 %v5689_v43 }
 0x13d   :  { %1187 = vmatpush1.bf16.msra.mxu0 %v5684_v42  ;;  %1228 = vmatpush1.bf16.msra.mxu1 %v5698_v44 }
 0x13e   :  { %1484 = vmatprep.subr.bf16.mxu0 %v5474_v7  ;;  %1525 = vmatprep.subr.bf16.mxu1 %v5487_v9 }
 0x1e0   :  { %v894_v49 = vpop.f32.mrf.mxu0  ;;  %v935_v50 = vpop.f32.mrf.mxu1 }
 0x1e1   :  { %v942_v57 = vadd.f32 %v894_v49, %v5774_v61  ;;  %v944_v9 = vadd.f32 %v935_v50, %v5781_v0 }
 0x1e2   :  { %v896_v54 = vpop.f32.mrf.mxu0  ;;  %v937_v60 = vpop.f32.mrf.mxu1 }
 0x1e3   :  { %v4566_v55 = vmul.f32 -1.442695, %v942_v57  ;;  %v943_v48 = vadd.f32 %v896_v54, %v5783_v2  ;;  %v945_v7 = vadd.f32 %v937_v60, %v5786_v5 }
 0x1e4   :  { %v898_v47 = vpop.f32.mrf.mxu0  ;;  %v939_v53 = vpop.f32.mrf.mxu1 }
 0x1e5   :  { %5124 = vpow2.f32 %v4566_v55  ;;  %v4567_v3 = vmul.f32 -1.442695, %v943_v48  ;;  %v4568_v59 = vmul.f32 -1.442695, %v945_v7  ;;  %v5980_v55 = vld [vmem:[%s7209_s2 + $0xc4] ss:$16 sps:$4 sm:$0xff]  }
 0x1e6   :  { %v899_v20 = vpop.f32.mrf.mxu0  ;;  %v940_v40 = vpop.f32.mrf.mxu1  ;;  %v5985_v48 = vld [vmem:[%s7209_s2 + $0xcc] ss:$16 sps:$4 sm:$0xff]   ;;  %v5990_v47 = vld [vmem:[%s7209_s2 + $0xc0] ss:$16 sps:$4 sm:$0xff]   ;;  %v5995_v53 = vld [vmem:[%s7209_s2 + $0xc8] ss:$16 sps:$4 sm:$0xff]  }
 0x1e7   :  { %5126 = vpow2.f32 %v4567_v3  ;;  %v6004_v3 = vld [vmem:[%s7209_s2 + $0xa4] ss:$16 sps:$4 sm:$0xff]   ;;  %v6009_v20 = vld [vmem:[%s7209_s2 + $0xac] ss:$16 sps:$4 sm:$0xff]   ;;  %v6014_v40 = vld [vmem:[%s7209_s2 + $0xa0] ss:$16 sps:$4 sm:$0xff]  }
 0x1e8   :  { %5128 = vtanh.f32 %v944_v9  ;;  %v6019_v7 = vld [vmem:[%s7209_s2 + $0xa8] ss:$16 sps:$4 sm:$0xff]   ;;  %v6028_v9 = vld [vmem:[%s7209_s2 + $0x80] ss:$16 sps:$4 sm:$0xff]  }
 0x1e9   :  { %5130 = vpow2.f32 %v4568_v59  ;;  %v6033_v59 = vld [vmem:[%s7209_s2 + $0x84] ss:$16 sps:$4 sm:$0xff]  }
 0x1f2   :  { %v5125_v1 = vpop.eup %5124 }
 0x1f3   :  { %v949_v62 = vadd.f32 1.0, %v5125_v1  ;;  %v6038_v1 = vld [vmem:[%s7209_s2 + $0x88] ss:$16 sps:$4 sm:$0xff]  }
 0x1f4   :  { %v5127_v61 = vpop.eup %5126 }
 0x1f5   :  { %5132 = vrcp.f32 %v949_v62  ;;  %v955_v56 = vadd.f32 1.0, %v5127_v61  ;;  %v5129_v2 = vpop.eup %5128  ;;  %v6043_v62 = vld [vmem:[%s7209_s2 + $0x8c] ss:$16 sps:$4 sm:$0xff]   ;;  %v6048_v61 = vld [vmem:[%s7209_s2 + $0x64] ss:$16 sps:$4 sm:$0xff]  }
 0x1f6   :  { %v5131_v63 = vpop.eup %5130 }
 0x1f7   :  { %5134 = vrcp.f32 %v955_v56  ;;  %v962_v49 = vadd.f32 1.0, %v5131_v63  ;;  %v6054_v56 = vld [vmem:[%s7209_s2 + $0x6c] ss:$16 sps:$4 sm:$0xff]   ;;  %v6067_v63 = vld [vmem:[%s7209_s2 + $0x68] ss:$16 sps:$4 sm:$0xff]  }
 0x1f9   :  { %5136 = vrcp.f32 %v962_v49  ;;  %v6091_v49 = vld [vmem:[%s7209_s2 + $0x48] ss:$16 sps:$4 sm:$0xff]  }
 0x202   :  { %v5133_v45 = vpop.eup %5132 }
 0x203   :  { %v966_v52 = vmul.f32 %v5133_v45, %v5129_v2  ;;  %v6062_v2 = vld [vmem:[%s7209_s2 + $0x60] ss:$16 sps:$4 sm:$0xff]   ;;  %v6074_v45 = vld [vmem:[%s7209_s2 + $0x44] ss:$16 sps:$4 sm:$0xff]  }
 0x204   :  { %v5135_v30 = vpop.eup %5134 }
 0x205   :  { %v965_v57 = vmul.f32 %v5135_v30, %v5854_v10  ;;  %v5971_v10 = vld [vmem:[%s7209_s2 + $0xe8] ss:$16 sps:$4 sm:$0xff]   ;;  %v6086_v30 = vld [vmem:[%s7209_s2 + $0x40] ss:$16 sps:$4 sm:$0xff]  }
 0x206   :  { %v5137_v0 = vpop.eup %5136 }
 0x207   :  { %v5900_v5 = vadd.f32 %v966_v52, %v965_v57  ;;  %v6079_v52 = vld [vmem:[%s7209_s2 + $0x4c] ss:$16 sps:$4 sm:$0xff]   ;;  %v6098_v57 = vld [vmem:[%s7209_s2 + $0x24] ss:$16 sps:$4 sm:$0xff]  }
 0x209   :  { %5138 = vtanh.f32 %v5900_v5 }
 0x216   :  { %v5139_v50 = vpop.eup %5138 }
 0x217   :  { %v5903_v54 = vmul.f32 %v5139_v50, %v5137_v0  ;;  %v6110_v0 = vld [vmem:[%s7209_s2 + $0x20] ss:$16 sps:$4 sm:$0xff]   ;;  %v6115_v50 = vld [vmem:[%s7209_s2 + $0x28] ss:$16 sps:$4 sm:$0xff]  }
 0x219   :  { %v979_v60 = vpack.c.bf16 %v5903_v54, %v5903_v54 }
 0x21b   :  { %1205 = vmatmul.mubr.bf16.vlgmr.msra.gmra.mxu0 %v979_v60  ;;  %1246 = vmatmul.mubr.bf16.vlgmr.msra.gmra.mxu1 %v979_v60  ;;  %v6122_v60 = vld [vmem:[%s7209_s2 + $0x4] ss:$16 sps:$4 sm:$0xff]  }
 0x21c   :  { %1485 = vmatpush1.bf16.msra.mxu0 %v5469_v6  ;;  %1526 = vmatpush1.bf16.msra.mxu1 %v5481_v8 }
 0x21d   :  { %1486 = vmatprep.subr.bf16.mxu0 %v5503_v12  ;;  %1527 = vmatprep.subr.bf16.mxu1 %v5516_v14 }
 0x21e   :  { %1516 = vmatprep.mubr.bf16.mxu0 %v7247_v51  ;;  %1557 = vmatprep.mubr.bf16.mxu1 %v7247_v51 }
 0x220   :  { %1487 = vmatpush1.bf16.msra.mxu0 %v5498_v11  ;;  %1528 = vmatpush1.bf16.msra.mxu1 %v5511_v13 }
 0x221   :  { %1488 = vmatprep.subr.bf16.mxu0 %v5526_v16  ;;  %1529 = vmatprep.subr.bf16.mxu1 %v5540_v18 }
 0x224   :  { %1489 = vmatpush1.bf16.msra.mxu0 %v5533_v17  ;;  %1530 = vmatpush1.bf16.msra.mxu1 %v5547_v19 }
 0x225   :  { %1490 = vmatprep.subr.bf16.mxu0 %v5557_v21  ;;  %1531 = vmatprep.subr.bf16.mxu1 %v5569_v23 }
 0x228   :  { %1491 = vmatpush1.bf16.msra.mxu0 %v5564_v22  ;;  %1532 = vmatpush1.bf16.msra.mxu1 %v5578_v24 }
 0x229   :  { %1492 = vmatprep.subr.bf16.mxu0 %v5588_v26  ;;  %1533 = vmatprep.subr.bf16.mxu1 %v5600_v28 }
 0x22c   :  { %1493 = vmatpush1.bf16.msra.mxu0 %v5595_v27  ;;  %1534 = vmatpush1.bf16.msra.mxu1 %v5609_v29 }
 0x22d   :  { %1494 = vmatprep.subr.bf16.mxu0 %v5624_v32  ;;  %1535 = vmatprep.subr.bf16.mxu1 %v5631_v33 }
 0x230   :  { %1495 = vmatpush1.bf16.msra.mxu0 %v5619_v31  ;;  %1536 = vmatpush1.bf16.msra.mxu1 %v5638_v34 }
 0x231   :  { %1496 = vmatprep.subr.bf16.mxu0 %v5655_v37  ;;  %1537 = vmatprep.subr.bf16.mxu1 %v5667_v39 }
 0x234   :  { %1497 = vmatpush1.bf16.msra.mxu0 %v5648_v36  ;;  %1538 = vmatpush1.bf16.msra.mxu1 %v5662_v38 }
 0x235   :  { %1498 = vmatprep.subr.bf16.mxu0 %v5677_v41  ;;  %1539 = vmatprep.subr.bf16.mxu1 %v5689_v43 }
 0x238   :  { %1499 = vmatpush1.bf16.msra.mxu0 %v5684_v42  ;;  %1540 = vmatpush1.bf16.msra.mxu1 %v5698_v44 }
 0x2db   :  { %v1206_v6 = vpop.f32.mrf.mxu0  ;;  %v1247_v8 = vpop.f32.mrf.mxu1 }
 0x2dc   :  { %v1254_v11 = vadd.f32 %v1206_v6, %v5788_v15  ;;  %v1256_v24 = vadd.f32 %v1247_v8, %v5791_v25  ;;  %v5956_v25 = vld [vmem:[%s7209_s2 + $0xe4] ss:$16 sps:$4 sm:$0xff]   ;;  %v6127_v6 = vld [vmem:[%s7209_s2 + $0xc] ss:$16 sps:$4 sm:$0xff]   ;;  %v6134_v8 = vld [vmem:[%s7209_s2] ss:$16 sps:$4 sm:$0xff]  }
 0x2dd   :  { %v1208_v12 = vpop.f32.mrf.mxu0  ;;  %v1249_v13 = vpop.f32.mrf.mxu1  ;;  %1796 = vmatprep.subr.bf16.mxu0 %v5956_v25 }
 0x2de   :  { %v4601_v14 = vmul.f32 -1.442695, %v1254_v11  ;;  %v1255_v16 = vadd.f32 %v1208_v12, %v5793_v35  ;;  %v1257_v23 = vadd.f32 %v1249_v13, %v5796_v46  ;;  %v5961_v35 = vld [vmem:[%s7209_s2 + $0xec] ss:$16 sps:$4 sm:$0xff]   ;;  %v5966_v46 = vld [vmem:[%s7209_s2 + $0xe0] ss:$16 sps:$4 sm:$0xff]  }
 0x2df   :  { %v1210_v17 = vpop.f32.mrf.mxu0  ;;  %v1251_v18 = vpop.f32.mrf.mxu1  ;;  %1837 = vmatprep.subr.bf16.mxu1 %v5961_v35  ;;  %v6139_v11 = vld [vmem:[%s7209_s2 + $0x8] ss:$16 sps:$4 sm:$0xff]  }
 0x2e0   :  { %5140 = vpow2.f32 %v4601_v14  ;;  %v4602_v19 = vmul.f32 -1.442695, %v1255_v16  ;;  %v4603_v26 = vmul.f32 -1.442695, %v1257_v23  ;;  %v7248_v14 = vld [vmem:[#allocation5_spill] sm:$0xff] }
 0x2e1   :  { %v1211_v21 = vpop.f32.mrf.mxu0  ;;  %v1252_v22 = vpop.f32.mrf.mxu1 }
 0x2e2   :  { %5142 = vpow2.f32 %v4602_v19  ;;  %v7249_v21 = vld [vmem:[#allocation7_spill] sm:$0xff] }
 0x2e3   :  { %5144 = vtanh.f32 %v1256_v24 }
 0x2e4   :  { %5146 = vpow2.f32 %v4603_v26 }
 0x2ed   :  { %v5141_v27 = vpop.eup %5140 }
 0x2ee   :  { %v1261_v28 = vadd.f32 1.0, %v5141_v27 }
 0x2ef   :  { %v5143_v29 = vpop.eup %5142 }
 0x2f0   :  { %5148 = vrcp.f32 %v1261_v28  ;;  %v1267_v31 = vadd.f32 1.0, %v5143_v29  ;;  %v5145_v32 = vpop.eup %5144  ;;  %v7250_v29 = vld [vmem:[#allocation8_spill] sm:$0xff] }
 0x2f1   :  { %v5147_v33 = vpop.eup %5146 }
 0x2f2   :  { %5150 = vrcp.f32 %v1267_v31  ;;  %v1274_v38 = vadd.f32 1.0, %v5147_v33 }
 0x2f4   :  { %5152 = vrcp.f32 %v1274_v38 }
 0x2fd   :  { %v5149_v34 = vpop.eup %5148 }
 0x2fe   :  { %v1278_v36 = vmul.f32 %v5149_v34, %v5145_v32  ;;  %v7251_v32 = vld [vmem:[#allocation6_spill] sm:$0xff] }
 0x2ff   :  { %v5151_v37 = vpop.eup %5150 }
 0x300   :  { %v1277_v39 = vmul.f32 %v5151_v37, %v5900_v5  ;;  %v6103_v5 = vld [vmem:[%s7209_s2 + $0x2c] ss:$16 sps:$4 sm:$0xff]  }
 0x301   :  { %v5153_v42 = vpop.eup %5152 }
 0x302   :  { %v5944_v41 = vadd.f32 %v1278_v36, %v1277_v39 }
 0x304   :  { %5154 = vtanh.f32 %v5944_v41 }
 0x311   :  { %v5155_v43 = vpop.eup %5154 }
 0x312   :  { %v5947_v44 = vmul.f32 %v5155_v43, %v5153_v42 }
 0x314   :  { %v1291_v15 = vpack.c.bf16 %v5947_v44, %v5947_v44 }
 0x316   :  { %1517 = vmatmul.mubr.bf16.vlgmr.msra.gmra.mxu0 %v1291_v15  ;;  %1558 = vmatmul.mubr.bf16.vlgmr.msra.gmra.mxu1 %v1291_v15 }
 0x317   :  { %1828 = vmatprep.mubr.bf16.mxu0 %v7247_v51  ;;  %1869 = vmatprep.mubr.bf16.mxu1 %v7247_v51 }
 0x318   :  { %1797 = vmatpush1.bf16.msra.mxu0 %v5966_v46  ;;  %1838 = vmatpush1.bf16.msra.mxu1 %v5971_v10 }
 0x319   :  { %1798 = vmatprep.subr.bf16.mxu0 %v5980_v55  ;;  %1839 = vmatprep.subr.bf16.mxu1 %v5985_v48 }
 0x31c   :  { %1799 = vmatpush1.bf16.msra.mxu0 %v5990_v47  ;;  %1840 = vmatpush1.bf16.msra.mxu1 %v5995_v53 }
 0x31d   :  { %1800 = vmatprep.subr.bf16.mxu0 %v6004_v3  ;;  %1841 = vmatprep.subr.bf16.mxu1 %v6009_v20 }
 0x320   :  { %1801 = vmatpush1.bf16.msra.mxu0 %v6014_v40  ;;  %1842 = vmatpush1.bf16.msra.mxu1 %v6019_v7 }
 0x321   :  { %1802 = vmatprep.subr.bf16.mxu0 %v6033_v59  ;;  %1843 = vmatprep.subr.bf16.mxu1 %v6043_v62 }
 0x324   :  { %1803 = vmatpush1.bf16.msra.mxu0 %v6028_v9  ;;  %1844 = vmatpush1.bf16.msra.mxu1 %v6038_v1 }
 0x325   :  { %1804 = vmatprep.subr.bf16.mxu0 %v6048_v61  ;;  %1845 = vmatprep.subr.bf16.mxu1 %v6054_v56 }
 0x328   :  { %1805 = vmatpush1.bf16.msra.mxu0 %v6062_v2  ;;  %1846 = vmatpush1.bf16.msra.mxu1 %v6067_v63 }
 0x329   :  { %1806 = vmatprep.subr.bf16.mxu0 %v6074_v45  ;;  %1847 = vmatprep.subr.bf16.mxu1 %v6079_v52 }
 0x32c   :  { %1807 = vmatpush1.bf16.msra.mxu0 %v6086_v30  ;;  %1848 = vmatpush1.bf16.msra.mxu1 %v6091_v49 }
 0x32d   :  { %1808 = vmatprep.subr.bf16.mxu0 %v6098_v57  ;;  %1849 = vmatprep.subr.bf16.mxu1 %v6103_v5 }
 0x330   :  { %1809 = vmatpush1.bf16.msra.mxu0 %v6110_v0  ;;  %1850 = vmatpush1.bf16.msra.mxu1 %v6115_v50 }
 0x331   :  { %1810 = vmatprep.subr.bf16.mxu0 %v6122_v60  ;;  %1851 = vmatprep.subr.bf16.mxu1 %v6127_v6 }
 0x334   :  { %1811 = vmatpush1.bf16.msra.mxu0 %v6134_v8  ;;  %1852 = vmatpush1.bf16.msra.mxu1 %v6139_v11 }
 0x335   :  { %2108 = vmatprep.subr.bf16.mxu0 %v5956_v25  ;;  %2149 = vmatprep.subr.bf16.mxu1 %v5961_v35 }
 0x3d6   :  { %v1518_v12 = vpop.f32.mrf.mxu0  ;;  %v1559_v13 = vpop.f32.mrf.mxu1 }
 0x3d7   :  { %v1566_v16 = vadd.f32 %v1518_v12, %v7248_v14  ;;  %v1568_v33 = vadd.f32 %v1559_v13, %v7251_v32 }
 0x3d8   :  { %v1520_v17 = vpop.f32.mrf.mxu0  ;;  %v1561_v18 = vpop.f32.mrf.mxu1 }
 0x3d9   :  { %v4636_v19 = vmul.f32 -1.442695, %v1566_v16  ;;  %v1567_v22 = vadd.f32 %v1520_v17, %v7249_v21  ;;  %v1569_v31 = vadd.f32 %v1561_v18, %v7250_v29 }
 0x3da   :  { %v1522_v23 = vpop.f32.mrf.mxu0  ;;  %v1563_v24 = vpop.f32.mrf.mxu1 }
 0x3db   :  { %5156 = vpow2.f32 %v4636_v19  ;;  %v4637_v26 = vmul.f32 -1.442695, %v1567_v22  ;;  %v4638_v34 = vmul.f32 -1.442695, %v1569_v31  ;;  %v7252_v24 = vld [vmem:[#allocation9_spill] sm:$0xff]  ;;  %v7253_v31 = vld [vmem:[#allocation11_spill] sm:$0xff] }
 0x3dc   :  { %v1523_v27 = vpop.f32.mrf.mxu0  ;;  %v1564_v28 = vpop.f32.mrf.mxu1 }
 0x3dd   :  { %5158 = vpow2.f32 %v4637_v26 }
 0x3de   :  { %5160 = vtanh.f32 %v1568_v33 }
 0x3df   :  { %5162 = vpow2.f32 %v4638_v34 }
 0x3e8   :  { %v5157_v36 = vpop.eup %5156 }
 0x3e9   :  { %v1573_v37 = vadd.f32 1.0, %v5157_v36 }
 0x3ea   :  { %v5159_v38 = vpop.eup %5158 }
 0x3eb   :  { %5164 = vrcp.f32 %v1573_v37  ;;  %v1579_v39 = vadd.f32 1.0, %v5159_v38  ;;  %v5161_v42 = vpop.eup %5160 }
 0x3ec   :  { %v5163_v43 = vpop.eup %5162 }
 0x3ed   :  { %5166 = vrcp.f32 %v1579_v39  ;;  %v1586_v16 = vadd.f32 1.0, %v5163_v43  ;;  %v7254_v39 = vld [vmem:[#allocation12_spill] sm:$0xff]  ;;  %v7255_v43 = vld [vmem:[#allocation10_spill] sm:$0xff] }
 0x3ef   :  { %5168 = vrcp.f32 %v1586_v16 }
 0x3f8   :  { %v5165_v15 = vpop.eup %5164 }
 0x3f9   :  { %v1590_v12 = vmul.f32 %v5165_v15, %v5161_v42 }
 0x3fa   :  { %v5167_v14 = vpop.eup %5166 }
 0x3fb   :  { %v1589_v17 = vmul.f32 %v5167_v14, %v5944_v41 }
 0x3fc   :  { %v5169_v13 = vpop.eup %5168 }
 0x3fd   :  { %v6152_v18 = vadd.f32 %v1590_v12, %v1589_v17 }
 0x3ff   :  { %5170 = vtanh.f32 %v6152_v18 }
 0x40c   :  { %v5171_v19 = vpop.eup %5170 }
 0x40d   :  { %v6155_v21 = vmul.f32 %v5171_v19, %v5169_v13 }
 0x40f   :  { %v1603_v22 = vpack.c.bf16 %v6155_v21, %v6155_v21 }
 0x411   :  { %1829 = vmatmul.mubr.bf16.vlgmr.msra.gmra.mxu0 %v1603_v22  ;;  %1870 = vmatmul.mubr.bf16.vlgmr.msra.gmra.mxu1 %v1603_v22 }
 0x412   :  { %2109 = vmatpush1.bf16.msra.mxu0 %v5966_v46  ;;  %2150 = vmatpush1.bf16.msra.mxu1 %v5971_v10 }
 0x413   :  { %2110 = vmatprep.subr.bf16.mxu0 %v5980_v55  ;;  %2151 = vmatprep.subr.bf16.mxu1 %v5985_v48 }
 0x414   :  { %2140 = vmatprep.mubr.bf16.mxu0 %v7247_v51  ;;  %2181 = vmatprep.mubr.bf16.mxu1 %v7247_v51 }
 0x416   :  { %2111 = vmatpush1.bf16.msra.mxu0 %v5990_v47  ;;  %2152 = vmatpush1.bf16.msra.mxu1 %v5995_v53 }
 0x417   :  { %2112 = vmatprep.subr.bf16.mxu0 %v6004_v3  ;;  %2153 = vmatprep.subr.bf16.mxu1 %v6009_v20 }
 0x41a   :  { %2113 = vmatpush1.bf16.msra.mxu0 %v6014_v40  ;;  %2154 = vmatpush1.bf16.msra.mxu1 %v6019_v7 }
 0x41b   :  { %2114 = vmatprep.subr.bf16.mxu0 %v6033_v59  ;;  %2155 = vmatprep.subr.bf16.mxu1 %v6043_v62 }
 0x41e   :  { %2115 = vmatpush1.bf16.msra.mxu0 %v6028_v9  ;;  %2156 = vmatpush1.bf16.msra.mxu1 %v6038_v1 }
 0x41f   :  { %2116 = vmatprep.subr.bf16.mxu0 %v6048_v61  ;;  %2157 = vmatprep.subr.bf16.mxu1 %v6054_v56 }
 0x422   :  { %2117 = vmatpush1.bf16.msra.mxu0 %v6062_v2  ;;  %2158 = vmatpush1.bf16.msra.mxu1 %v6067_v63 }
 0x423   :  { %2118 = vmatprep.subr.bf16.mxu0 %v6074_v45  ;;  %2159 = vmatprep.subr.bf16.mxu1 %v6079_v52 }
 0x426   :  { %2119 = vmatpush1.bf16.msra.mxu0 %v6086_v30  ;;  %2160 = vmatpush1.bf16.msra.mxu1 %v6091_v49 }
 0x427   :  { %2120 = vmatprep.subr.bf16.mxu0 %v6098_v57  ;;  %2161 = vmatprep.subr.bf16.mxu1 %v6103_v5 }
 0x42a   :  { %2121 = vmatpush1.bf16.msra.mxu0 %v6110_v0  ;;  %2162 = vmatpush1.bf16.msra.mxu1 %v6115_v50 }
 0x42b   :  { %2122 = vmatprep.subr.bf16.mxu0 %v6122_v60  ;;  %2163 = vmatprep.subr.bf16.mxu1 %v6127_v6 }
 0x42e   :  { %2123 = vmatpush1.bf16.msra.mxu0 %v6134_v8  ;;  %2164 = vmatpush1.bf16.msra.mxu1 %v6139_v11 }
 0x42f   :  { %2420 = vmatprep.subr.bf16.mxu0 %v5956_v25  ;;  %2461 = vmatprep.subr.bf16.mxu1 %v5961_v35 }
 0x4d1   :  { %v1830_v41 = vpop.f32.mrf.mxu0  ;;  %v1871_v23 = vpop.f32.mrf.mxu1 }
 0x4d2   :  { %v1878_v26 = vadd.f32 %v1830_v41, %v7252_v24  ;;  %v1880_v15 = vadd.f32 %v1871_v23, %v7255_v43  ;;  %v7257_v43 = vld [vmem:[#allocation15_spill] sm:$0xff] }
 0x4d3   :  { %v1832_v27 = vpop.f32.mrf.mxu0  ;;  %v1873_v28 = vpop.f32.mrf.mxu1 }
 0x4d4   :  { %v4671_v29 = vmul.f32 -1.442695, %v1878_v26  ;;  %v1879_v32 = vadd.f32 %v1832_v27, %v7253_v31  ;;  %v1881_v42 = vadd.f32 %v1873_v28, %v7254_v39 }
 0x4d5   :  { %v1834_v33 = vpop.f32.mrf.mxu0  ;;  %v1875_v34 = vpop.f32.mrf.mxu1 }
 0x4d6   :  { %5172 = vpow2.f32 %v4671_v29  ;;  %v4672_v36 = vmul.f32 -1.442695, %v1879_v32  ;;  %v4673_v12 = vmul.f32 -1.442695, %v1881_v42 }
 0x4d7   :  { %v1835_v37 = vpop.f32.mrf.mxu0  ;;  %v1876_v38 = vpop.f32.mrf.mxu1 }
 0x4d8   :  { %5174 = vpow2.f32 %v4672_v36  ;;  %v7256_v36 = vld [vmem:[#allocation13_spill] sm:$0xff] }
 0x4d9   :  { %5176 = vtanh.f32 %v1880_v15 }
 0x4da   :  { %5178 = vpow2.f32 %v4673_v12 }
 0x4e3   :  { %v5173_v14 = vpop.eup %5172 }
 0x4e4   :  { %v1885_v16 = vadd.f32 1.0, %v5173_v14 }
 0x4e5   :  { %v5175_v17 = vpop.eup %5174 }
 0x4e6   :  { %5180 = vrcp.f32 %v1885_v16  ;;  %v1891_v13 = vadd.f32 1.0, %v5175_v17  ;;  %v5177_v19 = vpop.eup %5176 }
 0x4e7   :  { %v5179_v22 = vpop.eup %5178 }
 0x4e8   :  { %5182 = vrcp.f32 %v1891_v13  ;;  %v1898_v27 = vadd.f32 1.0, %v5179_v22  ;;  %v7259_v22 = vld [vmem:[#allocation14_spill] sm:$0xff] }
 0x4ea   :  { %5184 = vrcp.f32 %v1898_v27 }
 0x4f3   :  { %v5181_v41 = vpop.eup %5180 }
 0x4f4   :  { %v1902_v24 = vmul.f32 %v5181_v41, %v5177_v19  ;;  %v7258_v19 = vld [vmem:[#allocation16_spill] sm:$0xff] }
 0x4f5   :  { %v5183_v26 = vpop.eup %5182 }
 0x4f6   :  { %v1901_v29 = vmul.f32 %v5183_v26, %v6152_v18 }
 0x4f7   :  { %v5185_v23 = vpop.eup %5184 }
 0x4f8   :  { %v6198_v28 = vadd.f32 %v1902_v24, %v1901_v29 }
 0x4fa   :  { %5186 = vtanh.f32 %v6198_v28 }
 0x507   :  { %v5187_v31 = vpop.eup %5186 }
 0x508   :  { %v6201_v32 = vmul.f32 %v5187_v31, %v5185_v23 }
 0x50a   :  { %v1915_v33 = vpack.c.bf16 %v6201_v32, %v6201_v32 }
 0x50c   :  { %2141 = vmatmul.mubr.bf16.vlgmr.msra.gmra.mxu0 %v1915_v33  ;;  %2182 = vmatmul.mubr.bf16.vlgmr.msra.gmra.mxu1 %v1915_v33 }
 0x50d   :  { %2421 = vmatpush1.bf16.msra.mxu0 %v5966_v46  ;;  %2462 = vmatpush1.bf16.msra.mxu1 %v5971_v10 }
 0x50e   :  { %2422 = vmatprep.subr.bf16.mxu0 %v5980_v55  ;;  %2463 = vmatprep.subr.bf16.mxu1 %v5985_v48 }
 0x50f   :  { %2452 = vmatprep.mubr.bf16.mxu0 %v7247_v51  ;;  %2493 = vmatprep.mubr.bf16.mxu1 %v7247_v51 }
 0x511   :  { %2423 = vmatpush1.bf16.msra.mxu0 %v5990_v47  ;;  %2464 = vmatpush1.bf16.msra.mxu1 %v5995_v53 }
 0x512   :  { %2424 = vmatprep.subr.bf16.mxu0 %v6004_v3  ;;  %2465 = vmatprep.subr.bf16.mxu1 %v6009_v20 }
 0x515   :  { %2425 = vmatpush1.bf16.msra.mxu0 %v6014_v40  ;;  %2466 = vmatpush1.bf16.msra.mxu1 %v6019_v7 }
 0x516   :  { %2426 = vmatprep.subr.bf16.mxu0 %v6033_v59  ;;  %2467 = vmatprep.subr.bf16.mxu1 %v6043_v62 }
 0x519   :  { %2427 = vmatpush1.bf16.msra.mxu0 %v6028_v9  ;;  %2468 = vmatpush1.bf16.msra.mxu1 %v6038_v1 }
 0x51a   :  { %2428 = vmatprep.subr.bf16.mxu0 %v6048_v61  ;;  %2469 = vmatprep.subr.bf16.mxu1 %v6054_v56 }
 0x51d   :  { %2429 = vmatpush1.bf16.msra.mxu0 %v6062_v2  ;;  %2470 = vmatpush1.bf16.msra.mxu1 %v6067_v63 }
 0x51e   :  { %2430 = vmatprep.subr.bf16.mxu0 %v6074_v45  ;;  %2471 = vmatprep.subr.bf16.mxu1 %v6079_v52 }
 0x521   :  { %2431 = vmatpush1.bf16.msra.mxu0 %v6086_v30  ;;  %2472 = vmatpush1.bf16.msra.mxu1 %v6091_v49 }
 0x522   :  { %2432 = vmatprep.subr.bf16.mxu0 %v6098_v57  ;;  %2473 = vmatprep.subr.bf16.mxu1 %v6103_v5 }
 0x525   :  { %2433 = vmatpush1.bf16.msra.mxu0 %v6110_v0  ;;  %2474 = vmatpush1.bf16.msra.mxu1 %v6115_v50 }
 0x526   :  { %2434 = vmatprep.subr.bf16.mxu0 %v6122_v60  ;;  %2475 = vmatprep.subr.bf16.mxu1 %v6127_v6 }
 0x529   :  { %2435 = vmatpush1.bf16.msra.mxu0 %v6134_v8  ;;  %2476 = vmatpush1.bf16.msra.mxu1 %v6139_v11 }
 0x52a   :  { %2732 = vmatprep.subr.bf16.mxu0 %v5956_v25  ;;  %2773 = vmatprep.subr.bf16.mxu1 %v5961_v35 }
 0x5cc   :  { %v2142_v18 = vpop.f32.mrf.mxu0  ;;  %v2183_v34 = vpop.f32.mrf.mxu1 }
 0x5cd   :  { %v2190_v37 = vadd.f32 %v2142_v18, %v7256_v36  ;;  %v2192_v35 = vadd.f32 %v2183_v34, %v7259_v22 }
 0x5ce   :  { %v2144_v38 = vpop.f32.mrf.mxu0  ;;  %v2185_v39 = vpop.f32.mrf.mxu1 }
 0x5cf   :  { %v4706_v42 = vmul.f32 -1.442695, %v2190_v37  ;;  %v2191_v15 = vadd.f32 %v2144_v38, %v7257_v43  ;;  %v2193_v25 = vadd.f32 %v2185_v39, %v7258_v19  ;;  %v5004_v19 = vld [vmem:[%s7211_s4 + $0xe0] ss:$16 sps:$4 sm:$0xff]  }
 0x5d0   :  { %v2146_v12 = vpop.f32.mrf.mxu0  ;;  %v2187_v14 = vpop.f32.mrf.mxu1 }
 0x5d1   :  { %5188 = vpow2.f32 %v4706_v42  ;;  %v4707_v16 = vmul.f32 -1.442695, %v2191_v15  ;;  %v4708_v41 = vmul.f32 -1.442695, %v2193_v25  ;;  %v5007_v25 = vld [vmem:[%s7211_s4 + $0xe8] ss:$16 sps:$4 sm:$0xff]  }
 0x5d2   :  { %v2147_v17 = vpop.f32.mrf.mxu0  ;;  %v2188_v13 = vpop.f32.mrf.mxu1 }
 0x5d3   :  { %5190 = vpow2.f32 %v4707_v16 }
 0x5d4   :  { %5192 = vtanh.f32 %v2192_v35  ;;  %v5012_v35 = vld [vmem:[%s7211_s4 + $0xc4] ss:$16 sps:$4 sm:$0xff]  }
 0x5d5   :  { %5194 = vpow2.f32 %v4708_v41  ;;  %v5015_v41 = vld [vmem:[%s7211_s4 + $0xcc] ss:$16 sps:$4 sm:$0xff]  }
 0x5de   :  { %v5189_v24 = vpop.eup %5188 }
 0x5df   :  { %v2197_v26 = vadd.f32 1.0, %v5189_v24  ;;  %v5010_v24 = vld [vmem:[%s7211_s4 + $0xc0] ss:$16 sps:$4 sm:$0xff]  }
 0x5e0   :  { %v5191_v27 = vpop.eup %5190 }
 0x5e1   :  { %5196 = vrcp.f32 %v2197_v26  ;;  %v2203_v29 = vadd.f32 1.0, %v5191_v27  ;;  %v5193_v23 = vpop.eup %5192  ;;  %v5013_v26 = vld [vmem:[%s7211_s4 + $0xc8] ss:$16 sps:$4 sm:$0xff]   ;;  %v5018_v27 = vld [vmem:[%s7211_s4 + $0xa4] ss:$16 sps:$4 sm:$0xff]  }
 0x5e2   :  { %v5195_v31 = vpop.eup %5194 }
 0x5e3   :  { %5198 = vrcp.f32 %v2203_v29  ;;  %v2210_v37 = vadd.f32 1.0, %v5195_v31  ;;  %v5021_v29 = vld [vmem:[%s7211_s4 + $0xac] ss:$16 sps:$4 sm:$0xff]   ;;  %v5019_v31 = vld [vmem:[%s7211_s4 + $0xa8] ss:$16 sps:$4 sm:$0xff]  }
 0x5e5   :  { %5200 = vrcp.f32 %v2210_v37  ;;  %v5025_v37 = vld [vmem:[%s7211_s4 + $0x88] ss:$16 sps:$4 sm:$0xff]  }
 0x5ee   :  { %v5197_v33 = vpop.eup %5196 }
 0x5ef   :  { %v2214_v18 = vmul.f32 %v5197_v33, %v5193_v23  ;;  %v5016_v23 = vld [vmem:[%s7211_s4 + $0xa0] ss:$16 sps:$4 sm:$0xff]   ;;  %v5024_v33 = vld [vmem:[%s7211_s4 + $0x84] ss:$16 sps:$4 sm:$0xff]  }
 0x5f0   :  { %v5199_v36 = vpop.eup %5198 }
 0x5f1   :  { %v2213_v38 = vmul.f32 %v5199_v36, %v6198_v28  ;;  %v5022_v36 = vld [vmem:[%s7211_s4 + $0x80] ss:$16 sps:$4 sm:$0xff]  }
 0x5f2   :  { %v5201_v34 = vpop.eup %5200 }
 0x5f3   :  { %v6244_v39 = vadd.f32 %v2214_v18, %v2213_v38  ;;  %v5027_v18 = vld [vmem:[%s7211_s4 + $0x8c] ss:$16 sps:$4 sm:$0xff]   ;;  %v5030_v38 = vld [vmem:[%s7211_s4 + $0x64] ss:$16 sps:$4 sm:$0xff]  }
 0x5f5   :  { %5202 = vtanh.f32 %v6244_v39 }
 0x602   :  { %v5203_v42 = vpop.eup %5202 }
 0x603   :  { %v6247_v43 = vmul.f32 %v5203_v42, %v5201_v34  ;;  %v5028_v34 = vld [vmem:[%s7211_s4 + $0x60] ss:$16 sps:$4 sm:$0xff]   ;;  %v5031_v42 = vld [vmem:[%s7211_s4 + $0x68] ss:$16 sps:$4 sm:$0xff]  }
 0x605   :  { %v2227_v15 = vpack.c.bf16 %v6247_v43, %v6247_v43 }
 0x607   :  { %2453 = vmatmul.mubr.bf16.vlgmr.msra.gmra.mxu0 %v2227_v15  ;;  %2494 = vmatmul.mubr.bf16.vlgmr.msra.gmra.mxu1 %v2227_v15  ;;  %v5036_v15 = vld [vmem:[%s7211_s4 + $0x44] ss:$16 sps:$4 sm:$0xff]  }
 0x608   :  { %2733 = vmatpush1.bf16.msra.mxu0 %v5966_v46  ;;  %2774 = vmatpush1.bf16.msra.mxu1 %v5971_v10  ;;  %v5006_v46 = vld [vmem:[%s7211_s4 + $0xe4] ss:$16 sps:$4 sm:$0xff]   ;;  %v5009_v10 = vld [vmem:[%s7211_s4 + $0xec] ss:$16 sps:$4 sm:$0xff]  }
 0x609   :  { %2734 = vmatprep.subr.bf16.mxu0 %v5980_v55  ;;  %2775 = vmatprep.subr.bf16.mxu1 %v5985_v48 }
 0x60a   :  { %2764 = vmatprep.mubr.bf16.mxu0 %v7247_v51  ;;  %2805 = vmatprep.mubr.bf16.mxu1 %v7247_v51 }
 0x60c   :  { %2735 = vmatpush1.bf16.msra.mxu0 %v5990_v47  ;;  %2776 = vmatpush1.bf16.msra.mxu1 %v5995_v53  ;;  %v7260_v47 = vld [vmem:[#allocation17_spill] sm:$0xff] }
 0x60d   :  { %2736 = vmatprep.subr.bf16.mxu0 %v6004_v3  ;;  %2777 = vmatprep.subr.bf16.mxu1 %v6009_v20 }
 0x610   :  { %2737 = vmatpush1.bf16.msra.mxu0 %v6014_v40  ;;  %2778 = vmatpush1.bf16.msra.mxu1 %v6019_v7  ;;  %v7261_v7 = vld [vmem:[#allocation19_spill] sm:$0xff] }
 0x611   :  { %2738 = vmatprep.subr.bf16.mxu0 %v6033_v59  ;;  %2779 = vmatprep.subr.bf16.mxu1 %v6043_v62 }
 0x614   :  { %2739 = vmatpush1.bf16.msra.mxu0 %v6028_v9  ;;  %2780 = vmatpush1.bf16.msra.mxu1 %v6038_v1 }
 0x615   :  { %2740 = vmatprep.subr.bf16.mxu0 %v6048_v61  ;;  %2781 = vmatprep.subr.bf16.mxu1 %v6054_v56 }
 0x618   :  { %2741 = vmatpush1.bf16.msra.mxu0 %v6062_v2  ;;  %2782 = vmatpush1.bf16.msra.mxu1 %v6067_v63  ;;  %v7262_v2 = vld [vmem:[#allocation20_spill] sm:$0xff] }
 0x619   :  { %2742 = vmatprep.subr.bf16.mxu0 %v6074_v45  ;;  %2783 = vmatprep.subr.bf16.mxu1 %v6079_v52  ;;  %v7263_v45 = vld [vmem:[#allocation18_spill] sm:$0xff] }
 0x61c   :  { %2743 = vmatpush1.bf16.msra.mxu0 %v6086_v30  ;;  %2784 = vmatpush1.bf16.msra.mxu1 %v6091_v49 }
 0x61d   :  { %2744 = vmatprep.subr.bf16.mxu0 %v6098_v57  ;;  %2785 = vmatprep.subr.bf16.mxu1 %v6103_v5 }
 0x620   :  { %2745 = vmatpush1.bf16.msra.mxu0 %v6110_v0  ;;  %2786 = vmatpush1.bf16.msra.mxu1 %v6115_v50 }
 0x621   :  { %2746 = vmatprep.subr.bf16.mxu0 %v6122_v60  ;;  %2787 = vmatprep.subr.bf16.mxu1 %v6127_v6 }
 0x624   :  { %2747 = vmatpush1.bf16.msra.mxu0 %v6134_v8  ;;  %2788 = vmatpush1.bf16.msra.mxu1 %v6139_v11 }
 0x625   :  { %3070 = vmatprep.subr.bf16.mxu0 %v5006_v46  ;;  %3143 = vmatprep.subr.bf16.mxu1 %v5009_v10  ;;  %v5039_v46 = vld [vmem:[%s7211_s4 + $0x4c] ss:$16 sps:$4 sm:$0xff]   ;;  %v5034_v10 = vld [vmem:[%s7211_s4 + $0x40] ss:$16 sps:$4 sm:$0xff]  }
 0x6c7   :  { %v2454_v55 = vpop.f32.mrf.mxu0  ;;  %v2495_v48 = vpop.f32.mrf.mxu1 }
 0x6c8   :  { %v2502_v53 = vadd.f32 %v2454_v55, %v7260_v47  ;;  %v2504_v52 = vadd.f32 %v2495_v48, %v7263_v45  ;;  %v5037_v55 = vld [vmem:[%s7211_s4 + $0x48] ss:$16 sps:$4 sm:$0xff]   ;;  %v5042_v48 = vld [vmem:[%s7211_s4 + $0x24] ss:$16 sps:$4 sm:$0xff]   ;;  %v5045_v47 = vld [vmem:[%s7211_s4 + $0x2c] ss:$16 sps:$4 sm:$0xff]  }
 0x6c9   :  { %v2456_v3 = vpop.f32.mrf.mxu0  ;;  %v2497_v20 = vpop.f32.mrf.mxu1  ;;  %v6466_v45 = vld [vmem:[%s7212_s5 + $0xa0] ss:$16 sps:$4 sm:$0xff]  }
 0x6ca   :  { %v4741_v40 = vmul.f32 -1.442695, %v2502_v53  ;;  %v2503_v9 = vadd.f32 %v2456_v3, %v7261_v7  ;;  %v2505_v63 = vadd.f32 %v2497_v20, %v7262_v2  ;;  %v5040_v53 = vld [vmem:[%s7211_s4 + $0x20] ss:$16 sps:$4 sm:$0xff]   ;;  %v5043_v3 = vld [vmem:[%s7211_s4 + $0x28] ss:$16 sps:$4 sm:$0xff]  }
 0x6cb   :  { %v2458_v59 = vpop.f32.mrf.mxu0  ;;  %v2499_v1 = vpop.f32.mrf.mxu1  ;;  %v5048_v20 = vld [vmem:[%s7211_s4 + $0x4] ss:$16 sps:$4 sm:$0xff]   ;;  %v5046_v7 = vld [vmem:[%s7211_s4] ss:$16 sps:$4 sm:$0xff]  }
 0x6cc   :  { %5204 = vpow2.f32 %v4741_v40  ;;  %v4742_v62 = vmul.f32 -1.442695, %v2503_v9  ;;  %v4743_v30 = vmul.f32 -1.442695, %v2505_v63  ;;  %v5051_v40 = vld [vmem:[%s7211_s4 + $0xc] ss:$16 sps:$4 sm:$0xff]   ;;  %v2852_v59 = vpack.c.bf16 %v5903_v54, %v5857_v58 }
 0x6cd   :  { %v2459_v61 = vpop.f32.mrf.mxu0  ;;  %v2500_v56 = vpop.f32.mrf.mxu1  ;;  %v5049_v9 = vld [vmem:[%s7211_s4 + $0x8] ss:$16 sps:$4 sm:$0xff]   ;;  %v2853_v1 = vpack.c.bf16 %v6155_v21, %v5947_v44  ;;  %v6408_v58 = vld [vmem:[%s7212_s5 + $0xe4] ss:$16 sps:$4 sm:$0xff]   ;;  %v6413_v54 = vld [vmem:[%s7212_s5 + $0xec] ss:$16 sps:$4 sm:$0xff]  }
 0x6ce   :  { %5206 = vpow2.f32 %v4742_v62  ;;  %v2854_v62 = vpack.c.bf16 %v6247_v43, %v6201_v32  ;;  %v6419_v44 = vld [vmem:[%s7212_s5 + $0xe0] ss:$16 sps:$4 sm:$0xff]   ;;  %v6424_v21 = vld [vmem:[%s7212_s5 + $0xe8] ss:$16 sps:$4 sm:$0xff]   ;;  %v6432_v32 = vld [vmem:[%s7212_s5 + $0xc4] ss:$16 sps:$4 sm:$0xff]  }
 0x6cf   :  { %5208 = vtanh.f32 %v2504_v52  ;;  %v6437_v43 = vld [vmem:[%s7212_s5 + $0xcc] ss:$16 sps:$4 sm:$0xff]   ;;  %v6442_v61 = vld [vmem:[%s7212_s5 + $0xc0] ss:$16 sps:$4 sm:$0xff]   ;;  %v6447_v56 = vld [vmem:[%s7212_s5 + $0xc8] ss:$16 sps:$4 sm:$0xff]  }
 0x6d0   :  { %5210 = vpow2.f32 %v4743_v30  ;;  %v6456_v2 = vld [vmem:[%s7212_s5 + $0xa4] ss:$16 sps:$4 sm:$0xff]   ;;  %v6461_v63 = vld [vmem:[%s7212_s5 + $0xac] ss:$16 sps:$4 sm:$0xff]   ;;  %v6471_v52 = vld [vmem:[%s7212_s5 + $0xa8] ss:$16 sps:$4 sm:$0xff]  }
 0x6d1   :  { %v6480_v30 = vld [vmem:[%s7212_s5 + $0x84] ss:$16 sps:$4 sm:$0xff]  }
 0x6d9   :  { %v5205_v49 = vpop.eup %5204 }
 0x6da   :  { %v2509_v57 = vadd.f32 1.0, %v5205_v49  ;;  %v6485_v49 = vld [vmem:[%s7212_s5 + $0x8c] ss:$16 sps:$4 sm:$0xff]  }
 0x6db   :  { %v5207_v5 = vpop.eup %5206 }
 0x6dc   :  { %5212 = vrcp.f32 %v2509_v57  ;;  %v2515_v0 = vadd.f32 1.0, %v5207_v5  ;;  %v5209_v50 = vpop.eup %5208  ;;  %v6490_v57 = vld [vmem:[%s7212_s5 + $0x80] ss:$16 sps:$4 sm:$0xff]   ;;  %v6495_v5 = vld [vmem:[%s7212_s5 + $0x88] ss:$16 sps:$4 sm:$0xff]  }
 0x6dd   :  { %v5211_v60 = vpop.eup %5210 }
 0x6de   :  { %5214 = vrcp.f32 %v2515_v0  ;;  %v2522_v28 = vadd.f32 1.0, %v5211_v60  ;;  %v6504_v0 = vld [vmem:[%s7212_s5 + $0x64] ss:$16 sps:$4 sm:$0xff]   ;;  %v6514_v60 = vld [vmem:[%s7212_s5 + $0x60] ss:$16 sps:$4 sm:$0xff]  }
 0x6e0   :  { %5216 = vrcp.f32 %v2522_v28  ;;  %v6538_v28 = vld [vmem:[%s7212_s5 + $0x40] ss:$16 sps:$4 sm:$0xff]  }
 0x6e9   :  { %v5213_v6 = vpop.eup %5212 }
 0x6ea   :  { %v2526_v8 = vmul.f32 %v5213_v6, %v5209_v50  ;;  %v6509_v50 = vld [vmem:[%s7212_s5 + $0x6c] ss:$16 sps:$4 sm:$0xff]   ;;  %v6519_v6 = vld [vmem:[%s7212_s5 + $0x68] ss:$16 sps:$4 sm:$0xff]  }
 0x6eb   :  { %v5215_v11 = vpop.eup %5214 }
 0x6ec   :  { %v2525_v12 = vmul.f32 %v5215_v11, %v6244_v39  ;;  %v5033_v39 = vld [vmem:[%s7211_s4 + $0x6c] ss:$16 sps:$4 sm:$0xff]  }
 0x6ed   :  { %v5217_v16 = vpop.eup %5216  ;;  %v6531_v11 = vld [vmem:[%s7212_s5 + $0x4c] ss:$16 sps:$4 sm:$0xff]  }
 0x6ee   :  { %v6294_v14 = vadd.f32 %v2526_v8, %v2525_v12  ;;  %v6526_v8 = vld [vmem:[%s7212_s5 + $0x44] ss:$16 sps:$4 sm:$0xff]   ;;  %v6543_v12 = vld [vmem:[%s7212_s5 + $0x48] ss:$16 sps:$4 sm:$0xff]  }
 0x6f0   :  { %5218 = vtanh.f32 %v6294_v14 }
 0x6fd   :  { %v5219_v17 = vpop.eup %5218 }
 0x6fe   :  { %v6297_v13 = vmul.f32 %v5219_v17, %v5217_v16  ;;  %v6550_v16 = vld [vmem:[%s7212_s5 + $0x24] ss:$16 sps:$4 sm:$0xff]   ;;  %v6555_v17 = vld [vmem:[%s7212_s5 + $0x2c] ss:$16 sps:$4 sm:$0xff]  }
 0x700   :  { %v2539_v22 = vpack.c.bf16 %v6297_v13, %v6297_v13 }
 0x702   :  { %2765 = vmatmul.mubr.bf16.vlgmr.msra.gmra.mxu0 %v2539_v22  ;;  %2806 = vmatmul.mubr.bf16.vlgmr.msra.gmra.mxu1 %v2539_v22  ;;  %v6574_v22 = vld [vmem:[%s7212_s5 + $0x4] ss:$16 sps:$4 sm:$0xff]  }
 0x703   :  { %3071 = vmatpush1.bf16.msra.mxu0 %v5004_v19  ;;  %3144 = vmatpush1.bf16.msra.mxu1 %v5007_v25  ;;  %v6562_v19 = vld [vmem:[%s7212_s5 + $0x20] ss:$16 sps:$4 sm:$0xff]   ;;  %v6567_v25 = vld [vmem:[%s7212_s5 + $0x28] ss:$16 sps:$4 sm:$0xff]  }
 0x704   :  { %3072 = vmatprep.subr.bf16.mxu0 %v5012_v35  ;;  %3145 = vmatprep.subr.bf16.mxu1 %v5015_v41  ;;  %v6579_v35 = vld [vmem:[%s7212_s5 + $0xc] ss:$16 sps:$4 sm:$0xff]   ;;  %v6586_v41 = vld [vmem:[%s7212_s5] ss:$16 sps:$4 sm:$0xff]  }
 0x705   :  { %3102 = vmatprep.mubr.bf16.mxu0 %v7247_v51  ;;  %3175 = vmatprep.mubr.bf16.mxu1 %v7247_v51 }
 0x707   :  { %3073 = vmatpush1.bf16.msra.mxu0 %v5010_v24  ;;  %3146 = vmatpush1.bf16.msra.mxu1 %v5013_v26  ;;  %v6591_v24 = vld [vmem:[%s7212_s5 + $0x8] ss:$16 sps:$4 sm:$0xff]  }
 0x708   :  { %3074 = vmatprep.subr.bf16.mxu0 %v5018_v27  ;;  %3147 = vmatprep.subr.bf16.mxu1 %v5021_v29  ;;  %v7264_v29 = vld [vmem:[#allocation21_spill] sm:$0xff] }
 0x70b   :  { %3075 = vmatpush1.bf16.msra.mxu0 %v5016_v23  ;;  %3148 = vmatpush1.bf16.msra.mxu1 %v5019_v31 }
 0x70c   :  { %3076 = vmatprep.subr.bf16.mxu0 %v5024_v33  ;;  %3149 = vmatprep.subr.bf16.mxu1 %v5027_v18 }
 0x70f   :  { %3077 = vmatpush1.bf16.msra.mxu0 %v5022_v36  ;;  %3150 = vmatpush1.bf16.msra.mxu1 %v5025_v37  ;;  %v7265_v36 = vld [vmem:[#allocation23_spill] sm:$0xff] }
 0x710   :  { %3078 = vmatprep.subr.bf16.mxu0 %v5030_v38  ;;  %3151 = vmatprep.subr.bf16.mxu1 %v5033_v39 }
 0x713   :  { %3079 = vmatpush1.bf16.msra.mxu0 %v5028_v34  ;;  %3152 = vmatpush1.bf16.msra.mxu1 %v5031_v42 }
 0x714   :  { %3080 = vmatprep.subr.bf16.mxu0 %v5036_v15  ;;  %3153 = vmatprep.subr.bf16.mxu1 %v5039_v46 }
 0x717   :  { %3081 = vmatpush1.bf16.msra.mxu0 %v5034_v10  ;;  %3154 = vmatpush1.bf16.msra.mxu1 %v5037_v55  ;;  %v7266_v10 = vld [vmem:[#allocation22_spill] sm:$0xff] }
 0x718   :  { %3082 = vmatprep.subr.bf16.mxu0 %v5042_v48  ;;  %3155 = vmatprep.subr.bf16.mxu1 %v5045_v47 }
 0x71b   :  { %3083 = vmatpush1.bf16.msra.mxu0 %v5040_v53  ;;  %3156 = vmatpush1.bf16.msra.mxu1 %v5043_v3 }
 0x71c   :  { %3084 = vmatprep.subr.bf16.mxu0 %v5048_v20  ;;  %3157 = vmatprep.subr.bf16.mxu1 %v5051_v40 }
 0x71f   :  { %3085 = vmatpush1.bf16.msra.mxu0 %v5046_v7  ;;  %3158 = vmatpush1.bf16.msra.mxu1 %v5049_v9 }
 0x720   :  { %3444 = vmatprep.subr.bf16.mxu0 %v6408_v58  ;;  %3485 = vmatprep.subr.bf16.mxu1 %v6413_v54 }
 0x722   :  { %3103 = vmatmul.mubr.bf16.vlgmr.msra.gmra.mxu0 %v2852_v59  ;;  %3176 = vmatmul.mubr.bf16.vlgmr.msra.gmra.mxu1 %v2852_v59 }
 0x723   :  { %3112 = vmatprep.mubr.bf16.mxu0 %v7247_v51  ;;  %3185 = vmatprep.mubr.bf16.mxu1 %v7247_v51 }
 0x724   :  { %3445 = vmatpush1.bf16.msra.mxu0 %v6419_v44  ;;  %3486 = vmatpush1.bf16.msra.mxu1 %v6424_v21 }
 0x725   :  { %3446 = vmatprep.subr.bf16.mxu0 %v6432_v32  ;;  %3487 = vmatprep.subr.bf16.mxu1 %v6437_v43 }
 0x728   :  { %3447 = vmatpush1.bf16.msra.mxu0 %v6442_v61  ;;  %3488 = vmatpush1.bf16.msra.mxu1 %v6447_v56 }
 0x729   :  { %3448 = vmatprep.subr.bf16.mxu0 %v6456_v2  ;;  %3489 = vmatprep.subr.bf16.mxu1 %v6461_v63 }
 0x72a   :  { %3113 = vmatmul.mubr.bf16.gmra.mxu0 %v2853_v1  ;;  %3186 = vmatmul.mubr.bf16.gmra.mxu1 %v2853_v1 }
 0x72b   :  { %3122 = vmatprep.mubr.bf16.mxu0 %v7247_v51  ;;  %3195 = vmatprep.mubr.bf16.mxu1 %v7247_v51 }
 0x72c   :  { %3449 = vmatpush1.bf16.msra.mxu0 %v6466_v45  ;;  %3490 = vmatpush1.bf16.msra.mxu1 %v6471_v52 }
 0x72d   :  { %3450 = vmatprep.subr.bf16.mxu0 %v6480_v30  ;;  %3491 = vmatprep.subr.bf16.mxu1 %v6485_v49 }
 0x730   :  { %3451 = vmatpush1.bf16.msra.mxu0 %v6490_v57  ;;  %3492 = vmatpush1.bf16.msra.mxu1 %v6495_v5 }
 0x731   :  { %3452 = vmatprep.subr.bf16.mxu0 %v6504_v0  ;;  %3493 = vmatprep.subr.bf16.mxu1 %v6509_v50 }
 0x732   :  { %3123 = vmatmul.mubr.bf16.gmra.mxu0 %v2854_v62  ;;  %3196 = vmatmul.mubr.bf16.gmra.mxu1 %v2854_v62 }
 0x733   :  { %3132 = vmatprep.mubr.bf16.mxu0 %v7247_v51  ;;  %3205 = vmatprep.mubr.bf16.mxu1 %v7247_v51 }
 0x734   :  { %3453 = vmatpush1.bf16.msra.mxu0 %v6514_v60  ;;  %3494 = vmatpush1.bf16.msra.mxu1 %v6519_v6 }
 0x735   :  { %3454 = vmatprep.subr.bf16.mxu0 %v6526_v8  ;;  %3495 = vmatprep.subr.bf16.mxu1 %v6531_v11 }
 0x738   :  { %3455 = vmatpush1.bf16.msra.mxu0 %v6538_v28  ;;  %3496 = vmatpush1.bf16.msra.mxu1 %v6543_v12 }
 0x739   :  { %3456 = vmatprep.subr.bf16.mxu0 %v6550_v16  ;;  %3497 = vmatprep.subr.bf16.mxu1 %v6555_v17 }
 0x73c   :  { %3457 = vmatpush1.bf16.msra.mxu0 %v6562_v19  ;;  %3498 = vmatpush1.bf16.msra.mxu1 %v6567_v25 }
 0x73d   :  { %3458 = vmatprep.subr.bf16.mxu0 %v6574_v22  ;;  %3499 = vmatprep.subr.bf16.mxu1 %v6579_v35 }
 0x740   :  { %3459 = vmatpush1.bf16.msra.mxu0 %v6586_v41  ;;  %3500 = vmatpush1.bf16.msra.mxu1 %v6591_v24 }
 0x741   :  { %3559 = vmatprep.subr.bf16.mxu0 %v6408_v58  ;;  %3600 = vmatprep.subr.bf16.mxu1 %v6413_v54 }
 0x7c2   :  { %v2766_v26 = vpop.f32.mrf.mxu0  ;;  %v2807_v27 = vpop.f32.mrf.mxu1 }
 0x7c3   :  { %v2814_v23 = vadd.f32 %v2766_v26, %v7264_v29  ;;  %v2816_v55 = vadd.f32 %v2807_v27, %v7266_v10 }
 0x7c4   :  { %v2768_v31 = vpop.f32.mrf.mxu0  ;;  %v2809_v33 = vpop.f32.mrf.mxu1 }
 0x7c5   :  { %v4776_v18 = vmul.f32 -1.442695, %v2814_v23  ;;  %v2815_v37 = vadd.f32 %v2768_v31, %v7265_v36  ;;  %v2817_v46 = vadd.f32 %v2809_v33, %v5847_v4 }
 0x7c6   :  { %v2770_v38 = vpop.f32.mrf.mxu0  ;;  %v2811_v39 = vpop.f32.mrf.mxu1 }
 0x7c7   :  { %5220 = vpow2.f32 %v4776_v18  ;;  %v4777_v34 = vmul.f32 -1.442695, %v2815_v37  ;;  %v4778_v48 = vmul.f32 -1.442695, %v2817_v46 }
 0x7c8   :  { %v2771_v42 = vpop.f32.mrf.mxu0  ;;  %v2812_v15 = vpop.f32.mrf.mxu1 }
 0x7c9   :  { %5222 = vpow2.f32 %v4777_v34 }
 0x7ca   :  { %5224 = vtanh.f32 %v2816_v55 }
 0x7cb   :  { %5226 = vpow2.f32 %v4778_v48 }
 0x7d4   :  { %v5221_v47 = vpop.eup %5220 }
 0x7d5   :  { %v2821_v53 = vadd.f32 1.0, %v5221_v47 }
 0x7d6   :  { %v5223_v3 = vpop.eup %5222 }
 0x7d7   :  { %5228 = vrcp.f32 %v2821_v53  ;;  %v2827_v20 = vadd.f32 1.0, %v5223_v3  ;;  %v5225_v40 = vpop.eup %5224 }
 0x7d8   :  { %v5227_v7 = vpop.eup %5226 }
 0x7d9   :  { %5230 = vrcp.f32 %v2827_v20  ;;  %v2834_v62 = vadd.f32 1.0, %v5227_v7 }
 0x7db   :  { %5232 = vrcp.f32 %v2834_v62  ;;  %v2888_v62 = vld [vmem:[%s7213_s6] sm:$0xf] }
 0x7e4   :  { %v5229_v9 = vpop.eup %5228 }
 0x7e5   :  { %v2838_v59 = vmul.f32 %v5229_v9, %v5225_v40 }
 0x7e6   :  { %v5231_v1 = vpop.eup %5230 }
 0x7e7   :  { %v2837_v26 = vmul.f32 %v5231_v1, %v6294_v14  ;;  %v3104_v14 = vpop.f32.mrf.mxu0 }
 0x7e8   :  { %v5233_v27 = vpop.eup %5232 }
 0x7e9   :  { %v2839_v4 = vadd.f32 %v2838_v59, %v2837_v26  ;;  %v3106_v33 = vpop.f32.mrf.mxu0 }
 0x7eb   :  { %5234 = vtanh.f32 %v2839_v4  ;;  %v6643_v36 = vpop.f32.mrf.mxu0 }
 0x7ed   :  { %v6647_v38 = vpop.f32.mrf.mxu0 }
 0x7ef   :  { %v6651_v34 = vpop.f32.mrf.mxu0 }
 0x7f1   :  { %v6655_v15 = vpop.f32.mrf.mxu0 }
 0x7f3   :  { %v6659_v10 = vpop.f32.mrf.mxu0 }
 0x7f4   :  { %7268 = vst [vmem:[#allocation7_spill] sm:$0xff] %v6659_v10 }
 0x7f5   :  { %v6663_v48 = vpop.f32.mrf.mxu0 }
 0x7f6   :  { %7270 = vst [vmem:[#allocation6_spill] sm:$0xff] %v6663_v48 }
 0x7f7   :  { %v6667_v53 = vpop.f32.mrf.mxu0 }
 0x7f8   :  { %v5235_v29 = vpop.eup %5234  ;;  %7272 = vst [vmem:[#allocation11_spill] sm:$0xff] %v6667_v53 }
 0x7f9   :  { %v2841_v23 = vmul.f32 %v5235_v29, %v5233_v27  ;;  %v6671_v20 = vpop.f32.mrf.mxu0 }
 0x7fa   :  { %7274 = vst [vmem:[#allocation10_spill] sm:$0xff] %v6671_v20 }
 0x7fb   :  { %v2855_v31 = vpack.c.bf16 %v2841_v23, %v6297_v13  ;;  %v3177_v13 = vpop.f32.mrf.mxu1  ;;  %v6675_v7 = vpop.f32.mrf.mxu0  ;;  %v7284_v23 = vld [vmem:[#allocation4_spill] sm:$0xff] }
 0x7fc   :  { %7276 = vst [vmem:[#allocation15_spill] sm:$0xff] %v6675_v7  ;;  %v7291_v10 = vsub.s32 3, %v7284_v23 }
 0x7fd   :  { %3133 = vmatmul.mubr.bf16.gmra.mxu0 %v2855_v31  ;;  %3206 = vmatmul.mubr.bf16.gmra.mxu1 %v2855_v31  ;;  %v3179_v18 = vpop.f32.mrf.mxu1  ;;  %v6679_v59 = vpop.f32.mrf.mxu0  ;;  %v7285_v31 = vsub.s32 0, %v7284_v23 }
 0x7fe   :  { %3476 = vmatprep.mubr.bf16.mxu0 %v7247_v51  ;;  %3517 = vmatprep.mubr.bf16.mxu1 %v7247_v51  ;;  %7278 = vst [vmem:[#allocation14_spill] sm:$0xff] %v6679_v59 }
 0x7ff   :  { %v6645_v37 = vpop.f32.mrf.mxu1  ;;  %v6696_v7 = vrot.slane %v2888_v62, %v7285_v31 }
 0x801   :  { %v6649_v39 = vpop.f32.mrf.mxu1 }
 0x803   :  { %v6653_v42 = vpop.f32.mrf.mxu1 }
 0x804   :  { %7267 = vst [vmem:[#allocation5_spill] sm:$0xff] %v6653_v42 }
 0x805   :  { %3477 = vmatmul.mubr.bf16.vlgmr.msra.gmra.mxu0 %v7247_v51  ;;  %3518 = vmatmul.mubr.bf16.vlgmr.msra.gmra.mxu1 %v7247_v51  ;;  %v6657_v46 = vpop.f32.mrf.mxu1 }
 0x806   :  { %3560 = vmatpush1.bf16.msra.mxu0 %v6419_v44  ;;  %3601 = vmatpush1.bf16.msra.mxu1 %v6424_v21 }
 0x807   :  { %3561 = vmatprep.subr.bf16.mxu0 %v6432_v32  ;;  %3602 = vmatprep.subr.bf16.mxu1 %v6437_v43  ;;  %v6661_v55 = vpop.f32.mrf.mxu1 }
 0x808   :  { %3591 = vmatprep.mubr.bf16.mxu0 %v7247_v51  ;;  %3632 = vmatprep.mubr.bf16.mxu1 %v7247_v51  ;;  %7269 = vst [vmem:[#allocation8_spill] sm:$0xff] %v6661_v55 }
 0x809   :  { %v6665_v47 = vpop.f32.mrf.mxu1 }
 0x80a   :  { %3562 = vmatpush1.bf16.msra.mxu0 %v6442_v61  ;;  %3603 = vmatpush1.bf16.msra.mxu1 %v6447_v56  ;;  %7271 = vst [vmem:[#allocation9_spill] sm:$0xff] %v6665_v47 }
 0x80b   :  { %3563 = vmatprep.subr.bf16.mxu0 %v6456_v2  ;;  %3604 = vmatprep.subr.bf16.mxu1 %v6461_v63  ;;  %v6669_v3 = vpop.f32.mrf.mxu1 }
 0x80c   :  { %7273 = vst [vmem:[#allocation12_spill] sm:$0xff] %v6669_v3 }
 0x80d   :  { %v6673_v40 = vpop.f32.mrf.mxu1 }
 0x80e   :  { %3564 = vmatpush1.bf16.msra.mxu0 %v6466_v45  ;;  %3605 = vmatpush1.bf16.msra.mxu1 %v6471_v52  ;;  %7275 = vst [vmem:[#allocation13_spill] sm:$0xff] %v6673_v40 }
 0x80f   :  { %3565 = vmatprep.subr.bf16.mxu0 %v6480_v30  ;;  %3606 = vmatprep.subr.bf16.mxu1 %v6485_v49  ;;  %v6677_v9 = vpop.f32.mrf.mxu1 }
 0x810   :  { %7277 = vst [vmem:[#allocation16_spill] sm:$0xff] %v6677_v9 }
 0x811   :  { %v6681_v1 = vpop.f32.mrf.mxu1 }
 0x812   :  { %3566 = vmatpush1.bf16.msra.mxu0 %v6490_v57  ;;  %3607 = vmatpush1.bf16.msra.mxu1 %v6495_v5  ;;  %7279 = vst [vmem:[#allocation17_spill] sm:$0xff] %v6681_v1  ;;  %v7288_v1 = vsub.s32 1, %v7284_v23 }
 0x813   :  { %3567 = vmatprep.subr.bf16.mxu0 %v6504_v0  ;;  %3608 = vmatprep.subr.bf16.mxu1 %v6509_v50 }
 0x814   :  { %v6704_v3 = vrot.slane %v2888_v62, %v7288_v1 }
 0x816   :  { %3568 = vmatpush1.bf16.msra.mxu0 %v6514_v60  ;;  %3609 = vmatpush1.bf16.msra.mxu1 %v6519_v6  ;;  %v3107_v20 = vadd.f32 %v3106_v33, %v6704_v3  ;;  %v7292_v33 = vsub.s32 2, %v7284_v23 }
 0x817   :  { %3569 = vmatprep.subr.bf16.mxu0 %v6526_v8  ;;  %3610 = vmatprep.subr.bf16.mxu1 %v6531_v11 }
 0x81a   :  { %3570 = vmatpush1.bf16.msra.mxu0 %v6538_v28  ;;  %3611 = vmatpush1.bf16.msra.mxu1 %v6543_v12 }
 0x81b   :  { %3571 = vmatprep.subr.bf16.mxu0 %v6550_v16  ;;  %3612 = vmatprep.subr.bf16.mxu1 %v6555_v17 }
 0x81e   :  { %3572 = vmatpush1.bf16.msra.mxu0 %v6562_v19  ;;  %3613 = vmatpush1.bf16.msra.mxu1 %v6567_v25 }
 0x81f   :  { %3573 = vmatprep.subr.bf16.mxu0 %v6574_v22  ;;  %3614 = vmatprep.subr.bf16.mxu1 %v6579_v35 }
 0x822   :  { %3574 = vmatpush1.bf16.msra.mxu0 %v6586_v41  ;;  %3615 = vmatpush1.bf16.msra.mxu1 %v6591_v24 }
 0x823   :  { %3674 = vmatprep.subr.bf16.mxu0 %v6408_v58  ;;  %3715 = vmatprep.subr.bf16.mxu1 %v6413_v54 }
 0x8bd   :  { %v6686_v26 = vpop.f32.mrf.mxu0  ;;  %v6688_v4 = vpop.f32.mrf.mxu1 }
 0x8be   :  { %7280 = vst [vmem:[#allocation19_spill] sm:$0xff] %v6686_v26  ;;  %7281 = vst [vmem:[#allocation20_spill] sm:$0xff] %v6688_v4  ;;  %v3105_v4 = vadd.f32 %v3104_v14, %v6696_v7 }
 0x8bf   :  { %v6690_v27 = vpop.f32.mrf.mxu0  ;;  %v6692_v29 = vpop.f32.mrf.mxu1 }
 0x8c0   :  { %7282 = vst [vmem:[#allocation18_spill] sm:$0xff] %v6690_v27  ;;  %7283 = vst [vmem:[#allocation21_spill] sm:$0xff] %v6692_v29 }
 0x8c1   :  { %v6698_v9 = vpop.f32.mrf.mxu0  ;;  %v6700_v59 = vpop.f32.mrf.mxu1 }
 0x8c2   :  { %7286 = vst [vmem:[#allocation23_spill] sm:$0xff] %v6698_v9  ;;  %7287 = vst [vmem:[#allocation22_spill] sm:$0xff] %v6700_v59 }
 0x8c3   :  { %v6706_v40 = vpop.f32.mrf.mxu0  ;;  %v6708_v26 = vpop.f32.mrf.mxu1 }
 0x8c4   :  { %7289 = vst [vmem:[#allocation4_spill] sm:$0xff] %v6706_v40  ;;  %7290 = vst [vmem:[#allocation24_spill] sm:$0xff] %v6708_v26  ;;  %v6714_v40 = vrot.slane %v2888_v62, %v7291_v10 }
 0x8c5   :  { %v3478_v27 = vpop.f32.mrf.mxu0  ;;  %v3519_v29 = vpop.f32.mrf.mxu1 }
 0x8c6   :  { %v3526_v31 = vadd.f32 %v3478_v27, %v3105_v4  ;;  %v3180_v14 = vadd.f32 %v3179_v18, %v6714_v40  ;;  %v6719_v4 = vrot.slane %v2888_v62, %v7292_v33 }
 0x8c7   :  { %v3480_v53 = vpop.f32.mrf.mxu0  ;;  %v3521_v55 = vpop.f32.mrf.mxu1 }
 0x8c8   :  { %v4843_v9 = vmul.f32 -1.442695, %v3526_v31  ;;  %v3527_v47 = vadd.f32 %v3480_v53, %v3107_v20  ;;  %v3529_v27 = vadd.f32 %v3521_v55, %v3180_v14  ;;  %v3178_v53 = vadd.f32 %v3177_v13, %v6719_v4 }
 0x8c9   :  { %v3482_v59 = vpop.f32.mrf.mxu0  ;;  %v3523_v48 = vpop.f32.mrf.mxu1 }
 0x8ca   :  { %5236 = vpow2.f32 %v4843_v9  ;;  %v4844_v1 = vmul.f32 -1.442695, %v3527_v47  ;;  %v4845_v20 = vmul.f32 -1.442695, %v3529_v27  ;;  %v3528_v9 = vadd.f32 %v3519_v29, %v3178_v53 }
 0x8cb   :  { %v3483_v26 = vpop.f32.mrf.mxu0  ;;  %v3524_v42 = vpop.f32.mrf.mxu1  ;;  %v3109_v27 = vadd.f32 %v6643_v36, %v6696_v7  ;;  %v3184_v36 = vadd.f32 %v6649_v39, %v6714_v40 }
 0x8cc   :  { %5238 = vpow2.f32 %v4844_v1 }
 0x8cd   :  { %5240 = vpow2.f32 %v4845_v20 }
 0x8d7   :  { %v5237_v48 = vpop.eup %5236 }
 0x8d8   :  { %v3533_v47 = vadd.f32 1.0, %v5237_v48  ;;  %v3111_v48 = vadd.f32 %v6647_v38, %v6704_v3 }
 0x8d9   :  { %v5239_v59 = vpop.eup %5238 }
 0x8da   :  { %5242 = vrcp.f32 %v3533_v47  ;;  %v3539_v10 = vadd.f32 1.0, %v5239_v59  ;;  %v5241_v42 = vpop.eup %5240 }
 0x8db   :  { %5244 = vtanh.f32 %v3528_v9  ;;  %v3546_v23 = vadd.f32 1.0, %v5241_v42 }
 0x8dc   :  { %5246 = vrcp.f32 %v3539_v10 }
 0x8dd   :  { %5248 = vrcp.f32 %v3546_v23 }
 0x8e7   :  { %v5243_v26 = vpop.eup %5242 }
 0x8e8   :  { %v5245_v18 = vpop.eup %5244 }
 0x8e9   :  { %v5247_v31 = vpop.eup %5246  ;;  %v3550_v1 = vmul.f32 %v5245_v18, %v5243_v26 }
 0x8ea   :  { %v3549_v62 = vmul.f32 0.0, %v5247_v31  ;;  %v5249_v13 = vpop.eup %5248 }
 0x8ec   :  { %v6722_v55 = vadd.f32 %v3550_v1, %v3549_v62 }
 0x8ee   :  { %5250 = vtanh.f32 %v6722_v55 }
 0x8fb   :  { %v5251_v29 = vpop.eup %5250 }
 0x8fc   :  { %v3553_v14 = vmul.f32 %v5251_v29, %v5249_v13  ;;  %v3182_v13 = vadd.f32 %v6645_v37, %v6719_v4 }
 0x8fe   :  { %v3558_v33 = vpack.c.bf16 %v3553_v14, %v3553_v14 }
 0x900   :  { %3592 = vmatmul.mubr.bf16.vlgmr.msra.gmra.mxu0 %v3558_v33  ;;  %3633 = vmatmul.mubr.bf16.vlgmr.msra.gmra.mxu1 %v3558_v33 }
 0x901   :  { %3675 = vmatpush1.bf16.msra.mxu0 %v6419_v44  ;;  %3716 = vmatpush1.bf16.msra.mxu1 %v6424_v21 }
 0x902   :  { %3676 = vmatprep.subr.bf16.mxu0 %v6432_v32  ;;  %3717 = vmatprep.subr.bf16.mxu1 %v6437_v43 }
 0x903   :  { %3706 = vmatprep.mubr.bf16.mxu0 %v7247_v51  ;;  %3747 = vmatprep.mubr.bf16.mxu1 %v7247_v51 }
 0x905   :  { %3677 = vmatpush1.bf16.msra.mxu0 %v6442_v61  ;;  %3718 = vmatpush1.bf16.msra.mxu1 %v6447_v56 }
 0x906   :  { %3678 = vmatprep.subr.bf16.mxu0 %v6456_v2  ;;  %3719 = vmatprep.subr.bf16.mxu1 %v6461_v63 }
 0x909   :  { %3679 = vmatpush1.bf16.msra.mxu0 %v6466_v45  ;;  %3720 = vmatpush1.bf16.msra.mxu1 %v6471_v52 }
 0x90a   :  { %3680 = vmatprep.subr.bf16.mxu0 %v6480_v30  ;;  %3721 = vmatprep.subr.bf16.mxu1 %v6485_v49 }
 0x90d   :  { %3681 = vmatpush1.bf16.msra.mxu0 %v6490_v57  ;;  %3722 = vmatpush1.bf16.msra.mxu1 %v6495_v5 }
 0x90e   :  { %3682 = vmatprep.subr.bf16.mxu0 %v6504_v0  ;;  %3723 = vmatprep.subr.bf16.mxu1 %v6509_v50 }
 0x911   :  { %3683 = vmatpush1.bf16.msra.mxu0 %v6514_v60  ;;  %3724 = vmatpush1.bf16.msra.mxu1 %v6519_v6 }
 0x912   :  { %3684 = vmatprep.subr.bf16.mxu0 %v6526_v8  ;;  %3725 = vmatprep.subr.bf16.mxu1 %v6531_v11 }
 0x915   :  { %3685 = vmatpush1.bf16.msra.mxu0 %v6538_v28  ;;  %3726 = vmatpush1.bf16.msra.mxu1 %v6543_v12 }
 0x916   :  { %3686 = vmatprep.subr.bf16.mxu0 %v6550_v16  ;;  %3727 = vmatprep.subr.bf16.mxu1 %v6555_v17 }
 0x919   :  { %3687 = vmatpush1.bf16.msra.mxu0 %v6562_v19  ;;  %3728 = vmatpush1.bf16.msra.mxu1 %v6567_v25 }
 0x91a   :  { %3688 = vmatprep.subr.bf16.mxu0 %v6574_v22  ;;  %3729 = vmatprep.subr.bf16.mxu1 %v6579_v35 }
 0x91d   :  { %3689 = vmatpush1.bf16.msra.mxu0 %v6586_v41  ;;  %3730 = vmatpush1.bf16.msra.mxu1 %v6591_v24 }
 0x91e   :  { %3789 = vmatprep.subr.bf16.mxu0 %v6408_v58  ;;  %3830 = vmatprep.subr.bf16.mxu1 %v6413_v54 }
 0x9c0   :  { %v3593_v53 = vpop.f32.mrf.mxu0  ;;  %v3634_v20 = vpop.f32.mrf.mxu1 }
 0x9c1   :  { %v3641_v9 = vadd.f32 %v3593_v53, %v3109_v27  ;;  %v3643_v38 = vadd.f32 %v3634_v20, %v3182_v13 }
 0x9c2   :  { %v3595_v47 = vpop.f32.mrf.mxu0  ;;  %v3636_v59 = vpop.f32.mrf.mxu1 }
 0x9c3   :  { %v4846_v10 = vmul.f32 -1.442695, %v3641_v9  ;;  %v3642_v42 = vadd.f32 %v3595_v47, %v3111_v48  ;;  %v3644_v1 = vadd.f32 %v3636_v59, %v3184_v36  ;;  %v3117_v36 = vadd.f32 %v6655_v15, %v6704_v3 }
 0x9c4   :  { %v3597_v26 = vpop.f32.mrf.mxu0  ;;  %v3638_v18 = vpop.f32.mrf.mxu1 }
 0x9c5   :  { %5252 = vpow2.f32 %v4846_v10  ;;  %v4847_v31 = vmul.f32 -1.442695, %v3642_v42  ;;  %v4848_v29 = vmul.f32 -1.442695, %v3644_v1 }
 0x9c6   :  { %v3598_v23 = vpop.f32.mrf.mxu0  ;;  %v3639_v62 = vpop.f32.mrf.mxu1 }
 0x9c7   :  { %5254 = vpow2.f32 %v4847_v31 }
 0x9c8   :  { %5256 = vtanh.f32 %v3643_v38 }
 0x9c9   :  { %5258 = vpow2.f32 %v4848_v29 }
 0x9d2   :  { %v5253_v14 = vpop.eup %5252 }
 0x9d3   :  { %v3648_v33 = vadd.f32 1.0, %v5253_v14 }
 0x9d4   :  { %v5255_v27 = vpop.eup %5254 }
 0x9d5   :  { %5260 = vrcp.f32 %v3648_v33  ;;  %v3654_v53 = vadd.f32 1.0, %v5255_v27  ;;  %v5257_v48 = vpop.eup %5256 }
 0x9d6   :  { %v5259_v9 = vpop.eup %5258 }
 0x9d7   :  { %5262 = vrcp.f32 %v3654_v53  ;;  %v3661_v39 = vadd.f32 1.0, %v5259_v9 }
 0x9d9   :  { %5264 = vrcp.f32 %v3661_v39 }
 0x9e2   :  { %v5261_v47 = vpop.eup %5260 }
 0x9e3   :  { %v3665_v10 = vmul.f32 %v5261_v47, %v5257_v48 }
 0x9e4   :  { %v5263_v42 = vpop.eup %5262 }
 0x9e5   :  { %v3664_v59 = vmul.f32 %v5263_v42, %v6722_v55  ;;  %v3115_v55 = vadd.f32 %v6651_v34, %v6696_v7  ;;  %v3190_v34 = vadd.f32 %v6657_v46, %v6714_v40 }
 0x9e6   :  { %v5265_v37 = vpop.eup %5264 }
 0x9e7   :  { %v6768_v26 = vadd.f32 %v3665_v10, %v3664_v59  ;;  %v7293_v10 = vld [vmem:[#allocation5_spill] sm:$0xff] }
 0x9e8   :  { %v3188_v42 = vadd.f32 %v7293_v10, %v6719_v4 }
 0x9e9   :  { %5266 = vtanh.f32 %v6768_v26 }
 0x9f6   :  { %v5267_v20 = vpop.eup %5266 }
 0x9f7   :  { %v3668_v18 = vmul.f32 %v5267_v20, %v5265_v37 }
 0x9f9   :  { %v3673_v31 = vpack.c.bf16 %v3668_v18, %v3668_v18 }
 0x9fb   :  { %3707 = vmatmul.mubr.bf16.vlgmr.msra.gmra.mxu0 %v3673_v31  ;;  %3748 = vmatmul.mubr.bf16.vlgmr.msra.gmra.mxu1 %v3673_v31 }
 0x9fc   :  { %3790 = vmatpush1.bf16.msra.mxu0 %v6419_v44  ;;  %3831 = vmatpush1.bf16.msra.mxu1 %v6424_v21 }
 0x9fd   :  { %3791 = vmatprep.subr.bf16.mxu0 %v6432_v32  ;;  %3832 = vmatprep.subr.bf16.mxu1 %v6437_v43 }
 0x9fe   :  { %3821 = vmatprep.mubr.bf16.mxu0 %v7247_v51  ;;  %3862 = vmatprep.mubr.bf16.mxu1 %v7247_v51 }
 0xa00   :  { %3792 = vmatpush1.bf16.msra.mxu0 %v6442_v61  ;;  %3833 = vmatpush1.bf16.msra.mxu1 %v6447_v56 }
 0xa01   :  { %3793 = vmatprep.subr.bf16.mxu0 %v6456_v2  ;;  %3834 = vmatprep.subr.bf16.mxu1 %v6461_v63 }
 0xa04   :  { %3794 = vmatpush1.bf16.msra.mxu0 %v6466_v45  ;;  %3835 = vmatpush1.bf16.msra.mxu1 %v6471_v52 }
 0xa05   :  { %3795 = vmatprep.subr.bf16.mxu0 %v6480_v30  ;;  %3836 = vmatprep.subr.bf16.mxu1 %v6485_v49 }
 0xa08   :  { %3796 = vmatpush1.bf16.msra.mxu0 %v6490_v57  ;;  %3837 = vmatpush1.bf16.msra.mxu1 %v6495_v5 }
 0xa09   :  { %3797 = vmatprep.subr.bf16.mxu0 %v6504_v0  ;;  %3838 = vmatprep.subr.bf16.mxu1 %v6509_v50 }
 0xa0c   :  { %3798 = vmatpush1.bf16.msra.mxu0 %v6514_v60  ;;  %3839 = vmatpush1.bf16.msra.mxu1 %v6519_v6 }
 0xa0d   :  { %3799 = vmatprep.subr.bf16.mxu0 %v6526_v8  ;;  %3840 = vmatprep.subr.bf16.mxu1 %v6531_v11 }
 0xa10   :  { %3800 = vmatpush1.bf16.msra.mxu0 %v6538_v28  ;;  %3841 = vmatpush1.bf16.msra.mxu1 %v6543_v12 }
 0xa11   :  { %3801 = vmatprep.subr.bf16.mxu0 %v6550_v16  ;;  %3842 = vmatprep.subr.bf16.mxu1 %v6555_v17 }
 0xa14   :  { %3802 = vmatpush1.bf16.msra.mxu0 %v6562_v19  ;;  %3843 = vmatpush1.bf16.msra.mxu1 %v6567_v25 }
 0xa15   :  { %3803 = vmatprep.subr.bf16.mxu0 %v6574_v22  ;;  %3844 = vmatprep.subr.bf16.mxu1 %v6579_v35 }
 0xa18   :  { %3804 = vmatpush1.bf16.msra.mxu0 %v6586_v41  ;;  %3845 = vmatpush1.bf16.msra.mxu1 %v6591_v24 }
 0xa19   :  { %3904 = vmatprep.subr.bf16.mxu0 %v6408_v58  ;;  %3945 = vmatprep.subr.bf16.mxu1 %v6413_v54 }
 0xabb   :  { %v3708_v23 = vpop.f32.mrf.mxu0  ;;  %v3749_v62 = vpop.f32.mrf.mxu1 }
 0xabc   :  { %v3756_v1 = vadd.f32 %v3708_v23, %v3115_v55  ;;  %v3758_v15 = vadd.f32 %v3749_v62, %v3188_v42 }
 0xabd   :  { %v3710_v13 = vpop.f32.mrf.mxu0  ;;  %v3751_v38 = vpop.f32.mrf.mxu1 }
 0xabe   :  { %v4849_v29 = vmul.f32 -1.442695, %v3756_v1  ;;  %v3757_v14 = vadd.f32 %v3710_v13, %v3117_v36  ;;  %v3759_v47 = vadd.f32 %v3751_v38, %v3190_v34 }
 0xabf   :  { %v3712_v33 = vpop.f32.mrf.mxu0  ;;  %v3753_v27 = vpop.f32.mrf.mxu1 }
 0xac0   :  { %5268 = vpow2.f32 %v4849_v29  ;;  %v4850_v53 = vmul.f32 -1.442695, %v3757_v14  ;;  %v4851_v39 = vmul.f32 -1.442695, %v3759_v47 }
 0xac1   :  { %v3713_v48 = vpop.f32.mrf.mxu0  ;;  %v3754_v9 = vpop.f32.mrf.mxu1 }
 0xac2   :  { %5270 = vpow2.f32 %v4850_v53  ;;  %v7295_v9 = vld [vmem:[#allocation6_spill] sm:$0xff] }
 0xac3   :  { %5272 = vtanh.f32 %v3758_v15  ;;  %v3121_v34 = vadd.f32 %v7295_v9, %v6704_v3 }
 0xac4   :  { %5274 = vpow2.f32 %v4851_v39 }
 0xacd   :  { %v5269_v59 = vpop.eup %5268 }
 0xace   :  { %v3763_v37 = vadd.f32 1.0, %v5269_v59 }
 0xacf   :  { %v5271_v20 = vpop.eup %5270 }
 0xad0   :  { %5276 = vrcp.f32 %v3763_v37  ;;  %v3769_v18 = vadd.f32 1.0, %v5271_v20  ;;  %v5273_v31 = vpop.eup %5272 }
 0xad1   :  { %v5275_v55 = vpop.eup %5274 }
 0xad2   :  { %5278 = vrcp.f32 %v3769_v18  ;;  %v3776_v46 = vadd.f32 1.0, %v5275_v55 }
 0xad4   :  { %5280 = vrcp.f32 %v3776_v46 }
 0xadd   :  { %v5277_v23 = vpop.eup %5276 }
 0xade   :  { %v3780_v36 = vmul.f32 %v5277_v23, %v5273_v31  ;;  %v7297_v23 = vld [vmem:[#allocation8_spill] sm:$0xff] }
 0xadf   :  { %v5279_v1 = vpop.eup %5278 }
 0xae0   :  { %v3779_v13 = vmul.f32 %v5279_v1, %v6768_v26  ;;  %v7294_v26 = vld [vmem:[#allocation7_spill] sm:$0xff] }
 0xae1   :  { %v5281_v62 = vpop.eup %5280  ;;  %v3119_v27 = vadd.f32 %v7294_v26, %v6696_v7 }
 0xae2   :  { %v6814_v38 = vadd.f32 %v3780_v36, %v3779_v13  ;;  %v3192_v36 = vadd.f32 %v7297_v23, %v6719_v4 }
 0xae4   :  { %5282 = vtanh.f32 %v6814_v38 }
 0xaf1   :  { %v5283_v29 = vpop.eup %5282 }
 0xaf2   :  { %v3783_v14 = vmul.f32 %v5283_v29, %v5281_v62 }
 0xaf4   :  { %v3788_v33 = vpack.c.bf16 %v3783_v14, %v3783_v14 }
 0xaf6   :  { %3822 = vmatmul.mubr.bf16.vlgmr.msra.gmra.mxu0 %v3788_v33  ;;  %3863 = vmatmul.mubr.bf16.vlgmr.msra.gmra.mxu1 %v3788_v33 }
 0xaf7   :  { %3905 = vmatpush1.bf16.msra.mxu0 %v6419_v44  ;;  %3946 = vmatpush1.bf16.msra.mxu1 %v6424_v21 }
 0xaf8   :  { %3906 = vmatprep.subr.bf16.mxu0 %v6432_v32  ;;  %3947 = vmatprep.subr.bf16.mxu1 %v6437_v43 }
 0xaf9   :  { %3936 = vmatprep.mubr.bf16.mxu0 %v7247_v51  ;;  %3977 = vmatprep.mubr.bf16.mxu1 %v7247_v51 }
 0xafb   :  { %3907 = vmatpush1.bf16.msra.mxu0 %v6442_v61  ;;  %3948 = vmatpush1.bf16.msra.mxu1 %v6447_v56 }
 0xafc   :  { %3908 = vmatprep.subr.bf16.mxu0 %v6456_v2  ;;  %3949 = vmatprep.subr.bf16.mxu1 %v6461_v63 }
 0xaff   :  { %3909 = vmatpush1.bf16.msra.mxu0 %v6466_v45  ;;  %3950 = vmatpush1.bf16.msra.mxu1 %v6471_v52 }
 0xb00   :  { %3910 = vmatprep.subr.bf16.mxu0 %v6480_v30  ;;  %3951 = vmatprep.subr.bf16.mxu1 %v6485_v49 }
 0xb03   :  { %3911 = vmatpush1.bf16.msra.mxu0 %v6490_v57  ;;  %3952 = vmatpush1.bf16.msra.mxu1 %v6495_v5 }
 0xb04   :  { %3912 = vmatprep.subr.bf16.mxu0 %v6504_v0  ;;  %3953 = vmatprep.subr.bf16.mxu1 %v6509_v50 }
 0xb07   :  { %3913 = vmatpush1.bf16.msra.mxu0 %v6514_v60  ;;  %3954 = vmatpush1.bf16.msra.mxu1 %v6519_v6 }
 0xb08   :  { %3914 = vmatprep.subr.bf16.mxu0 %v6526_v8  ;;  %3955 = vmatprep.subr.bf16.mxu1 %v6531_v11 }
 0xb0b   :  { %3915 = vmatpush1.bf16.msra.mxu0 %v6538_v28  ;;  %3956 = vmatpush1.bf16.msra.mxu1 %v6543_v12 }
 0xb0c   :  { %3916 = vmatprep.subr.bf16.mxu0 %v6550_v16  ;;  %3957 = vmatprep.subr.bf16.mxu1 %v6555_v17 }
 0xb0f   :  { %3917 = vmatpush1.bf16.msra.mxu0 %v6562_v19  ;;  %3958 = vmatpush1.bf16.msra.mxu1 %v6567_v25 }
 0xb10   :  { %3918 = vmatprep.subr.bf16.mxu0 %v6574_v22  ;;  %3959 = vmatprep.subr.bf16.mxu1 %v6579_v35 }
 0xb13   :  { %3919 = vmatpush1.bf16.msra.mxu0 %v6586_v41  ;;  %3960 = vmatpush1.bf16.msra.mxu1 %v6591_v24 }
 0xb14   :  { %4019 = vmatprep.subr.bf16.mxu0 %v6408_v58  ;;  %4060 = vmatprep.subr.bf16.mxu1 %v6413_v54  ;;  %v7296_v54 = vld [vmem:[#allocation9_spill] sm:$0xff] }
 0xb15   :  { %v3194_v31 = vadd.f32 %v7296_v54, %v6714_v40 }
 0xbb6   :  { %v3823_v53 = vpop.f32.mrf.mxu0  ;;  %v3864_v48 = vpop.f32.mrf.mxu1 }
 0xbb7   :  { %v3871_v47 = vadd.f32 %v3823_v53, %v3119_v27  ;;  %v3873_v1 = vadd.f32 %v3864_v48, %v3192_v36 }
 0xbb8   :  { %v3825_v10 = vpop.f32.mrf.mxu0  ;;  %v3866_v42 = vpop.f32.mrf.mxu1 }
 0xbb9   :  { %v4852_v15 = vmul.f32 -1.442695, %v3871_v47  ;;  %v3872_v39 = vadd.f32 %v3825_v10, %v3121_v34  ;;  %v3874_v55 = vadd.f32 %v3866_v42, %v3194_v31 }
 0xbba   :  { %v3827_v59 = vpop.f32.mrf.mxu0  ;;  %v3868_v37 = vpop.f32.mrf.mxu1 }
 0xbbb   :  { %5284 = vpow2.f32 %v4852_v15  ;;  %v4853_v20 = vmul.f32 -1.442695, %v3872_v39  ;;  %v4854_v46 = vmul.f32 -1.442695, %v3874_v55 }
 0xbbc   :  { %v3828_v58 = vpop.f32.mrf.mxu0  ;;  %v3869_v18 = vpop.f32.mrf.mxu1 }
 0xbbd   :  { %5286 = vpow2.f32 %v4853_v20 }
 0xbbe   :  { %5288 = vtanh.f32 %v3873_v1  ;;  %v6922_v1 = vld [vmem:[%s7212_s5 + $0xe0] ss:$16 sps:$4 sm:$0xff]  }
 0xbbf   :  { %5290 = vpow2.f32 %v4854_v46  ;;  %v6928_v46 = vld [vmem:[%s7212_s5 + $0xe8] ss:$16 sps:$4 sm:$0xff]  }
 0xbc8   :  { %v5285_v13 = vpop.eup %5284 }
 0xbc9   :  { %v3878_v62 = vadd.f32 1.0, %v5285_v13  ;;  %v6934_v13 = vld [vmem:[%s7212_s5 + $0xc4] ss:$16 sps:$4 sm:$0xff]  }
 0xbca   :  { %v5287_v29 = vpop.eup %5286 }
 0xbcb   :  { %5292 = vrcp.f32 %v3878_v62  ;;  %v3884_v14 = vadd.f32 1.0, %v5287_v29  ;;  %v5289_v33 = vpop.eup %5288  ;;  %v6940_v62 = vld [vmem:[%s7212_s5 + $0xcc] ss:$16 sps:$4 sm:$0xff]   ;;  %v6948_v29 = vld [vmem:[%s7212_s5 + $0xc0] ss:$16 sps:$4 sm:$0xff]  }
 0xbcc   :  { %v5291_v26 = vpop.eup %5290 }
 0xbcd   :  { %5294 = vrcp.f32 %v3884_v14  ;;  %v3891_v34 = vadd.f32 1.0, %v5291_v26  ;;  %v6954_v14 = vld [vmem:[%s7212_s5 + $0xc8] ss:$16 sps:$4 sm:$0xff]   ;;  %v6966_v26 = vld [vmem:[%s7212_s5 + $0xac] ss:$16 sps:$4 sm:$0xff]  }
 0xbcf   :  { %5296 = vrcp.f32 %v3891_v34  ;;  %v6990_v34 = vld [vmem:[%s7212_s5 + $0x8c] ss:$16 sps:$4 sm:$0xff]  }
 0xbd8   :  { %v5293_v27 = vpop.eup %5292 }
 0xbd9   :  { %v3895_v53 = vmul.f32 %v5293_v27, %v5289_v33  ;;  %v6960_v33 = vld [vmem:[%s7212_s5 + $0xa4] ss:$16 sps:$4 sm:$0xff]   ;;  %v6972_v27 = vld [vmem:[%s7212_s5 + $0xa0] ss:$16 sps:$4 sm:$0xff]  }
 0xbda   :  { %v5295_v9 = vpop.eup %5294 }
 0xbdb   :  { %v3894_v47 = vmul.f32 %v5295_v9, %v6814_v38  ;;  %v6984_v9 = vld [vmem:[%s7212_s5 + $0x84] ss:$16 sps:$4 sm:$0xff]  }
 0xbdc   :  { %v5297_v48 = vpop.eup %5296 }
 0xbdd   :  { %v6860_v10 = vadd.f32 %v3895_v53, %v3894_v47  ;;  %v6978_v53 = vld [vmem:[%s7212_s5 + $0xa8] ss:$16 sps:$4 sm:$0xff]   ;;  %v6996_v47 = vld [vmem:[%s7212_s5 + $0x80] ss:$16 sps:$4 sm:$0xff]  }
 0xbdf   :  { %5298 = vtanh.f32 %v6860_v10 }
 0xbec   :  { %v5299_v42 = vpop.eup %5298 }
 0xbed   :  { %v3898_v15 = vmul.f32 %v5299_v42, %v5297_v48  ;;  %v7008_v48 = vld [vmem:[%s7212_s5 + $0x64] ss:$16 sps:$4 sm:$0xff]   ;;  %v7014_v42 = vld [vmem:[%s7212_s5 + $0x6c] ss:$16 sps:$4 sm:$0xff]  }
 0xbef   :  { %v3903_v39 = vpack.c.bf16 %v3898_v15, %v3898_v15  ;;  %v7020_v15 = vld [vmem:[%s7212_s5 + $0x60] ss:$16 sps:$4 sm:$0xff]  }
 0xbf1   :  { %3937 = vmatmul.mubr.bf16.vlgmr.msra.gmra.mxu0 %v3903_v39  ;;  %3978 = vmatmul.mubr.bf16.vlgmr.msra.gmra.mxu1 %v3903_v39  ;;  %v7026_v39 = vld [vmem:[%s7212_s5 + $0x68] ss:$16 sps:$4 sm:$0xff]  }
 0xbf2   :  { %4020 = vmatpush1.bf16.msra.mxu0 %v6419_v44  ;;  %4061 = vmatpush1.bf16.msra.mxu1 %v6424_v21  ;;  %v6898_v44 = vld [vmem:[%s7212_s5 + $0xe4] ss:$16 sps:$4 sm:$0xff]   ;;  %v6904_v21 = vld [vmem:[%s7212_s5 + $0xec] ss:$16 sps:$4 sm:$0xff]  }
 0xbf3   :  { %4021 = vmatprep.subr.bf16.mxu0 %v6432_v32  ;;  %4062 = vmatprep.subr.bf16.mxu1 %v6437_v43  ;;  %v7298_v32 = vld [vmem:[#allocation11_spill] sm:$0xff] }
 0xbf4   :  { %4051 = vmatprep.mubr.bf16.mxu0 %v7247_v51  ;;  %4092 = vmatprep.mubr.bf16.mxu1 %v7247_v51  ;;  %v3125_v43 = vadd.f32 %v7298_v32, %v6696_v7  ;;  %v7032_v32 = vld [vmem:[%s7212_s5 + $0x44] ss:$16 sps:$4 sm:$0xff]  }
 0xbf6   :  { %4022 = vmatpush1.bf16.msra.mxu0 %v6442_v61  ;;  %4063 = vmatpush1.bf16.msra.mxu1 %v6447_v56 }
 0xbf7   :  { %4023 = vmatprep.subr.bf16.mxu0 %v6456_v2  ;;  %4064 = vmatprep.subr.bf16.mxu1 %v6461_v63  ;;  %v7299_v2 = vld [vmem:[#allocation10_spill] sm:$0xff] }
 0xbf8   :  { %v3127_v63 = vadd.f32 %v7299_v2, %v6704_v3  ;;  %v7056_v2 = vld [vmem:[%s7212_s5 + $0x24] ss:$16 sps:$4 sm:$0xff]  }
 0xbfa   :  { %4024 = vmatpush1.bf16.msra.mxu0 %v6466_v45  ;;  %4065 = vmatpush1.bf16.msra.mxu1 %v6471_v52 }
 0xbfb   :  { %4025 = vmatprep.subr.bf16.mxu0 %v6480_v30  ;;  %4066 = vmatprep.subr.bf16.mxu1 %v6485_v49 }
 0xbfe   :  { %4026 = vmatpush1.bf16.msra.mxu0 %v6490_v57  ;;  %4067 = vmatpush1.bf16.msra.mxu1 %v6495_v5 }
 0xbff   :  { %4027 = vmatprep.subr.bf16.mxu0 %v6504_v0  ;;  %4068 = vmatprep.subr.bf16.mxu1 %v6509_v50 }
 0xc02   :  { %4028 = vmatpush1.bf16.msra.mxu0 %v6514_v60  ;;  %4069 = vmatpush1.bf16.msra.mxu1 %v6519_v6 }
 0xc03   :  { %4029 = vmatprep.subr.bf16.mxu0 %v6526_v8  ;;  %4070 = vmatprep.subr.bf16.mxu1 %v6531_v11  ;;  %v7300_v8 = vld [vmem:[#allocation13_spill] sm:$0xff] }
 0xc04   :  { %v3200_v11 = vadd.f32 %v7300_v8, %v6714_v40  ;;  %v7303_v8 = vld [vmem:[#allocation14_spill] sm:$0xff] }
 0xc06   :  { %4030 = vmatpush1.bf16.msra.mxu0 %v6538_v28  ;;  %4071 = vmatpush1.bf16.msra.mxu1 %v6543_v12  ;;  %v7301_v12 = vld [vmem:[#allocation12_spill] sm:$0xff] }
 0xc07   :  { %4031 = vmatprep.subr.bf16.mxu0 %v6550_v16  ;;  %4072 = vmatprep.subr.bf16.mxu1 %v6555_v17  ;;  %v3198_v16 = vadd.f32 %v7301_v12, %v6719_v4 }
 0xc0a   :  { %4032 = vmatpush1.bf16.msra.mxu0 %v6562_v19  ;;  %4073 = vmatpush1.bf16.msra.mxu1 %v6567_v25 }
 0xc0b   :  { %4033 = vmatprep.subr.bf16.mxu0 %v6574_v22  ;;  %4074 = vmatprep.subr.bf16.mxu1 %v6579_v35 }
 0xc0e   :  { %4034 = vmatpush1.bf16.msra.mxu0 %v6586_v41  ;;  %4075 = vmatpush1.bf16.msra.mxu1 %v6591_v24 }
 0xc0f   :  { %4134 = vmatprep.subr.bf16.mxu0 %v6898_v44  ;;  %4175 = vmatprep.subr.bf16.mxu1 %v6904_v21 }
 0xcb1   :  { %v3938_v61 = vpop.f32.mrf.mxu0  ;;  %v3979_v56 = vpop.f32.mrf.mxu1 }
 0xcb2   :  { %v3986_v45 = vadd.f32 %v3938_v61, %v3125_v43  ;;  %v3988_v17 = vadd.f32 %v3979_v56, %v3198_v16  ;;  %v7038_v43 = vld [vmem:[%s7212_s5 + $0x4c] ss:$16 sps:$4 sm:$0xff]   ;;  %v7044_v61 = vld [vmem:[%s7212_s5 + $0x40] ss:$16 sps:$4 sm:$0xff]   ;;  %v7050_v56 = vld [vmem:[%s7212_s5 + $0x48] ss:$16 sps:$4 sm:$0xff]  }
 0xcb3   :  { %v3940_v52 = vpop.f32.mrf.mxu0  ;;  %v3981_v30 = vpop.f32.mrf.mxu1 }
 0xcb4   :  { %v4855_v49 = vmul.f32 -1.442695, %v3986_v45  ;;  %v3987_v57 = vadd.f32 %v3940_v52, %v3127_v63  ;;  %v3989_v28 = vadd.f32 %v3981_v30, %v3200_v11  ;;  %v7062_v63 = vld [vmem:[%s7212_s5 + $0x2c] ss:$16 sps:$4 sm:$0xff]   ;;  %v7068_v45 = vld [vmem:[%s7212_s5 + $0x20] ss:$16 sps:$4 sm:$0xff]   ;;  %v3131_v11 = vadd.f32 %v7303_v8, %v6704_v3 }
 0xcb5   :  { %v3942_v5 = vpop.f32.mrf.mxu0  ;;  %v3983_v0 = vpop.f32.mrf.mxu1  ;;  %v7074_v52 = vld [vmem:[%s7212_s5 + $0x28] ss:$16 sps:$4 sm:$0xff]   ;;  %v7080_v30 = vld [vmem:[%s7212_s5 + $0x4] ss:$16 sps:$4 sm:$0xff]  }
 0xcb6   :  { %5300 = vpow2.f32 %v4855_v49  ;;  %v4856_v50 = vmul.f32 -1.442695, %v3987_v57  ;;  %v4857_v19 = vmul.f32 -1.442695, %v3989_v28  ;;  %v7086_v49 = vld [vmem:[%s7212_s5 + $0xc] ss:$16 sps:$4 sm:$0xff]  }
 0xcb7   :  { %v3943_v60 = vpop.f32.mrf.mxu0  ;;  %v3984_v6 = vpop.f32.mrf.mxu1  ;;  %v7092_v57 = vld [vmem:[%s7212_s5] ss:$16 sps:$4 sm:$0xff]   ;;  %v7098_v5 = vld [vmem:[%s7212_s5 + $0x8] ss:$16 sps:$4 sm:$0xff]  }
 0xcb8   :  { %5302 = vpow2.f32 %v4856_v50  ;;  %v7302_v0 = vld [vmem:[#allocation15_spill] sm:$0xff] }
 0xcb9   :  { %5304 = vtanh.f32 %v3988_v17  ;;  %v3129_v50 = vadd.f32 %v7302_v0, %v6696_v7 }
 0xcba   :  { %5306 = vpow2.f32 %v4857_v19 }
 0xcc3   :  { %v5301_v25 = vpop.eup %5300 }
 0xcc4   :  { %v3993_v22 = vadd.f32 1.0, %v5301_v25 }
 0xcc5   :  { %v5303_v35 = vpop.eup %5302 }
 0xcc6   :  { %5308 = vrcp.f32 %v3993_v22  ;;  %v3999_v41 = vadd.f32 1.0, %v5303_v35  ;;  %v5305_v24 = vpop.eup %5304 }
 0xcc7   :  { %v5307_v38 = vpop.eup %5306 }
 0xcc8   :  { %5310 = vrcp.f32 %v3999_v41  ;;  %v4006_v58 = vadd.f32 1.0, %v5307_v38 }
 0xcca   :  { %5312 = vrcp.f32 %v4006_v58 }
 0xcd3   :  { %v5309_v59 = vpop.eup %5308 }
 0xcd4   :  { %v4010_v37 = vmul.f32 %v5309_v59, %v5305_v24  ;;  %v7305_v59 = vld [vmem:[#allocation16_spill] sm:$0xff] }
 0xcd5   :  { %v5311_v20 = vpop.eup %5310 }
 0xcd6   :  { %v4009_v18 = vmul.f32 %v5311_v20, %v6860_v10  ;;  %v7002_v10 = vld [vmem:[%s7212_s5 + $0x88] ss:$16 sps:$4 sm:$0xff]  }
 0xcd7   :  { %v5313_v31 = vpop.eup %5312 }
 0xcd8   :  { %v6916_v54 = vadd.f32 %v4010_v37, %v4009_v18  ;;  %v3202_v37 = vadd.f32 %v7305_v59, %v6719_v4  ;;  %v5100_v59 = vld [vmem:[%s7214_s7 + $0x38] sm:$0xff]  }
 0xcda   :  { %5314 = vtanh.f32 %v6916_v54 }
 0xce7   :  { %v5315_v55 = vpop.eup %5314 }
 0xce8   :  { %v4013_v23 = vmul.f32 %v5315_v55, %v5313_v31 }
 0xcea   :  { %v4018_v36 = vpack.c.bf16 %v4013_v23, %v4013_v23 }
 0xcec   :  { %4052 = vmatmul.mubr.bf16.vlgmr.msra.gmra.mxu0 %v4018_v36  ;;  %4093 = vmatmul.mubr.bf16.vlgmr.msra.gmra.mxu1 %v4018_v36 }
 0xced   :  { %4135 = vmatpush1.bf16.msra.mxu0 %v6922_v1  ;;  %4176 = vmatpush1.bf16.msra.mxu1 %v6928_v46 }
 0xcee   :  { %4136 = vmatprep.subr.bf16.mxu0 %v6934_v13  ;;  %4177 = vmatprep.subr.bf16.mxu1 %v6940_v62 }
 0xcef   :  { %4166 = vmatprep.mubr.bf16.mxu0 %v7247_v51  ;;  %4207 = vmatprep.mubr.bf16.mxu1 %v7247_v51 }
 0xcf1   :  { %4137 = vmatpush1.bf16.msra.mxu0 %v6948_v29  ;;  %4178 = vmatpush1.bf16.msra.mxu1 %v6954_v14 }
 0xcf2   :  { %4138 = vmatprep.subr.bf16.mxu0 %v6960_v33  ;;  %4179 = vmatprep.subr.bf16.mxu1 %v6966_v26 }
 0xcf5   :  { %4139 = vmatpush1.bf16.msra.mxu0 %v6972_v27  ;;  %4180 = vmatpush1.bf16.msra.mxu1 %v6978_v53 }
 0xcf6   :  { %4140 = vmatprep.subr.bf16.mxu0 %v6984_v9  ;;  %4181 = vmatprep.subr.bf16.mxu1 %v6990_v34 }
 0xcf9   :  { %4141 = vmatpush1.bf16.msra.mxu0 %v6996_v47  ;;  %4182 = vmatpush1.bf16.msra.mxu1 %v7002_v10 }
 0xcfa   :  { %4142 = vmatprep.subr.bf16.mxu0 %v7008_v48  ;;  %4183 = vmatprep.subr.bf16.mxu1 %v7014_v42 }
 0xcfd   :  { %4143 = vmatpush1.bf16.msra.mxu0 %v7020_v15  ;;  %4184 = vmatpush1.bf16.msra.mxu1 %v7026_v39 }
 0xcfe   :  { %4144 = vmatprep.subr.bf16.mxu0 %v7032_v32  ;;  %4185 = vmatprep.subr.bf16.mxu1 %v7038_v43 }
 0xd01   :  { %4145 = vmatpush1.bf16.msra.mxu0 %v7044_v61  ;;  %4186 = vmatpush1.bf16.msra.mxu1 %v7050_v56 }
 0xd02   :  { %4146 = vmatprep.subr.bf16.mxu0 %v7056_v2  ;;  %4187 = vmatprep.subr.bf16.mxu1 %v7062_v63 }
 0xd05   :  { %4147 = vmatpush1.bf16.msra.mxu0 %v7068_v45  ;;  %4188 = vmatpush1.bf16.msra.mxu1 %v7074_v52 }
 0xd06   :  { %4148 = vmatprep.subr.bf16.mxu0 %v7080_v30  ;;  %4189 = vmatprep.subr.bf16.mxu1 %v7086_v49 }
 0xd09   :  { %4149 = vmatpush1.bf16.msra.mxu0 %v7092_v57  ;;  %4190 = vmatpush1.bf16.msra.mxu1 %v7098_v5 }
 0xd0a   :  { %4249 = vmatprep.subr.bf16.mxu0 %v6898_v44  ;;  %4290 = vmatprep.subr.bf16.mxu1 %v6904_v21  ;;  %v7304_v21 = vld [vmem:[#allocation17_spill] sm:$0xff] }
 0xd0b   :  { %v3204_v24 = vadd.f32 %v7304_v21, %v6714_v40 }
 0xdac   :  { %v4053_v60 = vpop.f32.mrf.mxu0  ;;  %v4094_v6 = vpop.f32.mrf.mxu1 }
 0xdad   :  { %v4101_v28 = vadd.f32 %v4053_v60, %v3129_v50  ;;  %v4103_v20 = vadd.f32 %v4094_v6, %v3202_v37  ;;  %v5101_v37 = vld [vmem:[%s7214_s7 + $0x30] sm:$0xff]  }
 0xdae   :  { %v4055_v12 = vpop.f32.mrf.mxu0  ;;  %v4096_v16 = vpop.f32.mrf.mxu1 }
 0xdaf   :  { %v4858_v17 = vmul.f32 -1.442695, %v4101_v28  ;;  %v4102_v19 = vadd.f32 %v4055_v12, %v3131_v11  ;;  %v4104_v38 = vadd.f32 %v4096_v16, %v3204_v24 }
 0xdb0   :  { %v4057_v25 = vpop.f32.mrf.mxu0  ;;  %v4098_v22 = vpop.f32.mrf.mxu1 }
 0xdb1   :  { %5316 = vpow2.f32 %v4858_v17  ;;  %v4859_v35 = vmul.f32 -1.442695, %v4102_v19  ;;  %v4860_v58 = vmul.f32 -1.442695, %v4104_v38 }
 0xdb2   :  { %v4058_v44 = vpop.f32.mrf.mxu0  ;;  %v4099_v41 = vpop.f32.mrf.mxu1 }
 0xdb3   :  { %5318 = vpow2.f32 %v4859_v35 }
 0xdb4   :  { %5320 = vtanh.f32 %v4103_v20  ;;  %v5102_v20 = vld [vmem:[%s7214_s7 + $0x28] sm:$0xff]  }
 0xdb5   :  { %5322 = vpow2.f32 %v4860_v58  ;;  %v5103_v58 = vld [vmem:[%s7214_s7 + $0x20] sm:$0xff]  }
 0xdbe   :  { %v5317_v18 = vpop.eup %5316 }
 0xdbf   :  { %v4108_v31 = vadd.f32 1.0, %v5317_v18  ;;  %v5104_v18 = vld [vmem:[%s7214_s7 + $0x18] sm:$0xff]  }
 0xdc0   :  { %v5319_v55 = vpop.eup %5318 }
 0xdc1   :  { %5324 = vrcp.f32 %v4108_v31  ;;  %v4114_v23 = vadd.f32 1.0, %v5319_v55  ;;  %v5321_v36 = vpop.eup %5320  ;;  %v5105_v31 = vld [vmem:[%s7214_s7 + $0x10] sm:$0xff]   ;;  %v5106_v55 = vld [vmem:[%s7214_s7 + $0x8] sm:$0xff]  }
 0xdc2   :  { %v5323_v0 = vpop.eup %5322 }
 0xdc3   :  { %5326 = vrcp.f32 %v4114_v23  ;;  %v4121_v11 = vadd.f32 1.0, %v5323_v0  ;;  %v5107_v23 = vld [vmem:[%s7214_s7] sm:$0xff]  }
 0xdc5   :  { %5328 = vrcp.f32 %v4121_v11 }
 0xdce   :  { %v5325_v50 = vpop.eup %5324 }
 0xdcf   :  { %v4125_v60 = vmul.f32 %v5325_v50, %v5321_v36  ;;  %v7311_v36 = vld [vmem:[#allocation23_spill] sm:$0xff] }
 0xdd0   :  { %v5327_v8 = vpop.eup %5326  ;;  %v3139_v0 = vadd.f32 %v7311_v36, %v6696_v7 }
 0xdd1   :  { %v4124_v28 = vmul.f32 %v5327_v8, %v6916_v54  ;;  %v7307_v54 = vld [vmem:[#allocation19_spill] sm:$0xff]  ;;  %v7312_v8 = vld [vmem:[#allocation4_spill] sm:$0xff] }
 0xdd2   :  { %v5329_v6 = vpop.eup %5328  ;;  %v3141_v11 = vadd.f32 %v7312_v8, %v6704_v3 }
 0xdd3   :  { %v7112_v12 = vadd.f32 %v4125_v60, %v4124_v28 }
 0xdd5   :  { %5330 = vtanh.f32 %v7112_v12 }
 0xde2   :  { %v5331_v16 = vpop.eup %5330 }
 0xde3   :  { %v4128_v17 = vmul.f32 %v5331_v16, %v5329_v6 }
 0xde5   :  { %v4133_v19 = vpack.c.bf16 %v4128_v17, %v4128_v17 }
 0xde7   :  { %4167 = vmatmul.mubr.bf16.vlgmr.msra.gmra.mxu0 %v4133_v19  ;;  %4208 = vmatmul.mubr.bf16.vlgmr.msra.gmra.mxu1 %v4133_v19 }
 0xde8   :  { %4250 = vmatpush1.bf16.msra.mxu0 %v6922_v1  ;;  %4291 = vmatpush1.bf16.msra.mxu1 %v6928_v46  ;;  %v3135_v1 = vadd.f32 %v7307_v54, %v6696_v7 }
 0xde9   :  { %4251 = vmatprep.subr.bf16.mxu0 %v6934_v13  ;;  %4292 = vmatprep.subr.bf16.mxu1 %v6940_v62  ;;  %v7308_v62 = vld [vmem:[#allocation18_spill] sm:$0xff] }
 0xdea   :  { %4281 = vmatprep.mubr.bf16.mxu0 %v7247_v51  ;;  %4322 = vmatprep.mubr.bf16.mxu1 %v7247_v51  ;;  %v7306_v51 = vmov 0.0  }
 0xdec   :  { %4252 = vmatpush1.bf16.msra.mxu0 %v6948_v29  ;;  %4293 = vmatpush1.bf16.msra.mxu1 %v6954_v14  ;;  %v3137_v29 = vadd.f32 %v7308_v62, %v6704_v3 }
 0xded   :  { %4253 = vmatprep.subr.bf16.mxu0 %v6960_v33  ;;  %4294 = vmatprep.subr.bf16.mxu1 %v6966_v26 }
 0xdf0   :  { %4254 = vmatpush1.bf16.msra.mxu0 %v6972_v27  ;;  %4295 = vmatpush1.bf16.msra.mxu1 %v6978_v53 }
 0xdf1   :  { %4255 = vmatprep.subr.bf16.mxu0 %v6984_v9  ;;  %4296 = vmatprep.subr.bf16.mxu1 %v6990_v34 }
 0xdf4   :  { %4256 = vmatpush1.bf16.msra.mxu0 %v6996_v47  ;;  %4297 = vmatpush1.bf16.msra.mxu1 %v7002_v10 }
 0xdf5   :  { %4257 = vmatprep.subr.bf16.mxu0 %v7008_v48  ;;  %4298 = vmatprep.subr.bf16.mxu1 %v7014_v42  ;;  %v7309_v42 = vld [vmem:[#allocation21_spill] sm:$0xff] }
 0xdf8   :  { %4258 = vmatpush1.bf16.msra.mxu0 %v7020_v15  ;;  %4299 = vmatpush1.bf16.msra.mxu1 %v7026_v39  ;;  %v3210_v15 = vadd.f32 %v7309_v42, %v6714_v40 }
 0xdf9   :  { %4259 = vmatprep.subr.bf16.mxu0 %v7032_v32  ;;  %4300 = vmatprep.subr.bf16.mxu1 %v7038_v43  ;;  %v7310_v32 = vld [vmem:[#allocation20_spill] sm:$0xff] }
 0xdfa   :  { %v3208_v43 = vadd.f32 %v7310_v32, %v6719_v4 }
 0xdfc   :  { %4260 = vmatpush1.bf16.msra.mxu0 %v7044_v61  ;;  %4301 = vmatpush1.bf16.msra.mxu1 %v7050_v56 }
 0xdfd   :  { %4261 = vmatprep.subr.bf16.mxu0 %v7056_v2  ;;  %4302 = vmatprep.subr.bf16.mxu1 %v7062_v63 }
 0xe00   :  { %4262 = vmatpush1.bf16.msra.mxu0 %v7068_v45  ;;  %4303 = vmatpush1.bf16.msra.mxu1 %v7074_v52 }
 0xe01   :  { %4263 = vmatprep.subr.bf16.mxu0 %v7080_v30  ;;  %4304 = vmatprep.subr.bf16.mxu1 %v7086_v49 }
 0xe04   :  { %4264 = vmatpush1.bf16.msra.mxu0 %v7092_v57  ;;  %4305 = vmatpush1.bf16.msra.mxu1 %v7098_v5 }
 0xe05   :  { %4885 = vmatprep.subr.bf16.mxu0 %v7306_v51 }
 0xea7   :  { %v4168_v46 = vpop.f32.mrf.mxu0  ;;  %v4209_v13 = vpop.f32.mrf.mxu1 }
 0xea8   :  { %v4216_v14 = vadd.f32 %v4168_v46, %v3135_v1  ;;  %v4218_v61 = vadd.f32 %v4209_v13, %v3208_v43  ;;  %v7313_v13 = vld [vmem:[#allocation24_spill] sm:$0xff] }
 0xea9   :  { %v4170_v33 = vpop.f32.mrf.mxu0  ;;  %v4211_v26 = vpop.f32.mrf.mxu1  ;;  %v3214_v7 = vadd.f32 %v7313_v13, %v6714_v40 }
 0xeaa   :  { %v4861_v27 = vmul.f32 -1.442695, %v4216_v14  ;;  %v4217_v53 = vadd.f32 %v4170_v33, %v3137_v29  ;;  %v4219_v39 = vadd.f32 %v4211_v26, %v3210_v15  ;;  %v7314_v29 = vld [vmem:[#allocation22_spill] sm:$0xff] }
 0xeab   :  { %v4172_v9 = vpop.f32.mrf.mxu0  ;;  %v4213_v34 = vpop.f32.mrf.mxu1  ;;  %v3212_v14 = vadd.f32 %v7314_v29, %v6719_v4 }
 0xeac   :  { %5332 = vpow2.f32 %v4861_v27  ;;  %v4862_v47 = vmul.f32 -1.442695, %v4217_v53  ;;  %v4863_v56 = vmul.f32 -1.442695, %v4219_v39 }
 0xead   :  { %v4173_v10 = vpop.f32.mrf.mxu0  ;;  %v4214_v48 = vpop.f32.mrf.mxu1 }
 0xeae   :  { %5334 = vpow2.f32 %v4862_v47 }
 0xeaf   :  { %5336 = vtanh.f32 %v4218_v61 }
 0xeb0   :  { %5338 = vpow2.f32 %v4863_v56  ;;  %v4867_v56 = vld [vmem:[%s7215_s8] ss:$0 sm:$0xff] }
 0xeb9   :  { %v5333_v2 = vpop.eup %5332 }
 0xeba   :  { %v4223_v63 = vadd.f32 1.0, %v5333_v2 }
 0xebb   :  { %v5335_v45 = vpop.eup %5334 }
 0xebc   :  { %5340 = vrcp.f32 %v4223_v63  ;;  %v4229_v52 = vadd.f32 1.0, %v5335_v45  ;;  %v5337_v30 = vpop.eup %5336 }
 0xebd   :  { %v5339_v49 = vpop.eup %5338 }
 0xebe   :  { %5342 = vrcp.f32 %v4229_v52  ;;  %v4236_v22 = vadd.f32 1.0, %v5339_v49 }
 0xec0   :  { %5344 = vrcp.f32 %v4236_v22 }
 0xec9   :  { %v5341_v57 = vpop.eup %5340 }
 0xeca   :  { %v4240_v5 = vmul.f32 %v5341_v57, %v5337_v30 }
 0xecb   :  { %v5343_v25 = vpop.eup %5342 }
 0xecc   :  { %v4239_v35 = vmul.f32 %v5343_v25, %v7112_v12 }
 0xecd   :  { %v5345_v41 = vpop.eup %5344 }
 0xece   :  { %v7157_v44 = vadd.f32 %v4240_v5, %v4239_v35 }
 0xed0   :  { %5346 = vtanh.f32 %v7157_v44 }
 0xedd   :  { %v5347_v21 = vpop.eup %5346 }
 0xede   :  { %v4243_v24 = vmul.f32 %v5347_v21, %v5345_v41 }
 0xee0   :  { %v4248_v38 = vpack.c.bf16 %v4243_v24, %v4243_v24 }
 0xee2   :  { %4282 = vmatmul.mubr.bf16.vlgmr.msra.gmra.mxu0 %v4248_v38  ;;  %4323 = vmatmul.mubr.bf16.vlgmr.msra.gmra.mxu1 %v4248_v38 }
 0xee3   :  { %4886 = vmatpush3.bf16.msra.mxu0 %v5100_v59  ;;  %4901 = vmatprep.mubr.msk.bf16.mxu0 %vm5398_vm1, %v7306_v51 }
 0xee4   :  { %4887 = vmatprep.subr.bf16.mxu0 %v7306_v51 }
 0xee7   :  { %4888 = vmatpush3.bf16.msra.mxu0 %v5101_v37 }
 0xee8   :  { %4889 = vmatprep.subr.bf16.mxu0 %v7306_v51 }
 0xeeb   :  { %4890 = vmatpush3.bf16.msra.mxu0 %v5102_v20 }
 0xeec   :  { %4891 = vmatprep.subr.bf16.mxu0 %v7306_v51 }
 0xeef   :  { %4892 = vmatpush3.bf16.msra.mxu0 %v5103_v58 }
 0xef0   :  { %4893 = vmatprep.subr.bf16.mxu0 %v7306_v51 }
 0xef3   :  { %4894 = vmatpush3.bf16.msra.mxu0 %v5104_v18 }
 0xef4   :  { %4895 = vmatprep.subr.bf16.mxu0 %v7306_v51 }
 0xef7   :  { %4896 = vmatpush3.bf16.msra.mxu0 %v5105_v31 }
 0xef8   :  { %4897 = vmatprep.subr.bf16.mxu0 %v7306_v51 }
 0xefb   :  { %4898 = vmatpush3.bf16.msra.mxu0 %v5106_v55 }
 0xefc   :  { %4899 = vmatprep.subr.bf16.mxu0 %v7306_v51 }
 0xeff   :  { %4900 = vmatpush3.bf16.msra.mxu0 %v5107_v23 }
 0xfa2   :  { %v4283_v50 = vpop.f32.mrf.mxu0  ;;  %v4324_v60 = vpop.f32.mrf.mxu1 }
 0xfa3   :  { %v4331_v28 = vadd.f32 %v4283_v50, %v3139_v0  ;;  %v4333_v3 = vadd.f32 %v4324_v60, %v3212_v14 }
 0xfa4   :  { %v4285_v12 = vpop.f32.mrf.mxu0  ;;  %v4326_v6 = vpop.f32.mrf.mxu1 }
 0xfa5   :  { %v4864_v16 = vmul.f32 -1.442695, %v4331_v28  ;;  %v4332_v17 = vadd.f32 %v4285_v12, %v3141_v11  ;;  %v4334_v62 = vadd.f32 %v4326_v6, %v3214_v7 }
 0xfa6   :  { %v4287_v19 = vpop.f32.mrf.mxu0  ;;  %v4328_v54 = vpop.f32.mrf.mxu1 }
 0xfa7   :  { %5348 = vpow2.f32 %v4864_v16  ;;  %v4865_v1 = vmul.f32 -1.442695, %v4332_v17  ;;  %v4866_v33 = vmul.f32 -1.442695, %v4334_v62 }
 0xfa8   :  { %v4288_v46 = vpop.f32.mrf.mxu0  ;;  %v4329_v51 = vpop.f32.mrf.mxu1 }
 0xfa9   :  { %5350 = vpow2.f32 %v4865_v1 }
 0xfaa   :  { %5352 = vtanh.f32 %v4333_v3 }
 0xfab   :  { %5354 = vpow2.f32 %v4866_v33 }
 0xfb4   :  { %v5349_v26 = vpop.eup %5348 }
 0xfb5   :  { %v4338_v27 = vadd.f32 1.0, %v5349_v26 }
 0xfb6   :  { %v5351_v53 = vpop.eup %5350 }
 0xfb7   :  { %5356 = vrcp.f32 %v4338_v27  ;;  %v4344_v9 = vadd.f32 1.0, %v5351_v53  ;;  %v5353_v34 = vpop.eup %5352 }
 0xfb8   :  { %v5355_v47 = vpop.eup %5354 }
 0xfb9   :  { %5358 = vrcp.f32 %v4344_v9  ;;  %v4351_v40 = vadd.f32 1.0, %v5355_v47 }
 0xfbb   :  { %5360 = vrcp.f32 %v4351_v40 }
 0xfc4   :  { %v5357_v10 = vpop.eup %5356 }
 0xfc5   :  { %v4355_v48 = vmul.f32 %v5357_v10, %v5353_v34 }
 0xfc6   :  { %v5359_v42 = vpop.eup %5358 }
 0xfc7   :  { %v4354_v15 = vmul.f32 %v5359_v42, %v7157_v44 }
 0xfc8   :  { %v5361_v4 = vpop.eup %5360 }
 0xfc9   :  { %v4356_v39 = vadd.f32 %v4355_v48, %v4354_v15 }
 0xfcb   :  { %5362 = vtanh.f32 %v4356_v39 }
 0xfd8   :  { %v5363_v32 = vpop.eup %5362 }
 0xfd9   :  { %v4358_v43 = vmul.f32 %v5363_v32, %v5361_v4 }
 0xfdb   :  { %v4359_v61 = vpack.c.bf16 %v4358_v43, %v4358_v43 }
 0xfdd   :  { %4902 = vmatmul.mubr.bf16.vlgmr.msra.gmra.mxu0 %v4359_v61 }
0x109d   :  { %v4465_v2 = vpop.f32.mrf.mxu0 }
0x109e   :  { %v4466_v63 = vadd.f32 %v4867_v56, %v4465_v2 }
0x109f   :  { %v4903_v45 = vpop.f32.mrf.mxu0 }
0x10a0   :  { %4471 = vst [vmem:[%s7216_s9] sm:$0xff] %v4466_v63 }
0x10a1   :  { %v4468_v52 = vpop.f32.mrf.mxu0 }
0x10a3   :  { %v4904_v30 = vpop.f32.mrf.mxu0 }

</bundles_post_ra>
